<compile_context>
chip_gen: v7x
topology: tpu7x:2x2x1
jax: 0.10.0
libtpu: 0.0.40
codegen_flags: <defaults>
</compile_context>

<pallas_src>
import functools

import jax
import jax.numpy as jnp
from jax import lax
from jax.experimental import pallas as pl
from jax.experimental.pallas import tpu as pltpu

MATMUL_DTYPE = jnp.bfloat16   # MXU operand dtype; accumulation / gate math stay float32.
_LANE = 128
_SUBLANE = 8


def _round_up(x, m):
    return (x + m - 1) // m * m


def _vmem_capacity_bytes():
    """Per-generation VMEM capacity (64 MiB on v7x, 128 MiB on v5e/v6e)."""
    try:
        cap = getattr(pltpu.get_tpu_info(), "vmem_capacity_bytes", None)
        if cap:
            return int(cap)
    except Exception:
        pass
    return 64 * 1024 * 1024   # conservative default (v7x)


def _resident_spec(shape):
    """Constant-index (VMEM-resident) BlockSpec; single-buffered when supported."""
    index_map = lambda bi, ti, _n=len(shape): (0,) * _n
    try:
        return pl.BlockSpec(shape, index_map, pipeline_mode=pl.Buffered(1))
    except Exception:   # older jax without pipeline_mode kwarg
        return pl.BlockSpec(shape, index_map)


def _pick_time_block(seq_len, b_blk, dp, hp, vmem_budget, max_blk=64):
    """Largest T_blk whose VMEM footprint fits the budget (S is then padded to it)."""
    four_hp = 4 * hp
    resident = (2 * (dp + hp) * four_hp * 2      # W_ih + W_hh (bf16, worst case 2 buffers)
                + 2 * four_hp * 4                # bias (f32)
                + b_blk * hp * (2 + 4))          # h (bf16) + c (f32) state scratch
    best = 1
    for t in range(1, min(max_blk, max(seq_len, 1)) + 1):
        per_blk = (2 * t * b_blk * dp * 2        # input block, bf16, double-buffered
                   + 2 * t * b_blk * hp * 4      # output block, <=f32, double-buffered
                   + t * b_blk * four_hp * 4)    # xg scratch, f32
        if resident + per_blk <= vmem_budget:
            best = t
    return best


def _lstm_layer_kernel(x_ref, wih_ref, whh_ref, b_ref, out_ref, xg_ref, h_ref, c_ref):
    """One LSTM layer: fused input projection + serial recurrence over a time block.

    grid = (batch blocks [parallel], time blocks [arbitrary / serial]).
      x_ref  : (T_blk, Bblk, Dp)   bf16   layer input, time-major
      wih_ref: (Dp, 4Hp)           bf16   input->gates weights (VMEM-resident)
      whh_ref: (Hp, 4Hp)           bf16   hidden->gates weights (VMEM-resident)
      b_ref  : (1, 4Hp)            f32    combined bias (b_ih + b_hh)
      out_ref: (T_blk, Bblk, Hp)   bf16|f32  hidden-state outputs (lane-dense stores)
      xg_ref : (T_blk, Bblk, 4Hp)  f32    scratch: block input projection
      h_ref  : (Bblk, Hp)          bf16   scratch: hidden state, carried across time blocks
      c_ref  : (Bblk, Hp)          f32    scratch: cell state,   carried across time blocks
    """
    @pl.when(pl.program_id(1) == 0)
    def _():
        h_ref[...] = jnp.zeros_like(h_ref)
        c_ref[...] = jnp.zeros_like(c_ref)

    t_blk, b_blk, dp = x_ref.shape
    hp = h_ref.shape[1]

    # Fused input projection for the whole time block: one MXU-friendly matmul with
    # T_blk*Bblk (>=64) LHS rows; f32 result parked in VMEM scratch, never in HBM.
    x2d = x_ref[...].reshape(t_blk * b_blk, dp)
    xg = jnp.dot(x2d, wih_ref[...], preferred_element_type=jnp.float32)
    xg_ref[...] = xg.reshape(t_blk, b_blk, 4 * hp)

    whh = whh_ref[...]           # (Hp, 4Hp) bf16, loaded once per block
    bias = b_ref[...]            # (1, 4Hp)  f32, broadcast over batch rows
    # TODO(synk): a further win is weight-stationary MXU driving (pltpu.matmul_push_rhs once
    #             per block + matmul_acc_lhs/matmul_pop per step); kept on jnp.dot for
    #             lowering portability across v5e/v6e/v7x.

    def step(i, carry):
        del carry
        # Only the hidden->gates matmul is on the serial critical path.
        gates = xg_ref[i] + bias + jnp.dot(h_ref[...], whh,
                                           preferred_element_type=jnp.float32)
        # Hp is a multiple of 128 -> lane-aligned static gate slices (PyTorch order i,f,g,o).
        i_g = jax.nn.sigmoid(gates[:, 0 * hp:1 * hp])
        f_g = jax.nn.sigmoid(gates[:, 1 * hp:2 * hp])
        g_g = jnp.tanh(gates[:, 2 * hp:3 * hp])
        o_g = jax.nn.sigmoid(gates[:, 3 * hp:4 * hp])
        c_new = f_g * c_ref[...] + i_g * g_g
        h_new = o_g * jnp.tanh(c_new)
        c_ref[...] = c_new
        h_ref[...] = h_new.astype(h_ref.dtype)     # bf16 copy: next step's MXU operand
        out_ref[i] = h_new.astype(out_ref.dtype)   # lane-dense store
        return 0

    # Guard the unroll against vreg pressure (64 vregs on all generations).
    state_vregs = max(1, (b_blk // _SUBLANE) * (hp // _LANE))   # f32 vregs per (Bblk, Hp)
    if state_vregs <= 4:
        unroll = t_blk
    elif state_vregs <= 16:
        unroll = min(t_blk, 4)
    else:
        unroll = 1
    lax.fori_loop(0, t_blk, step, 0, unroll=unroll)


def _run_lstm_layer(x_tm, w_ih_t, w_hh_t, bias2d, out_dtype, t_blk, b_blk, vmem_limit):
    """x_tm: (S_pad, Bp, Dp) bf16 -> (S_pad, Bp, Hp) in out_dtype."""
    s_pad, bp, dp = x_tm.shape
    hp, four_hp = w_hh_t.shape
    nt = s_pad // t_blk
    nb = bp // b_blk

    return pl.pallas_call(
        _lstm_layer_kernel,
        out_shape=jax.ShapeDtypeStruct((s_pad, bp, hp), out_dtype),
        grid_spec=pltpu.PrefetchScalarGridSpec(
            num_scalar_prefetch=0,
            grid=(nb, nt),
            in_specs=[
                pl.BlockSpec((t_blk, b_blk, dp), lambda bi, ti: (ti, bi, 0)),
                _resident_spec((dp, four_hp)),     # W_ih (resident)
                _resident_spec((hp, four_hp)),     # W_hh (resident)
                _resident_spec((1, four_hp)),      # bias (resident)
            ],
            out_specs=pl.BlockSpec((t_blk, b_blk, hp), lambda bi, ti: (ti, bi, 0)),
            scratch_shapes=[
                pltpu.VMEM((t_blk, b_blk, four_hp), jnp.float32),   # xg block
                pltpu.VMEM((b_blk, hp), MATMUL_DTYPE),              # h state (bf16)
                pltpu.VMEM((b_blk, hp), jnp.float32),               # c state (f32)
            ],
        ),
        compiler_params=pltpu.CompilerParams(
            dimension_semantics=("parallel", "arbitrary"),   # batch parallel, time serial
            vmem_limit_bytes=vmem_limit,
        ),
    )(x_tm, w_ih_t, w_hh_t, bias2d)


def _pad_gates(a, h, hp):
    """a: (4h, ...) in PyTorch gate order [i,f,g,o]; zero-pad each gate block h -> hp."""
    a4 = a.reshape((4, h) + a.shape[1:])
    pad = [(0, 0), (0, hp - h)] + [(0, 0)] * (a.ndim - 1)
    return jnp.pad(a4, pad).reshape((4 * hp,) + a.shape[1:])


def prepare_lstm_params(raw_params, input_size, hidden_size):
    """One-time preprocessing (outside jit): pad gates/dims, transpose, cast weights bf16."""
    hp = _round_up(max(hidden_size, 1), _LANE)
    dp0 = _round_up(max(input_size, 1), _LANE)
    prepared = []
    for layer, p in enumerate(raw_params):
        d_in = input_size if layer == 0 else hidden_size
        d_in_p = dp0 if layer == 0 else hp
        w_ih = _pad_gates(p["w_ih"], hidden_size, hp)                 # (4Hp, d_in)
        w_ih = jnp.pad(w_ih, ((0, 0), (0, d_in_p - d_in)))            # (4Hp, d_in_p)
        w_hh = _pad_gates(p["w_hh"], hidden_size, hp)                 # (4Hp, H)
        w_hh = jnp.pad(w_hh, ((0, 0), (0, hp - hidden_size)))         # (4Hp, Hp)
        bias = _pad_gates(p["b_ih"] + p["b_hh"], hidden_size, hp)     # (4Hp,)
        prepared.append({
            "w_ih_t": w_ih.T.astype(MATMUL_DTYPE),                    # (d_in_p, 4Hp)
            "w_hh_t": w_hh.T.astype(MATMUL_DTYPE),                    # (Hp, 4Hp)
            "b": bias.astype(jnp.float32).reshape(1, 4 * hp),         # (1, 4Hp)
        })
    return prepared


@functools.partial(jax.jit, static_argnames=("hidden_size",))
def lstm_forward(x, prepared_params, hidden_size):
    """x: (batch, seq, input_size) -> (batch, seq, hidden_size) float32.

    Matches `x, _ = nn.LSTM(..., batch_first=True)(x)` in eval mode (no dropout).
    """
    b, s, input_size = x.shape
    hp = _round_up(max(hidden_size, 1), _LANE)
    dp0 = _round_up(max(input_size, 1), _LANE)

    # Batch padding / blocking: larger batches are split into 2 parallel blocks so v7x's two
    # TensorCores each run half the batch's recurrence (block rows stay multiples of 16 so
    # bf16 inter-layer tensors remain tile-aligned).
    if b <= _SUBLANE:
        bp, b_blk = _SUBLANE, _SUBLANE
    else:
        bp = _round_up(b, 4 * _SUBLANE)
        b_blk = bp // 2

    # Generation-aware VMEM budget -> time block size; pad S up to a multiple of it.
    cap = _vmem_capacity_bytes()
    vmem_limit = max(32 * 1024 * 1024, int(cap * 0.75))
    t_blk = _pick_time_block(s, b_blk, max(dp0, hp), hp, int(vmem_limit * 0.85))
    s_pad = _round_up(s, t_blk)

    # Layer-0 input: time-major, zero-padded, bf16 MXU operand (only layout op in wrapper).
    x_tm = jnp.transpose(x, (1, 0, 2)).astype(MATMUL_DTYPE)
    x_tm = jnp.pad(x_tm, ((0, s_pad - s), (0, bp - b), (0, dp0 - input_size)))

    n_layers = len(prepared_params)
    h_seq = x_tm
    for layer, p in enumerate(prepared_params):
        out_dtype = jnp.float32 if layer == n_layers - 1 else MATMUL_DTYPE
        h_seq = _run_lstm_layer(h_seq, p["w_ih_t"], p["w_hh_t"], p["b"],
                                out_dtype, t_blk, b_blk, vmem_limit)   # (S_pad, Bp, Hp)

    # Back to batch-first; drop time / batch / hidden padding.
    return jnp.transpose(h_seq, (1, 0, 2))[:b, :s, :hidden_size]


def init_lstm_params(key, input_size, hidden_size, num_layers):
    """Raw PyTorch-layout params with U(-1/sqrt(H), 1/sqrt(H)) init."""
    k = 1.0 / float(hidden_size) ** 0.5
    params = []
    for layer in range(num_layers):
        d_in = input_size if layer == 0 else hidden_size
        key, k1, k2, k3, k4 = jax.random.split(key, 5)
        params.append({
            "w_ih": jax.random.uniform(k1, (4 * hidden_size, d_in), jnp.float32, -k, k),
            "w_hh": jax.random.uniform(k2, (4 * hidden_size, hidden_size), jnp.float32, -k, k),
            "b_ih": jax.random.uniform(k3, (4 * hidden_size,), jnp.float32, -k, k),
            "b_hh": jax.random.uniform(k4, (4 * hidden_size,), jnp.float32, -k, k),
        })
    return params


def lstm_forward_ref(x, raw_params, hidden_size):
    """Pure-JAX lax.scan reference with the same per-step math/dtypes (no padding, no fusion)."""
    h_tm = jnp.transpose(x, (1, 0, 2)).astype(jnp.float32)   # (S, B, D)
    b = h_tm.shape[1]
    hh = hidden_size
    for p in raw_params:
        w_ih_t = p["w_ih"].T.astype(MATMUL_DTYPE)
        w_hh_t = p["w_hh"].T.astype(MATMUL_DTYPE)
        bias = (p["b_ih"] + p["b_hh"]).astype(jnp.float32)

        def step(carry, x_t, w_ih_t=w_ih_t, w_hh_t=w_hh_t, bias=bias):
            h_prev, c_prev = carry
            gates = (jnp.dot(x_t.astype(MATMUL_DTYPE), w_ih_t,
                             preferred_element_type=jnp.float32)
                     + jnp.dot(h_prev.astype(MATMUL_DTYPE), w_hh_t,
                               preferred_element_type=jnp.float32)
                     + bias)
            i_g = jax.nn.sigmoid(gates[:, 0 * hh:1 * hh])
            f_g = jax.nn.sigmoid(gates[:, 1 * hh:2 * hh])
            g_g = jnp.tanh(gates[:, 2 * hh:3 * hh])
            o_g = jax.nn.sigmoid(gates[:, 3 * hh:4 * hh])
            c = f_g * c_prev + i_g * g_g
            h = o_g * jnp.tanh(c)
            return (h, c), h

        init = (jnp.zeros((b, hh), jnp.float32), jnp.zeros((b, hh), jnp.float32))
        _, h_tm = lax.scan(step, init, h_tm)
    return jnp.transpose(h_tm, (1, 0, 2))


if __name__ == "__main__":
    # Shapes consistent with nn.LSTM(input_size, hidden_size, num_layers, batch_first=True).
    batch, seq, input_size, hidden_size, num_layers = 2, 8, 16, 32, 2

    key = jax.random.PRNGKey(0)
    key, xk, pk = jax.random.split(key, 3)
    x = jax.random.normal(xk, (batch, seq, input_size), jnp.float32)
    raw_params = init_lstm_params(pk, input_size, hidden_size, num_layers)

    # Weight preprocessing runs ONCE, outside the jitted forward.
    prepared = prepare_lstm_params(raw_params, input_size, hidden_size)
    prepared = jax.tree_util.tree_map(jax.block_until_ready, prepared)

    out = jax.block_until_ready(lstm_forward(x, prepared, hidden_size))
    ref = jax.block_until_ready(lstm_forward_ref(x, raw_params, hidden_size))

    assert out.shape == (batch, seq, hidden_size), out.shape
    err = float(jnp.max(jnp.abs(out - ref)))
    assert err < 1e-3, f"Pallas LSTM mismatch vs reference: max abs err = {err}"
    print("KERNEL_OK")
</pallas_src>

<mosaic_0001>
module attributes {stable_mosaic.version = 11 : i64} {
  func.func @_lstm_layer_kernel(%arg0: i32, %arg1: i32, %arg2: memref<8x8x128xbf16, #tpu.memory_space<vmem>>, %arg3: memref<128x512xbf16, #tpu.memory_space<vmem>>, %arg4: memref<128x512xbf16, #tpu.memory_space<vmem>>, %arg5: memref<1x512xf32, #tpu.memory_space<vmem>>, %arg6: memref<8x8x128xf32, #tpu.memory_space<vmem>>, %arg7: memref<8x8x512xf32, #tpu.memory_space<vmem>>, %arg8: memref<8x128xbf16, #tpu.memory_space<vmem>>, %arg9: memref<8x128xf32, #tpu.memory_space<vmem>>) attributes {dimension_semantics = [#tpu.dimension_semantics<parallel>, #tpu.dimension_semantics<arbitrary>], iteration_bounds = array<i64: 1, 1>, scalar_prefetch = 0 : i64, scratch_operands = 3 : i64, tpu.core_type = #tpu.core_type<tc>, window_params = [{transform_indices = @transform_0, window_bounds = array<i64: 8, 8, 128>}, {pipeline_mode = #tpu.pipeline_mode<synchronous>, transform_indices = @transform_1, window_bounds = array<i64: 128, 512>}, {pipeline_mode = #tpu.pipeline_mode<synchronous>, transform_indices = @transform_2, window_bounds = array<i64: 128, 512>}, {pipeline_mode = #tpu.pipeline_mode<synchronous>, transform_indices = @transform_3, window_bounds = array<i64: 1, 512>}, {transform_indices = @transform_4, window_bounds = array<i64: 8, 8, 128>}]} {
    %c0_i32 = arith.constant 0 : i32
    %0 = arith.cmpi eq, %arg1, %c0_i32 : i32
    %1 = arith.extui %0 : i1 to i32
    %c0_i32_0 = arith.constant 0 : i32
    %2 = arith.cmpi ne, %1, %c0_i32_0 : i32
    scf.if %2 {
      %cst_141 = arith.constant 0.000000e+00 : bf16
      %339 = vector.broadcast %cst_141 : bf16 to vector<8x128xbf16>
      %c0_142 = arith.constant 0 : index
      %c0_143 = arith.constant 0 : index
      %340 = vector.load %arg8[%c0_142, %c0_143] : memref<8x128xbf16, #tpu.memory_space<vmem>>, vector<8x128xbf16>
      tpu.vector_store %arg8[%c0_142, %c0_143], %339 {strides = array<i32>} : memref<8x128xbf16, #tpu.memory_space<vmem>>, vector<8x128xbf16>,
      %cst_144 = arith.constant 0.000000e+00 : f32
      %341 = vector.broadcast %cst_144 : f32 to vector<8x128xf32>
      %c0_145 = arith.constant 0 : index
      %c0_146 = arith.constant 0 : index
      %342 = vector.load %arg9[%c0_145, %c0_146] : memref<8x128xf32, #tpu.memory_space<vmem>>, vector<8x128xf32>
      tpu.vector_store %arg9[%c0_145, %c0_146], %341 {strides = array<i32>} : memref<8x128xf32, #tpu.memory_space<vmem>>, vector<8x128xf32>,
    } else {
    }
    %c0 = arith.constant 0 : index
    %c0_1 = arith.constant 0 : index
    %c0_2 = arith.constant 0 : index
    %3 = vector.load %arg2[%c0, %c0_1, %c0_2] : memref<8x8x128xbf16, #tpu.memory_space<vmem>>, vector<8x8x128xbf16>
    %4 = vector.shape_cast %3 : vector<8x8x128xbf16> to vector<64x128xbf16>
    %c0_3 = arith.constant 0 : index
    %c0_4 = arith.constant 0 : index
    %5 = vector.load %arg3[%c0_3, %c0_4] : memref<128x512xbf16, #tpu.memory_space<vmem>>, vector<128x512xbf16>
    %cst = arith.constant dense<0.000000e+00> : vector<64x512xf32>
    %6 = tpu.matmul %4, %5, %cst {dimension_numbers = #tpu.dot_dimension_numbers<[1], [0], [0], [1], [0, 0, 1, 1], [], []>} : vector<64x128xbf16>, vector<128x512xbf16>, vector<64x512xf32> -> vector<64x512xf32>
    %7 = vector.shape_cast %6 : vector<64x512xf32> to vector<8x8x512xf32>
    %c0_5 = arith.constant 0 : index
    %c0_6 = arith.constant 0 : index
    %c0_7 = arith.constant 0 : index
    %8 = vector.load %arg7[%c0_5, %c0_6, %c0_7] : memref<8x8x512xf32, #tpu.memory_space<vmem>>, vector<8x8x512xf32>
    tpu.vector_store %arg7[%c0_5, %c0_6, %c0_7], %7 {strides = array<i32>} : memref<8x8x512xf32, #tpu.memory_space<vmem>>, vector<8x8x512xf32>,
    %c0_8 = arith.constant 0 : index
    %c0_9 = arith.constant 0 : index
    %9 = vector.load %arg4[%c0_8, %c0_9] : memref<128x512xbf16, #tpu.memory_space<vmem>>, vector<128x512xbf16>
    %c0_10 = arith.constant 0 : index
    %c0_11 = arith.constant 0 : index
    %10 = vector.load %arg5[%c0_10, %c0_11] : memref<1x512xf32, #tpu.memory_space<vmem>>, vector<1x512xf32>
    %c0_i32_12 = arith.constant 0 : i32
    %11 = arith.index_cast %c0_i32_12 : i32 to index
    %c0_13 = arith.constant 0 : index
    %c0_14 = arith.constant 0 : index
    %12 = vector.load %arg7[%11, %c0_13, %c0_14] : memref<8x8x512xf32, #tpu.memory_space<vmem>>, vector<1x8x512xf32>
    %13 = vector.shape_cast %12 : vector<1x8x512xf32> to vector<8x512xf32>
    %14 = vector.broadcast %10 : vector<1x512xf32> to vector<8x512xf32>
    %15 = arith.addf %13, %14 : vector<8x512xf32>
    %c0_15 = arith.constant 0 : index
    %c0_16 = arith.constant 0 : index
    %16 = vector.load %arg8[%c0_15, %c0_16] : memref<8x128xbf16, #tpu.memory_space<vmem>>, vector<8x128xbf16>
    %cst_17 = arith.constant dense<0.000000e+00> : vector<8x512xf32>
    %17 = tpu.matmul %16, %9, %cst_17 {dimension_numbers = #tpu.dot_dimension_numbers<[1], [0], [0], [1], [0, 0, 1, 1], [], []>} : vector<8x128xbf16>, vector<128x512xbf16>, vector<8x512xf32> -> vector<8x512xf32>
    %18 = arith.addf %15, %17 : vector<8x512xf32>
    %19 = vector.extract_strided_slice %18 {offsets = [0, 0], sizes = [8, 128], strides = [1, 1]} : vector<8x512xf32> to vector<8x128xf32>
    %20 = arith.negf %19 : vector<8x128xf32>
    %21 = math.exp %20 : vector<8x128xf32>
    %cst_18 = arith.constant 1.000000e+00 : f32
    %22 = vector.broadcast %cst_18 : f32 to vector<8x128xf32>
    %23 = arith.addf %22, %21 : vector<8x128xf32>
    %24 = arith.divf %22, %23 : vector<8x128xf32>
    %25 = vector.extract_strided_slice %18 {offsets = [0, 128], sizes = [8, 128], strides = [1, 1]} : vector<8x512xf32> to vector<8x128xf32>
    %26 = arith.negf %25 : vector<8x128xf32>
    %27 = math.exp %26 : vector<8x128xf32>
    %cst_19 = arith.constant 1.000000e+00 : f32
    %28 = vector.broadcast %cst_19 : f32 to vector<8x128xf32>
    %29 = arith.addf %28, %27 : vector<8x128xf32>
    %30 = arith.divf %28, %29 : vector<8x128xf32>
    %31 = vector.extract_strided_slice %18 {offsets = [0, 256], sizes = [8, 128], strides = [1, 1]} : vector<8x512xf32> to vector<8x128xf32>
    %32 = math.tanh %31 : vector<8x128xf32>
    %33 = vector.extract_strided_slice %18 {offsets = [0, 384], sizes = [8, 128], strides = [1, 1]} : vector<8x512xf32> to vector<8x128xf32>
    %34 = arith.negf %33 : vector<8x128xf32>
    %35 = math.exp %34 : vector<8x128xf32>
    %cst_20 = arith.constant 1.000000e+00 : f32
    %36 = vector.broadcast %cst_20 : f32 to vector<8x128xf32>
    %37 = arith.addf %36, %35 : vector<8x128xf32>
    %38 = arith.divf %36, %37 : vector<8x128xf32>
    %c0_21 = arith.constant 0 : index
    %c0_22 = arith.constant 0 : index
    %39 = vector.load %arg9[%c0_21, %c0_22] : memref<8x128xf32, #tpu.memory_space<vmem>>, vector<8x128xf32>
    %40 = arith.mulf %30, %39 : vector<8x128xf32>
    %41 = arith.mulf %24, %32 : vector<8x128xf32>
    %42 = arith.addf %40, %41 : vector<8x128xf32>
    %43 = math.tanh %42 : vector<8x128xf32>
    %44 = arith.mulf %38, %43 : vector<8x128xf32>
    %c0_23 = arith.constant 0 : index
    %c0_24 = arith.constant 0 : index
    %45 = vector.load %arg9[%c0_23, %c0_24] : memref<8x128xf32, #tpu.memory_space<vmem>>, vector<8x128xf32>
    tpu.vector_store %arg9[%c0_23, %c0_24], %42 {strides = array<i32>} : memref<8x128xf32, #tpu.memory_space<vmem>>, vector<8x128xf32>,
    %46 = arith.truncf %44 : vector<8x128xf32> to vector<8x128xbf16>
    %c0_25 = arith.constant 0 : index
    %c0_26 = arith.constant 0 : index
    %47 = vector.load %arg8[%c0_25, %c0_26] : memref<8x128xbf16, #tpu.memory_space<vmem>>, vector<8x128xbf16>
    tpu.vector_store %arg8[%c0_25, %c0_26], %46 {strides = array<i32>} : memref<8x128xbf16, #tpu.memory_space<vmem>>, vector<8x128xbf16>,
    %48 = arith.index_cast %c0_i32_12 : i32 to index
    %c0_27 = arith.constant 0 : index
    %c0_28 = arith.constant 0 : index
    %49 = vector.load %arg6[%48, %c0_27, %c0_28] : memref<8x8x128xf32, #tpu.memory_space<vmem>>, vector<1x8x128xf32>
    %50 = vector.shape_cast %49 : vector<1x8x128xf32> to vector<8x128xf32>
    %51 = vector.shape_cast %44 : vector<8x128xf32> to vector<1x8x128xf32>
    tpu.vector_store %arg6[%48, %c0_27, %c0_28], %51 {strides = array<i32>} : memref<8x8x128xf32, #tpu.memory_space<vmem>>, vector<1x8x128xf32>,
    %c1_i32 = arith.constant 1 : i32
    %52 = arith.index_cast %c1_i32 : i32 to index
    %c0_29 = arith.constant 0 : index
    %c0_30 = arith.constant 0 : index
    %53 = vector.load %arg7[%52, %c0_29, %c0_30] : memref<8x8x512xf32, #tpu.memory_space<vmem>>, vector<1x8x512xf32>
    %54 = vector.shape_cast %53 : vector<1x8x512xf32> to vector<8x512xf32>
    %55 = vector.broadcast %10 : vector<1x512xf32> to vector<8x512xf32>
    %56 = arith.addf %54, %55 : vector<8x512xf32>
    %c0_31 = arith.constant 0 : index
    %c0_32 = arith.constant 0 : index
    %57 = vector.load %arg8[%c0_31, %c0_32] : memref<8x128xbf16, #tpu.memory_space<vmem>>, vector<8x128xbf16>
    %cst_33 = arith.constant dense<0.000000e+00> : vector<8x512xf32>
    %58 = tpu.matmul %57, %9, %cst_33 {dimension_numbers = #tpu.dot_dimension_numbers<[1], [0], [0], [1], [0, 0, 1, 1], [], []>} : vector<8x128xbf16>, vector<128x512xbf16>, vector<8x512xf32> -> vector<8x512xf32>
    %59 = arith.addf %56, %58 : vector<8x512xf32>
    %60 = vector.extract_strided_slice %59 {offsets = [0, 0], sizes = [8, 128], strides = [1, 1]} : vector<8x512xf32> to vector<8x128xf32>
    %61 = arith.negf %60 : vector<8x128xf32>
    %62 = math.exp %61 : vector<8x128xf32>
    %cst_34 = arith.constant 1.000000e+00 : f32
    %63 = vector.broadcast %cst_34 : f32 to vector<8x128xf32>
    %64 = arith.addf %63, %62 : vector<8x128xf32>
    %65 = arith.divf %63, %64 : vector<8x128xf32>
    %66 = vector.extract_strided_slice %59 {offsets = [0, 128], sizes = [8, 128], strides = [1, 1]} : vector<8x512xf32> to vector<8x128xf32>
    %67 = arith.negf %66 : vector<8x128xf32>
    %68 = math.exp %67 : vector<8x128xf32>
    %cst_35 = arith.constant 1.000000e+00 : f32
    %69 = vector.broadcast %cst_35 : f32 to vector<8x128xf32>
    %70 = arith.addf %69, %68 : vector<8x128xf32>
    %71 = arith.divf %69, %70 : vector<8x128xf32>
    %72 = vector.extract_strided_slice %59 {offsets = [0, 256], sizes = [8, 128], strides = [1, 1]} : vector<8x512xf32> to vector<8x128xf32>
    %73 = math.tanh %72 : vector<8x128xf32>
    %74 = vector.extract_strided_slice %59 {offsets = [0, 384], sizes = [8, 128], strides = [1, 1]} : vector<8x512xf32> to vector<8x128xf32>
    %75 = arith.negf %74 : vector<8x128xf32>
    %76 = math.exp %75 : vector<8x128xf32>
    %cst_36 = arith.constant 1.000000e+00 : f32
    %77 = vector.broadcast %cst_36 : f32 to vector<8x128xf32>
    %78 = arith.addf %77, %76 : vector<8x128xf32>
    %79 = arith.divf %77, %78 : vector<8x128xf32>
    %c0_37 = arith.constant 0 : index
    %c0_38 = arith.constant 0 : index
    %80 = vector.load %arg9[%c0_37, %c0_38] : memref<8x128xf32, #tpu.memory_space<vmem>>, vector<8x128xf32>
    %81 = arith.mulf %71, %80 : vector<8x128xf32>
    %82 = arith.mulf %65, %73 : vector<8x128xf32>
    %83 = arith.addf %81, %82 : vector<8x128xf32>
    %84 = math.tanh %83 : vector<8x128xf32>
    %85 = arith.mulf %79, %84 : vector<8x128xf32>
    %c0_39 = arith.constant 0 : index
    %c0_40 = arith.constant 0 : index
    %86 = vector.load %arg9[%c0_39, %c0_40] : memref<8x128xf32, #tpu.memory_space<vmem>>, vector<8x128xf32>
    tpu.vector_store %arg9[%c0_39, %c0_40], %83 {strides = array<i32>} : memref<8x128xf32, #tpu.memory_space<vmem>>, vector<8x128xf32>,
    %87 = arith.truncf %85 : vector<8x128xf32> to vector<8x128xbf16>
    %c0_41 = arith.constant 0 : index
    %c0_42 = arith.constant 0 : index
    %88 = vector.load %arg8[%c0_41, %c0_42] : memref<8x128xbf16, #tpu.memory_space<vmem>>, vector<8x128xbf16>
    tpu.vector_store %arg8[%c0_41, %c0_42], %87 {strides = array<i32>} : memref<8x128xbf16, #tpu.memory_space<vmem>>, vector<8x128xbf16>,
    %89 = arith.index_cast %c1_i32 : i32 to index
    %c0_43 = arith.constant 0 : index
    %c0_44 = arith.constant 0 : index
    %90 = vector.load %arg6[%89, %c0_43, %c0_44] : memref<8x8x128xf32, #tpu.memory_space<vmem>>, vector<1x8x128xf32>
    %91 = vector.shape_cast %90 : vector<1x8x128xf32> to vector<8x128xf32>
    %92 = vector.shape_cast %85 : vector<8x128xf32> to vector<1x8x128xf32>
    tpu.vector_store %arg6[%89, %c0_43, %c0_44], %92 {strides = array<i32>} : memref<8x8x128xf32, #tpu.memory_space<vmem>>, vector<1x8x128xf32>,
    %c2_i32 = arith.constant 2 : i32
    %93 = arith.index_cast %c2_i32 : i32 to index
    %c0_45 = arith.constant 0 : index
    %c0_46 = arith.constant 0 : index
    %94 = vector.load %arg7[%93, %c0_45, %c0_46] : memref<8x8x512xf32, #tpu.memory_space<vmem>>, vector<1x8x512xf32>
    %95 = vector.shape_cast %94 : vector<1x8x512xf32> to vector<8x512xf32>
    %96 = vector.broadcast %10 : vector<1x512xf32> to vector<8x512xf32>
    %97 = arith.addf %95, %96 : vector<8x512xf32>
    %c0_47 = arith.constant 0 : index
    %c0_48 = arith.constant 0 : index
    %98 = vector.load %arg8[%c0_47, %c0_48] : memref<8x128xbf16, #tpu.memory_space<vmem>>, vector<8x128xbf16>
    %cst_49 = arith.constant dense<0.000000e+00> : vector<8x512xf32>
    %99 = tpu.matmul %98, %9, %cst_49 {dimension_numbers = #tpu.dot_dimension_numbers<[1], [0], [0], [1], [0, 0, 1, 1], [], []>} : vector<8x128xbf16>, vector<128x512xbf16>, vector<8x512xf32> -> vector<8x512xf32>
    %100 = arith.addf %97, %99 : vector<8x512xf32>
    %101 = vector.extract_strided_slice %100 {offsets = [0, 0], sizes = [8, 128], strides = [1, 1]} : vector<8x512xf32> to vector<8x128xf32>
    %102 = arith.negf %101 : vector<8x128xf32>
    %103 = math.exp %102 : vector<8x128xf32>
    %cst_50 = arith.constant 1.000000e+00 : f32
    %104 = vector.broadcast %cst_50 : f32 to vector<8x128xf32>
    %105 = arith.addf %104, %103 : vector<8x128xf32>
    %106 = arith.divf %104, %105 : vector<8x128xf32>
    %107 = vector.extract_strided_slice %100 {offsets = [0, 128], sizes = [8, 128], strides = [1, 1]} : vector<8x512xf32> to vector<8x128xf32>
    %108 = arith.negf %107 : vector<8x128xf32>
    %109 = math.exp %108 : vector<8x128xf32>
    %cst_51 = arith.constant 1.000000e+00 : f32
    %110 = vector.broadcast %cst_51 : f32 to vector<8x128xf32>
    %111 = arith.addf %110, %109 : vector<8x128xf32>
    %112 = arith.divf %110, %111 : vector<8x128xf32>
    %113 = vector.extract_strided_slice %100 {offsets = [0, 256], sizes = [8, 128], strides = [1, 1]} : vector<8x512xf32> to vector<8x128xf32>
    %114 = math.tanh %113 : vector<8x128xf32>
    %115 = vector.extract_strided_slice %100 {offsets = [0, 384], sizes = [8, 128], strides = [1, 1]} : vector<8x512xf32> to vector<8x128xf32>
    %116 = arith.negf %115 : vector<8x128xf32>
    %117 = math.exp %116 : vector<8x128xf32>
    %cst_52 = arith.constant 1.000000e+00 : f32
    %118 = vector.broadcast %cst_52 : f32 to vector<8x128xf32>
    %119 = arith.addf %118, %117 : vector<8x128xf32>
    %120 = arith.divf %118, %119 : vector<8x128xf32>
    %c0_53 = arith.constant 0 : index
    %c0_54 = arith.constant 0 : index
    %121 = vector.load %arg9[%c0_53, %c0_54] : memref<8x128xf32, #tpu.memory_space<vmem>>, vector<8x128xf32>
    %122 = arith.mulf %112, %121 : vector<8x128xf32>
    %123 = arith.mulf %106, %114 : vector<8x128xf32>
    %124 = arith.addf %122, %123 : vector<8x128xf32>
    %125 = math.tanh %124 : vector<8x128xf32>
    %126 = arith.mulf %120, %125 : vector<8x128xf32>
    %c0_55 = arith.constant 0 : index
    %c0_56 = arith.constant 0 : index
    %127 = vector.load %arg9[%c0_55, %c0_56] : memref<8x128xf32, #tpu.memory_space<vmem>>, vector<8x128xf32>
    tpu.vector_store %arg9[%c0_55, %c0_56], %124 {strides = array<i32>} : memref<8x128xf32, #tpu.memory_space<vmem>>, vector<8x128xf32>,
    %128 = arith.truncf %126 : vector<8x128xf32> to vector<8x128xbf16>
    %c0_57 = arith.constant 0 : index
    %c0_58 = arith.constant 0 : index
    %129 = vector.load %arg8[%c0_57, %c0_58] : memref<8x128xbf16, #tpu.memory_space<vmem>>, vector<8x128xbf16>
    tpu.vector_store %arg8[%c0_57, %c0_58], %128 {strides = array<i32>} : memref<8x128xbf16, #tpu.memory_space<vmem>>, vector<8x128xbf16>,
    %130 = arith.index_cast %c2_i32 : i32 to index
    %c0_59 = arith.constant 0 : index
    %c0_60 = arith.constant 0 : index
    %131 = vector.load %arg6[%130, %c0_59, %c0_60] : memref<8x8x128xf32, #tpu.memory_space<vmem>>, vector<1x8x128xf32>
    %132 = vector.shape_cast %131 : vector<1x8x128xf32> to vector<8x128xf32>
    %133 = vector.shape_cast %126 : vector<8x128xf32> to vector<1x8x128xf32>
    tpu.vector_store %arg6[%130, %c0_59, %c0_60], %133 {strides = array<i32>} : memref<8x8x128xf32, #tpu.memory_space<vmem>>, vector<1x8x128xf32>,
    %c3_i32 = arith.constant 3 : i32
    %134 = arith.index_cast %c3_i32 : i32 to index
    %c0_61 = arith.constant 0 : index
    %c0_62 = arith.constant 0 : index
    %135 = vector.load %arg7[%134, %c0_61, %c0_62] : memref<8x8x512xf32, #tpu.memory_space<vmem>>, vector<1x8x512xf32>
    %136 = vector.shape_cast %135 : vector<1x8x512xf32> to vector<8x512xf32>
    %137 = vector.broadcast %10 : vector<1x512xf32> to vector<8x512xf32>
    %138 = arith.addf %136, %137 : vector<8x512xf32>
    %c0_63 = arith.constant 0 : index
    %c0_64 = arith.constant 0 : index
    %139 = vector.load %arg8[%c0_63, %c0_64] : memref<8x128xbf16, #tpu.memory_space<vmem>>, vector<8x128xbf16>
    %cst_65 = arith.constant dense<0.000000e+00> : vector<8x512xf32>
    %140 = tpu.matmul %139, %9, %cst_65 {dimension_numbers = #tpu.dot_dimension_numbers<[1], [0], [0], [1], [0, 0, 1, 1], [], []>} : vector<8x128xbf16>, vector<128x512xbf16>, vector<8x512xf32> -> vector<8x512xf32>
    %141 = arith.addf %138, %140 : vector<8x512xf32>
    %142 = vector.extract_strided_slice %141 {offsets = [0, 0], sizes = [8, 128], strides = [1, 1]} : vector<8x512xf32> to vector<8x128xf32>
    %143 = arith.negf %142 : vector<8x128xf32>
    %144 = math.exp %143 : vector<8x128xf32>
    %cst_66 = arith.constant 1.000000e+00 : f32
    %145 = vector.broadcast %cst_66 : f32 to vector<8x128xf32>
    %146 = arith.addf %145, %144 : vector<8x128xf32>
    %147 = arith.divf %145, %146 : vector<8x128xf32>
    %148 = vector.extract_strided_slice %141 {offsets = [0, 128], sizes = [8, 128], strides = [1, 1]} : vector<8x512xf32> to vector<8x128xf32>
    %149 = arith.negf %148 : vector<8x128xf32>
    %150 = math.exp %149 : vector<8x128xf32>
    %cst_67 = arith.constant 1.000000e+00 : f32
    %151 = vector.broadcast %cst_67 : f32 to vector<8x128xf32>
    %152 = arith.addf %151, %150 : vector<8x128xf32>
    %153 = arith.divf %151, %152 : vector<8x128xf32>
    %154 = vector.extract_strided_slice %141 {offsets = [0, 256], sizes = [8, 128], strides = [1, 1]} : vector<8x512xf32> to vector<8x128xf32>
    %155 = math.tanh %154 : vector<8x128xf32>
    %156 = vector.extract_strided_slice %141 {offsets = [0, 384], sizes = [8, 128], strides = [1, 1]} : vector<8x512xf32> to vector<8x128xf32>
    %157 = arith.negf %156 : vector<8x128xf32>
    %158 = math.exp %157 : vector<8x128xf32>
    %cst_68 = arith.constant 1.000000e+00 : f32
    %159 = vector.broadcast %cst_68 : f32 to vector<8x128xf32>
    %160 = arith.addf %159, %158 : vector<8x128xf32>
    %161 = arith.divf %159, %160 : vector<8x128xf32>
    %c0_69 = arith.constant 0 : index
    %c0_70 = arith.constant 0 : index
    %162 = vector.load %arg9[%c0_69, %c0_70] : memref<8x128xf32, #tpu.memory_space<vmem>>, vector<8x128xf32>
    %163 = arith.mulf %153, %162 : vector<8x128xf32>
    %164 = arith.mulf %147, %155 : vector<8x128xf32>
    %165 = arith.addf %163, %164 : vector<8x128xf32>
    %166 = math.tanh %165 : vector<8x128xf32>
    %167 = arith.mulf %161, %166 : vector<8x128xf32>
    %c0_71 = arith.constant 0 : index
    %c0_72 = arith.constant 0 : index
    %168 = vector.load %arg9[%c0_71, %c0_72] : memref<8x128xf32, #tpu.memory_space<vmem>>, vector<8x128xf32>
    tpu.vector_store %arg9[%c0_71, %c0_72], %165 {strides = array<i32>} : memref<8x128xf32, #tpu.memory_space<vmem>>, vector<8x128xf32>,
    %169 = arith.truncf %167 : vector<8x128xf32> to vector<8x128xbf16>
    %c0_73 = arith.constant 0 : index
    %c0_74 = arith.constant 0 : index
    %170 = vector.load %arg8[%c0_73, %c0_74] : memref<8x128xbf16, #tpu.memory_space<vmem>>, vector<8x128xbf16>
    tpu.vector_store %arg8[%c0_73, %c0_74], %169 {strides = array<i32>} : memref<8x128xbf16, #tpu.memory_space<vmem>>, vector<8x128xbf16>,
    %171 = arith.index_cast %c3_i32 : i32 to index
    %c0_75 = arith.constant 0 : index
    %c0_76 = arith.constant 0 : index
    %172 = vector.load %arg6[%171, %c0_75, %c0_76] : memref<8x8x128xf32, #tpu.memory_space<vmem>>, vector<1x8x128xf32>
    %173 = vector.shape_cast %172 : vector<1x8x128xf32> to vector<8x128xf32>
    %174 = vector.shape_cast %167 : vector<8x128xf32> to vector<1x8x128xf32>
    tpu.vector_store %arg6[%171, %c0_75, %c0_76], %174 {strides = array<i32>} : memref<8x8x128xf32, #tpu.memory_space<vmem>>, vector<1x8x128xf32>,
    %c4_i32 = arith.constant 4 : i32
    %175 = arith.index_cast %c4_i32 : i32 to index
    %c0_77 = arith.constant 0 : index
    %c0_78 = arith.constant 0 : index
    %176 = vector.load %arg7[%175, %c0_77, %c0_78] : memref<8x8x512xf32, #tpu.memory_space<vmem>>, vector<1x8x512xf32>
    %177 = vector.shape_cast %176 : vector<1x8x512xf32> to vector<8x512xf32>
    %178 = vector.broadcast %10 : vector<1x512xf32> to vector<8x512xf32>
    %179 = arith.addf %177, %178 : vector<8x512xf32>
    %c0_79 = arith.constant 0 : index
    %c0_80 = arith.constant 0 : index
    %180 = vector.load %arg8[%c0_79, %c0_80] : memref<8x128xbf16, #tpu.memory_space<vmem>>, vector<8x128xbf16>
    %cst_81 = arith.constant dense<0.000000e+00> : vector<8x512xf32>
    %181 = tpu.matmul %180, %9, %cst_81 {dimension_numbers = #tpu.dot_dimension_numbers<[1], [0], [0], [1], [0, 0, 1, 1], [], []>} : vector<8x128xbf16>, vector<128x512xbf16>, vector<8x512xf32> -> vector<8x512xf32>
    %182 = arith.addf %179, %181 : vector<8x512xf32>
    %183 = vector.extract_strided_slice %182 {offsets = [0, 0], sizes = [8, 128], strides = [1, 1]} : vector<8x512xf32> to vector<8x128xf32>
    %184 = arith.negf %183 : vector<8x128xf32>
    %185 = math.exp %184 : vector<8x128xf32>
    %cst_82 = arith.constant 1.000000e+00 : f32
    %186 = vector.broadcast %cst_82 : f32 to vector<8x128xf32>
    %187 = arith.addf %186, %185 : vector<8x128xf32>
    %188 = arith.divf %186, %187 : vector<8x128xf32>
    %189 = vector.extract_strided_slice %182 {offsets = [0, 128], sizes = [8, 128], strides = [1, 1]} : vector<8x512xf32> to vector<8x128xf32>
    %190 = arith.negf %189 : vector<8x128xf32>
    %191 = math.exp %190 : vector<8x128xf32>
    %cst_83 = arith.constant 1.000000e+00 : f32
    %192 = vector.broadcast %cst_83 : f32 to vector<8x128xf32>
    %193 = arith.addf %192, %191 : vector<8x128xf32>
    %194 = arith.divf %192, %193 : vector<8x128xf32>
    %195 = vector.extract_strided_slice %182 {offsets = [0, 256], sizes = [8, 128], strides = [1, 1]} : vector<8x512xf32> to vector<8x128xf32>
    %196 = math.tanh %195 : vector<8x128xf32>
    %197 = vector.extract_strided_slice %182 {offsets = [0, 384], sizes = [8, 128], strides = [1, 1]} : vector<8x512xf32> to vector<8x128xf32>
    %198 = arith.negf %197 : vector<8x128xf32>
    %199 = math.exp %198 : vector<8x128xf32>
    %cst_84 = arith.constant 1.000000e+00 : f32
    %200 = vector.broadcast %cst_84 : f32 to vector<8x128xf32>
    %201 = arith.addf %200, %199 : vector<8x128xf32>
    %202 = arith.divf %200, %201 : vector<8x128xf32>
    %c0_85 = arith.constant 0 : index
    %c0_86 = arith.constant 0 : index
    %203 = vector.load %arg9[%c0_85, %c0_86] : memref<8x128xf32, #tpu.memory_space<vmem>>, vector<8x128xf32>
    %204 = arith.mulf %194, %203 : vector<8x128xf32>
    %205 = arith.mulf %188, %196 : vector<8x128xf32>
    %206 = arith.addf %204, %205 : vector<8x128xf32>
    %207 = math.tanh %206 : vector<8x128xf32>
    %208 = arith.mulf %202, %207 : vector<8x128xf32>
    %c0_87 = arith.constant 0 : index
    %c0_88 = arith.constant 0 : index
    %209 = vector.load %arg9[%c0_87, %c0_88] : memref<8x128xf32, #tpu.memory_space<vmem>>, vector<8x128xf32>
    tpu.vector_store %arg9[%c0_87, %c0_88], %206 {strides = array<i32>} : memref<8x128xf32, #tpu.memory_space<vmem>>, vector<8x128xf32>,
    %210 = arith.truncf %208 : vector<8x128xf32> to vector<8x128xbf16>
    %c0_89 = arith.constant 0 : index
    %c0_90 = arith.constant 0 : index
    %211 = vector.load %arg8[%c0_89, %c0_90] : memref<8x128xbf16, #tpu.memory_space<vmem>>, vector<8x128xbf16>
    tpu.vector_store %arg8[%c0_89, %c0_90], %210 {strides = array<i32>} : memref<8x128xbf16, #tpu.memory_space<vmem>>, vector<8x128xbf16>,
    %212 = arith.index_cast %c4_i32 : i32 to index
    %c0_91 = arith.constant 0 : index
    %c0_92 = arith.constant 0 : index
    %213 = vector.load %arg6[%212, %c0_91, %c0_92] : memref<8x8x128xf32, #tpu.memory_space<vmem>>, vector<1x8x128xf32>
    %214 = vector.shape_cast %213 : vector<1x8x128xf32> to vector<8x128xf32>
    %215 = vector.shape_cast %208 : vector<8x128xf32> to vector<1x8x128xf32>
    tpu.vector_store %arg6[%212, %c0_91, %c0_92], %215 {strides = array<i32>} : memref<8x8x128xf32, #tpu.memory_space<vmem>>, vector<1x8x128xf32>,
    %c5_i32 = arith.constant 5 : i32
    %216 = arith.index_cast %c5_i32 : i32 to index
    %c0_93 = arith.constant 0 : index
    %c0_94 = arith.constant 0 : index
    %217 = vector.load %arg7[%216, %c0_93, %c0_94] : memref<8x8x512xf32, #tpu.memory_space<vmem>>, vector<1x8x512xf32>
    %218 = vector.shape_cast %217 : vector<1x8x512xf32> to vector<8x512xf32>
    %219 = vector.broadcast %10 : vector<1x512xf32> to vector<8x512xf32>
    %220 = arith.addf %218, %219 : vector<8x512xf32>
    %c0_95 = arith.constant 0 : index
    %c0_96 = arith.constant 0 : index
    %221 = vector.load %arg8[%c0_95, %c0_96] : memref<8x128xbf16, #tpu.memory_space<vmem>>, vector<8x128xbf16>
    %cst_97 = arith.constant dense<0.000000e+00> : vector<8x512xf32>
    %222 = tpu.matmul %221, %9, %cst_97 {dimension_numbers = #tpu.dot_dimension_numbers<[1], [0], [0], [1], [0, 0, 1, 1], [], []>} : vector<8x128xbf16>, vector<128x512xbf16>, vector<8x512xf32> -> vector<8x512xf32>
    %223 = arith.addf %220, %222 : vector<8x512xf32>
    %224 = vector.extract_strided_slice %223 {offsets = [0, 0], sizes = [8, 128], strides = [1, 1]} : vector<8x512xf32> to vector<8x128xf32>
    %225 = arith.negf %224 : vector<8x128xf32>
    %226 = math.exp %225 : vector<8x128xf32>
    %cst_98 = arith.constant 1.000000e+00 : f32
    %227 = vector.broadcast %cst_98 : f32 to vector<8x128xf32>
    %228 = arith.addf %227, %226 : vector<8x128xf32>
    %229 = arith.divf %227, %228 : vector<8x128xf32>
    %230 = vector.extract_strided_slice %223 {offsets = [0, 128], sizes = [8, 128], strides = [1, 1]} : vector<8x512xf32> to vector<8x128xf32>
    %231 = arith.negf %230 : vector<8x128xf32>
    %232 = math.exp %231 : vector<8x128xf32>
    %cst_99 = arith.constant 1.000000e+00 : f32
    %233 = vector.broadcast %cst_99 : f32 to vector<8x128xf32>
    %234 = arith.addf %233, %232 : vector<8x128xf32>
    %235 = arith.divf %233, %234 : vector<8x128xf32>
    %236 = vector.extract_strided_slice %223 {offsets = [0, 256], sizes = [8, 128], strides = [1, 1]} : vector<8x512xf32> to vector<8x128xf32>
    %237 = math.tanh %236 : vector<8x128xf32>
    %238 = vector.extract_strided_slice %223 {offsets = [0, 384], sizes = [8, 128], strides = [1, 1]} : vector<8x512xf32> to vector<8x128xf32>
    %239 = arith.negf %238 : vector<8x128xf32>
    %240 = math.exp %239 : vector<8x128xf32>
    %cst_100 = arith.constant 1.000000e+00 : f32
    %241 = vector.broadcast %cst_100 : f32 to vector<8x128xf32>
    %242 = arith.addf %241, %240 : vector<8x128xf32>
    %243 = arith.divf %241, %242 : vector<8x128xf32>
    %c0_101 = arith.constant 0 : index
    %c0_102 = arith.constant 0 : index
    %244 = vector.load %arg9[%c0_101, %c0_102] : memref<8x128xf32, #tpu.memory_space<vmem>>, vector<8x128xf32>
    %245 = arith.mulf %235, %244 : vector<8x128xf32>
    %246 = arith.mulf %229, %237 : vector<8x128xf32>
    %247 = arith.addf %245, %246 : vector<8x128xf32>
    %248 = math.tanh %247 : vector<8x128xf32>
    %249 = arith.mulf %243, %248 : vector<8x128xf32>
    %c0_103 = arith.constant 0 : index
    %c0_104 = arith.constant 0 : index
    %250 = vector.load %arg9[%c0_103, %c0_104] : memref<8x128xf32, #tpu.memory_space<vmem>>, vector<8x128xf32>
    tpu.vector_store %arg9[%c0_103, %c0_104], %247 {strides = array<i32>} : memref<8x128xf32, #tpu.memory_space<vmem>>, vector<8x128xf32>,
    %251 = arith.truncf %249 : vector<8x128xf32> to vector<8x128xbf16>
    %c0_105 = arith.constant 0 : index
    %c0_106 = arith.constant 0 : index
    %252 = vector.load %arg8[%c0_105, %c0_106] : memref<8x128xbf16, #tpu.memory_space<vmem>>, vector<8x128xbf16>
    tpu.vector_store %arg8[%c0_105, %c0_106], %251 {strides = array<i32>} : memref<8x128xbf16, #tpu.memory_space<vmem>>, vector<8x128xbf16>,
    %253 = arith.index_cast %c5_i32 : i32 to index
    %c0_107 = arith.constant 0 : index
    %c0_108 = arith.constant 0 : index
    %254 = vector.load %arg6[%253, %c0_107, %c0_108] : memref<8x8x128xf32, #tpu.memory_space<vmem>>, vector<1x8x128xf32>
    %255 = vector.shape_cast %254 : vector<1x8x128xf32> to vector<8x128xf32>
    %256 = vector.shape_cast %249 : vector<8x128xf32> to vector<1x8x128xf32>
    tpu.vector_store %arg6[%253, %c0_107, %c0_108], %256 {strides = array<i32>} : memref<8x8x128xf32, #tpu.memory_space<vmem>>, vector<1x8x128xf32>,
    %c6_i32 = arith.constant 6 : i32
    %257 = arith.index_cast %c6_i32 : i32 to index
    %c0_109 = arith.constant 0 : index
    %c0_110 = arith.constant 0 : index
    %258 = vector.load %arg7[%257, %c0_109, %c0_110] : memref<8x8x512xf32, #tpu.memory_space<vmem>>, vector<1x8x512xf32>
    %259 = vector.shape_cast %258 : vector<1x8x512xf32> to vector<8x512xf32>
    %260 = vector.broadcast %10 : vector<1x512xf32> to vector<8x512xf32>
    %261 = arith.addf %259, %260 : vector<8x512xf32>
    %c0_111 = arith.constant 0 : index
    %c0_112 = arith.constant 0 : index
    %262 = vector.load %arg8[%c0_111, %c0_112] : memref<8x128xbf16, #tpu.memory_space<vmem>>, vector<8x128xbf16>
    %cst_113 = arith.constant dense<0.000000e+00> : vector<8x512xf32>
    %263 = tpu.matmul %262, %9, %cst_113 {dimension_numbers = #tpu.dot_dimension_numbers<[1], [0], [0], [1], [0, 0, 1, 1], [], []>} : vector<8x128xbf16>, vector<128x512xbf16>, vector<8x512xf32> -> vector<8x512xf32>
    %264 = arith.addf %261, %263 : vector<8x512xf32>
    %265 = vector.extract_strided_slice %264 {offsets = [0, 0], sizes = [8, 128], strides = [1, 1]} : vector<8x512xf32> to vector<8x128xf32>
    %266 = arith.negf %265 : vector<8x128xf32>
    %267 = math.exp %266 : vector<8x128xf32>
    %cst_114 = arith.constant 1.000000e+00 : f32
    %268 = vector.broadcast %cst_114 : f32 to vector<8x128xf32>
    %269 = arith.addf %268, %267 : vector<8x128xf32>
    %270 = arith.divf %268, %269 : vector<8x128xf32>
    %271 = vector.extract_strided_slice %264 {offsets = [0, 128], sizes = [8, 128], strides = [1, 1]} : vector<8x512xf32> to vector<8x128xf32>
    %272 = arith.negf %271 : vector<8x128xf32>
    %273 = math.exp %272 : vector<8x128xf32>
    %cst_115 = arith.constant 1.000000e+00 : f32
    %274 = vector.broadcast %cst_115 : f32 to vector<8x128xf32>
    %275 = arith.addf %274, %273 : vector<8x128xf32>
    %276 = arith.divf %274, %275 : vector<8x128xf32>
    %277 = vector.extract_strided_slice %264 {offsets = [0, 256], sizes = [8, 128], strides = [1, 1]} : vector<8x512xf32> to vector<8x128xf32>
    %278 = math.tanh %277 : vector<8x128xf32>
    %279 = vector.extract_strided_slice %264 {offsets = [0, 384], sizes = [8, 128], strides = [1, 1]} : vector<8x512xf32> to vector<8x128xf32>
    %280 = arith.negf %279 : vector<8x128xf32>
    %281 = math.exp %280 : vector<8x128xf32>
    %cst_116 = arith.constant 1.000000e+00 : f32
    %282 = vector.broadcast %cst_116 : f32 to vector<8x128xf32>
    %283 = arith.addf %282, %281 : vector<8x128xf32>
    %284 = arith.divf %282, %283 : vector<8x128xf32>
    %c0_117 = arith.constant 0 : index
    %c0_118 = arith.constant 0 : index
    %285 = vector.load %arg9[%c0_117, %c0_118] : memref<8x128xf32, #tpu.memory_space<vmem>>, vector<8x128xf32>
    %286 = arith.mulf %276, %285 : vector<8x128xf32>
    %287 = arith.mulf %270, %278 : vector<8x128xf32>
    %288 = arith.addf %286, %287 : vector<8x128xf32>
    %289 = math.tanh %288 : vector<8x128xf32>
    %290 = arith.mulf %284, %289 : vector<8x128xf32>
    %c0_119 = arith.constant 0 : index
    %c0_120 = arith.constant 0 : index
    %291 = vector.load %arg9[%c0_119, %c0_120] : memref<8x128xf32, #tpu.memory_space<vmem>>, vector<8x128xf32>
    tpu.vector_store %arg9[%c0_119, %c0_120], %288 {strides = array<i32>} : memref<8x128xf32, #tpu.memory_space<vmem>>, vector<8x128xf32>,
    %292 = arith.truncf %290 : vector<8x128xf32> to vector<8x128xbf16>
    %c0_121 = arith.constant 0 : index
    %c0_122 = arith.constant 0 : index
    %293 = vector.load %arg8[%c0_121, %c0_122] : memref<8x128xbf16, #tpu.memory_space<vmem>>, vector<8x128xbf16>
    tpu.vector_store %arg8[%c0_121, %c0_122], %292 {strides = array<i32>} : memref<8x128xbf16, #tpu.memory_space<vmem>>, vector<8x128xbf16>,
    %294 = arith.index_cast %c6_i32 : i32 to index
    %c0_123 = arith.constant 0 : index
    %c0_124 = arith.constant 0 : index
    %295 = vector.load %arg6[%294, %c0_123, %c0_124] : memref<8x8x128xf32, #tpu.memory_space<vmem>>, vector<1x8x128xf32>
    %296 = vector.shape_cast %295 : vector<1x8x128xf32> to vector<8x128xf32>
    %297 = vector.shape_cast %290 : vector<8x128xf32> to vector<1x8x128xf32>
    tpu.vector_store %arg6[%294, %c0_123, %c0_124], %297 {strides = array<i32>} : memref<8x8x128xf32, #tpu.memory_space<vmem>>, vector<1x8x128xf32>,
    %c7_i32 = arith.constant 7 : i32
    %298 = arith.index_cast %c7_i32 : i32 to index
    %c0_125 = arith.constant 0 : index
    %c0_126 = arith.constant 0 : index
    %299 = vector.load %arg7[%298, %c0_125, %c0_126] : memref<8x8x512xf32, #tpu.memory_space<vmem>>, vector<1x8x512xf32>
    %300 = vector.shape_cast %299 : vector<1x8x512xf32> to vector<8x512xf32>
    %301 = vector.broadcast %10 : vector<1x512xf32> to vector<8x512xf32>
    %302 = arith.addf %300, %301 : vector<8x512xf32>
    %c0_127 = arith.constant 0 : index
    %c0_128 = arith.constant 0 : index
    %303 = vector.load %arg8[%c0_127, %c0_128] : memref<8x128xbf16, #tpu.memory_space<vmem>>, vector<8x128xbf16>
    %cst_129 = arith.constant dense<0.000000e+00> : vector<8x512xf32>
    %304 = tpu.matmul %303, %9, %cst_129 {dimension_numbers = #tpu.dot_dimension_numbers<[1], [0], [0], [1], [0, 0, 1, 1], [], []>} : vector<8x128xbf16>, vector<128x512xbf16>, vector<8x512xf32> -> vector<8x512xf32>
    %305 = arith.addf %302, %304 : vector<8x512xf32>
    %306 = vector.extract_strided_slice %305 {offsets = [0, 0], sizes = [8, 128], strides = [1, 1]} : vector<8x512xf32> to vector<8x128xf32>
    %307 = arith.negf %306 : vector<8x128xf32>
    %308 = math.exp %307 : vector<8x128xf32>
    %cst_130 = arith.constant 1.000000e+00 : f32
    %309 = vector.broadcast %cst_130 : f32 to vector<8x128xf32>
    %310 = arith.addf %309, %308 : vector<8x128xf32>
    %311 = arith.divf %309, %310 : vector<8x128xf32>
    %312 = vector.extract_strided_slice %305 {offsets = [0, 128], sizes = [8, 128], strides = [1, 1]} : vector<8x512xf32> to vector<8x128xf32>
    %313 = arith.negf %312 : vector<8x128xf32>
    %314 = math.exp %313 : vector<8x128xf32>
    %cst_131 = arith.constant 1.000000e+00 : f32
    %315 = vector.broadcast %cst_131 : f32 to vector<8x128xf32>
    %316 = arith.addf %315, %314 : vector<8x128xf32>
    %317 = arith.divf %315, %316 : vector<8x128xf32>
    %318 = vector.extract_strided_slice %305 {offsets = [0, 256], sizes = [8, 128], strides = [1, 1]} : vector<8x512xf32> to vector<8x128xf32>
    %319 = math.tanh %318 : vector<8x128xf32>
    %320 = vector.extract_strided_slice %305 {offsets = [0, 384], sizes = [8, 128], strides = [1, 1]} : vector<8x512xf32> to vector<8x128xf32>
    %321 = arith.negf %320 : vector<8x128xf32>
    %322 = math.exp %321 : vector<8x128xf32>
    %cst_132 = arith.constant 1.000000e+00 : f32
    %323 = vector.broadcast %cst_132 : f32 to vector<8x128xf32>
    %324 = arith.addf %323, %322 : vector<8x128xf32>
    %325 = arith.divf %323, %324 : vector<8x128xf32>
    %c0_133 = arith.constant 0 : index
    %c0_134 = arith.constant 0 : index
    %326 = vector.load %arg9[%c0_133, %c0_134] : memref<8x128xf32, #tpu.memory_space<vmem>>, vector<8x128xf32>
    %327 = arith.mulf %317, %326 : vector<8x128xf32>
    %328 = arith.mulf %311, %319 : vector<8x128xf32>
    %329 = arith.addf %327, %328 : vector<8x128xf32>
    %330 = math.tanh %329 : vector<8x128xf32>
    %331 = arith.mulf %325, %330 : vector<8x128xf32>
    %c0_135 = arith.constant 0 : index
    %c0_136 = arith.constant 0 : index
    %332 = vector.load %arg9[%c0_135, %c0_136] : memref<8x128xf32, #tpu.memory_space<vmem>>, vector<8x128xf32>
    tpu.vector_store %arg9[%c0_135, %c0_136], %329 {strides = array<i32>} : memref<8x128xf32, #tpu.memory_space<vmem>>, vector<8x128xf32>,
    %333 = arith.truncf %331 : vector<8x128xf32> to vector<8x128xbf16>
    %c0_137 = arith.constant 0 : index
    %c0_138 = arith.constant 0 : index
    %334 = vector.load %arg8[%c0_137, %c0_138] : memref<8x128xbf16, #tpu.memory_space<vmem>>, vector<8x128xbf16>
    tpu.vector_store %arg8[%c0_137, %c0_138], %333 {strides = array<i32>} : memref<8x128xbf16, #tpu.memory_space<vmem>>, vector<8x128xbf16>,
    %335 = arith.index_cast %c7_i32 : i32 to index
    %c0_139 = arith.constant 0 : index
    %c0_140 = arith.constant 0 : index
    %336 = vector.load %arg6[%335, %c0_139, %c0_140] : memref<8x8x128xf32, #tpu.memory_space<vmem>>, vector<1x8x128xf32>
    %337 = vector.shape_cast %336 : vector<1x8x128xf32> to vector<8x128xf32>
    %338 = vector.shape_cast %331 : vector<8x128xf32> to vector<1x8x128xf32>
    tpu.vector_store %arg6[%335, %c0_139, %c0_140], %338 {strides = array<i32>} : memref<8x8x128xf32, #tpu.memory_space<vmem>>, vector<1x8x128xf32>,
    %c8_i32 = arith.constant 8 : i32
    return
  }
  func.func @transform_0(%arg0: i32, %arg1: i32) -> (i32, i32, i32) {
    %c0_i32 = arith.constant 0 : i32
    %c0_i32_0 = arith.constant 0 : i32
    return %arg1, %arg0, %c0_i32 : i32, i32, i32
  }
  func.func @transform_1(%arg0: i32, %arg1: i32) -> (i32, i32) {
    %c0_i32 = arith.constant 0 : i32
    %c0_i32_0 = arith.constant 0 : i32
    %c0_i32_1 = arith.constant 0 : i32
    return %c0_i32, %c0_i32_0 : i32, i32
  }
  func.func @transform_2(%arg0: i32, %arg1: i32) -> (i32, i32) {
    %c0_i32 = arith.constant 0 : i32
    %c0_i32_0 = arith.constant 0 : i32
    %c0_i32_1 = arith.constant 0 : i32
    return %c0_i32, %c0_i32_0 : i32, i32
  }
  func.func @transform_3(%arg0: i32, %arg1: i32) -> (i32, i32) {
    %c0_i32 = arith.constant 0 : i32
    %c0_i32_0 = arith.constant 0 : i32
    %c0_i32_1 = arith.constant 0 : i32
    return %c0_i32, %c0_i32_0 : i32, i32
  }
  func.func @transform_4(%arg0: i32, %arg1: i32) -> (i32, i32, i32) {
    %c0_i32 = arith.constant 0 : i32
    %c0_i32_0 = arith.constant 0 : i32
    return %arg1, %arg0, %c0_i32 : i32, i32, i32
  }
}

module attributes {stable_mosaic.version = 11 : i64} {
  func.func @_lstm_layer_kernel(%arg0: i32, %arg1: i32, %arg2: memref<8x8x128xbf16, #tpu.memory_space<vmem>>, %arg3: memref<128x512xbf16, #tpu.memory_space<vmem>>, %arg4: memref<128x512xbf16, #tpu.memory_space<vmem>>, %arg5: memref<1x512xf32, #tpu.memory_space<vmem>>, %arg6: memref<8x8x128xbf16, #tpu.memory_space<vmem>>, %arg7: memref<8x8x512xf32, #tpu.memory_space<vmem>>, %arg8: memref<8x128xbf16, #tpu.memory_space<vmem>>, %arg9: memref<8x128xf32, #tpu.memory_space<vmem>>) attributes {dimension_semantics = [#tpu.dimension_semantics<parallel>, #tpu.dimension_semantics<arbitrary>], iteration_bounds = array<i64: 1, 1>, scalar_prefetch = 0 : i64, scratch_operands = 3 : i64, tpu.core_type = #tpu.core_type<tc>, window_params = [{transform_indices = @transform_0, window_bounds = array<i64: 8, 8, 128>}, {pipeline_mode = #tpu.pipeline_mode<synchronous>, transform_indices = @transform_1, window_bounds = array<i64: 128, 512>}, {pipeline_mode = #tpu.pipeline_mode<synchronous>, transform_indices = @transform_2, window_bounds = array<i64: 128, 512>}, {pipeline_mode = #tpu.pipeline_mode<synchronous>, transform_indices = @transform_3, window_bounds = array<i64: 1, 512>}, {transform_indices = @transform_4, window_bounds = array<i64: 8, 8, 128>}]} {
    %c0_i32 = arith.constant 0 : i32
    %0 = arith.cmpi eq, %arg1, %c0_i32 : i32
    %1 = arith.extui %0 : i1 to i32
    %c0_i32_0 = arith.constant 0 : i32
    %2 = arith.cmpi ne, %1, %c0_i32_0 : i32
    scf.if %2 {
      %cst_141 = arith.constant 0.000000e+00 : bf16
      %347 = vector.broadcast %cst_141 : bf16 to vector<8x128xbf16>
      %c0_142 = arith.constant 0 : index
      %c0_143 = arith.constant 0 : index
      %348 = vector.load %arg8[%c0_142, %c0_143] : memref<8x128xbf16, #tpu.memory_space<vmem>>, vector<8x128xbf16>
      tpu.vector_store %arg8[%c0_142, %c0_143], %347 {strides = array<i32>} : memref<8x128xbf16, #tpu.memory_space<vmem>>, vector<8x128xbf16>,
      %cst_144 = arith.constant 0.000000e+00 : f32
      %349 = vector.broadcast %cst_144 : f32 to vector<8x128xf32>
      %c0_145 = arith.constant 0 : index
      %c0_146 = arith.constant 0 : index
      %350 = vector.load %arg9[%c0_145, %c0_146] : memref<8x128xf32, #tpu.memory_space<vmem>>, vector<8x128xf32>
      tpu.vector_store %arg9[%c0_145, %c0_146], %349 {strides = array<i32>} : memref<8x128xf32, #tpu.memory_space<vmem>>, vector<8x128xf32>,
    } else {
    }
    %c0 = arith.constant 0 : index
    %c0_1 = arith.constant 0 : index
    %c0_2 = arith.constant 0 : index
    %3 = vector.load %arg2[%c0, %c0_1, %c0_2] : memref<8x8x128xbf16, #tpu.memory_space<vmem>>, vector<8x8x128xbf16>
    %4 = vector.shape_cast %3 : vector<8x8x128xbf16> to vector<64x128xbf16>
    %c0_3 = arith.constant 0 : index
    %c0_4 = arith.constant 0 : index
    %5 = vector.load %arg3[%c0_3, %c0_4] : memref<128x512xbf16, #tpu.memory_space<vmem>>, vector<128x512xbf16>
    %cst = arith.constant dense<0.000000e+00> : vector<64x512xf32>
    %6 = tpu.matmul %4, %5, %cst {dimension_numbers = #tpu.dot_dimension_numbers<[1], [0], [0], [1], [0, 0, 1, 1], [], []>} : vector<64x128xbf16>, vector<128x512xbf16>, vector<64x512xf32> -> vector<64x512xf32>
    %7 = vector.shape_cast %6 : vector<64x512xf32> to vector<8x8x512xf32>
    %c0_5 = arith.constant 0 : index
    %c0_6 = arith.constant 0 : index
    %c0_7 = arith.constant 0 : index
    %8 = vector.load %arg7[%c0_5, %c0_6, %c0_7] : memref<8x8x512xf32, #tpu.memory_space<vmem>>, vector<8x8x512xf32>
    tpu.vector_store %arg7[%c0_5, %c0_6, %c0_7], %7 {strides = array<i32>} : memref<8x8x512xf32, #tpu.memory_space<vmem>>, vector<8x8x512xf32>,
    %c0_8 = arith.constant 0 : index
    %c0_9 = arith.constant 0 : index
    %9 = vector.load %arg4[%c0_8, %c0_9] : memref<128x512xbf16, #tpu.memory_space<vmem>>, vector<128x512xbf16>
    %c0_10 = arith.constant 0 : index
    %c0_11 = arith.constant 0 : index
    %10 = vector.load %arg5[%c0_10, %c0_11] : memref<1x512xf32, #tpu.memory_space<vmem>>, vector<1x512xf32>
    %c0_i32_12 = arith.constant 0 : i32
    %11 = arith.index_cast %c0_i32_12 : i32 to index
    %c0_13 = arith.constant 0 : index
    %c0_14 = arith.constant 0 : index
    %12 = vector.load %arg7[%11, %c0_13, %c0_14] : memref<8x8x512xf32, #tpu.memory_space<vmem>>, vector<1x8x512xf32>
    %13 = vector.shape_cast %12 : vector<1x8x512xf32> to vector<8x512xf32>
    %14 = vector.broadcast %10 : vector<1x512xf32> to vector<8x512xf32>
    %15 = arith.addf %13, %14 : vector<8x512xf32>
    %c0_15 = arith.constant 0 : index
    %c0_16 = arith.constant 0 : index
    %16 = vector.load %arg8[%c0_15, %c0_16] : memref<8x128xbf16, #tpu.memory_space<vmem>>, vector<8x128xbf16>
    %cst_17 = arith.constant dense<0.000000e+00> : vector<8x512xf32>
    %17 = tpu.matmul %16, %9, %cst_17 {dimension_numbers = #tpu.dot_dimension_numbers<[1], [0], [0], [1], [0, 0, 1, 1], [], []>} : vector<8x128xbf16>, vector<128x512xbf16>, vector<8x512xf32> -> vector<8x512xf32>
    %18 = arith.addf %15, %17 : vector<8x512xf32>
    %19 = vector.extract_strided_slice %18 {offsets = [0, 0], sizes = [8, 128], strides = [1, 1]} : vector<8x512xf32> to vector<8x128xf32>
    %20 = arith.negf %19 : vector<8x128xf32>
    %21 = math.exp %20 : vector<8x128xf32>
    %cst_18 = arith.constant 1.000000e+00 : f32
    %22 = vector.broadcast %cst_18 : f32 to vector<8x128xf32>
    %23 = arith.addf %22, %21 : vector<8x128xf32>
    %24 = arith.divf %22, %23 : vector<8x128xf32>
    %25 = vector.extract_strided_slice %18 {offsets = [0, 128], sizes = [8, 128], strides = [1, 1]} : vector<8x512xf32> to vector<8x128xf32>
    %26 = arith.negf %25 : vector<8x128xf32>
    %27 = math.exp %26 : vector<8x128xf32>
    %cst_19 = arith.constant 1.000000e+00 : f32
    %28 = vector.broadcast %cst_19 : f32 to vector<8x128xf32>
    %29 = arith.addf %28, %27 : vector<8x128xf32>
    %30 = arith.divf %28, %29 : vector<8x128xf32>
    %31 = vector.extract_strided_slice %18 {offsets = [0, 256], sizes = [8, 128], strides = [1, 1]} : vector<8x512xf32> to vector<8x128xf32>
    %32 = math.tanh %31 : vector<8x128xf32>
    %33 = vector.extract_strided_slice %18 {offsets = [0, 384], sizes = [8, 128], strides = [1, 1]} : vector<8x512xf32> to vector<8x128xf32>
    %34 = arith.negf %33 : vector<8x128xf32>
    %35 = math.exp %34 : vector<8x128xf32>
    %cst_20 = arith.constant 1.000000e+00 : f32
    %36 = vector.broadcast %cst_20 : f32 to vector<8x128xf32>
    %37 = arith.addf %36, %35 : vector<8x128xf32>
    %38 = arith.divf %36, %37 : vector<8x128xf32>
    %c0_21 = arith.constant 0 : index
    %c0_22 = arith.constant 0 : index
    %39 = vector.load %arg9[%c0_21, %c0_22] : memref<8x128xf32, #tpu.memory_space<vmem>>, vector<8x128xf32>
    %40 = arith.mulf %30, %39 : vector<8x128xf32>
    %41 = arith.mulf %24, %32 : vector<8x128xf32>
    %42 = arith.addf %40, %41 : vector<8x128xf32>
    %43 = math.tanh %42 : vector<8x128xf32>
    %44 = arith.mulf %38, %43 : vector<8x128xf32>
    %c0_23 = arith.constant 0 : index
    %c0_24 = arith.constant 0 : index
    %45 = vector.load %arg9[%c0_23, %c0_24] : memref<8x128xf32, #tpu.memory_space<vmem>>, vector<8x128xf32>
    tpu.vector_store %arg9[%c0_23, %c0_24], %42 {strides = array<i32>} : memref<8x128xf32, #tpu.memory_space<vmem>>, vector<8x128xf32>,
    %46 = arith.truncf %44 : vector<8x128xf32> to vector<8x128xbf16>
    %c0_25 = arith.constant 0 : index
    %c0_26 = arith.constant 0 : index
    %47 = vector.load %arg8[%c0_25, %c0_26] : memref<8x128xbf16, #tpu.memory_space<vmem>>, vector<8x128xbf16>
    tpu.vector_store %arg8[%c0_25, %c0_26], %46 {strides = array<i32>} : memref<8x128xbf16, #tpu.memory_space<vmem>>, vector<8x128xbf16>,
    %48 = arith.truncf %44 : vector<8x128xf32> to vector<8x128xbf16>
    %49 = arith.index_cast %c0_i32_12 : i32 to index
    %c0_27 = arith.constant 0 : index
    %c0_28 = arith.constant 0 : index
    %50 = vector.load %arg6[%49, %c0_27, %c0_28] : memref<8x8x128xbf16, #tpu.memory_space<vmem>>, vector<1x8x128xbf16>
    %51 = vector.shape_cast %50 : vector<1x8x128xbf16> to vector<8x128xbf16>
    %52 = vector.shape_cast %48 : vector<8x128xbf16> to vector<1x8x128xbf16>
    tpu.vector_store %arg6[%49, %c0_27, %c0_28], %52 {strides = array<i32>} : memref<8x8x128xbf16, #tpu.memory_space<vmem>>, vector<1x8x128xbf16>,
    %c1_i32 = arith.constant 1 : i32
    %53 = arith.index_cast %c1_i32 : i32 to index
    %c0_29 = arith.constant 0 : index
    %c0_30 = arith.constant 0 : index
    %54 = vector.load %arg7[%53, %c0_29, %c0_30] : memref<8x8x512xf32, #tpu.memory_space<vmem>>, vector<1x8x512xf32>
    %55 = vector.shape_cast %54 : vector<1x8x512xf32> to vector<8x512xf32>
    %56 = vector.broadcast %10 : vector<1x512xf32> to vector<8x512xf32>
    %57 = arith.addf %55, %56 : vector<8x512xf32>
    %c0_31 = arith.constant 0 : index
    %c0_32 = arith.constant 0 : index
    %58 = vector.load %arg8[%c0_31, %c0_32] : memref<8x128xbf16, #tpu.memory_space<vmem>>, vector<8x128xbf16>
    %cst_33 = arith.constant dense<0.000000e+00> : vector<8x512xf32>
    %59 = tpu.matmul %58, %9, %cst_33 {dimension_numbers = #tpu.dot_dimension_numbers<[1], [0], [0], [1], [0, 0, 1, 1], [], []>} : vector<8x128xbf16>, vector<128x512xbf16>, vector<8x512xf32> -> vector<8x512xf32>
    %60 = arith.addf %57, %59 : vector<8x512xf32>
    %61 = vector.extract_strided_slice %60 {offsets = [0, 0], sizes = [8, 128], strides = [1, 1]} : vector<8x512xf32> to vector<8x128xf32>
    %62 = arith.negf %61 : vector<8x128xf32>
    %63 = math.exp %62 : vector<8x128xf32>
    %cst_34 = arith.constant 1.000000e+00 : f32
    %64 = vector.broadcast %cst_34 : f32 to vector<8x128xf32>
    %65 = arith.addf %64, %63 : vector<8x128xf32>
    %66 = arith.divf %64, %65 : vector<8x128xf32>
    %67 = vector.extract_strided_slice %60 {offsets = [0, 128], sizes = [8, 128], strides = [1, 1]} : vector<8x512xf32> to vector<8x128xf32>
    %68 = arith.negf %67 : vector<8x128xf32>
    %69 = math.exp %68 : vector<8x128xf32>
    %cst_35 = arith.constant 1.000000e+00 : f32
    %70 = vector.broadcast %cst_35 : f32 to vector<8x128xf32>
    %71 = arith.addf %70, %69 : vector<8x128xf32>
    %72 = arith.divf %70, %71 : vector<8x128xf32>
    %73 = vector.extract_strided_slice %60 {offsets = [0, 256], sizes = [8, 128], strides = [1, 1]} : vector<8x512xf32> to vector<8x128xf32>
    %74 = math.tanh %73 : vector<8x128xf32>
    %75 = vector.extract_strided_slice %60 {offsets = [0, 384], sizes = [8, 128], strides = [1, 1]} : vector<8x512xf32> to vector<8x128xf32>
    %76 = arith.negf %75 : vector<8x128xf32>
    %77 = math.exp %76 : vector<8x128xf32>
    %cst_36 = arith.constant 1.000000e+00 : f32
    %78 = vector.broadcast %cst_36 : f32 to vector<8x128xf32>
    %79 = arith.addf %78, %77 : vector<8x128xf32>
    %80 = arith.divf %78, %79 : vector<8x128xf32>
    %c0_37 = arith.constant 0 : index
    %c0_38 = arith.constant 0 : index
    %81 = vector.load %arg9[%c0_37, %c0_38] : memref<8x128xf32, #tpu.memory_space<vmem>>, vector<8x128xf32>
    %82 = arith.mulf %72, %81 : vector<8x128xf32>
    %83 = arith.mulf %66, %74 : vector<8x128xf32>
    %84 = arith.addf %82, %83 : vector<8x128xf32>
    %85 = math.tanh %84 : vector<8x128xf32>
    %86 = arith.mulf %80, %85 : vector<8x128xf32>
    %c0_39 = arith.constant 0 : index
    %c0_40 = arith.constant 0 : index
    %87 = vector.load %arg9[%c0_39, %c0_40] : memref<8x128xf32, #tpu.memory_space<vmem>>, vector<8x128xf32>
    tpu.vector_store %arg9[%c0_39, %c0_40], %84 {strides = array<i32>} : memref<8x128xf32, #tpu.memory_space<vmem>>, vector<8x128xf32>,
    %88 = arith.truncf %86 : vector<8x128xf32> to vector<8x128xbf16>
    %c0_41 = arith.constant 0 : index
    %c0_42 = arith.constant 0 : index
    %89 = vector.load %arg8[%c0_41, %c0_42] : memref<8x128xbf16, #tpu.memory_space<vmem>>, vector<8x128xbf16>
    tpu.vector_store %arg8[%c0_41, %c0_42], %88 {strides = array<i32>} : memref<8x128xbf16, #tpu.memory_space<vmem>>, vector<8x128xbf16>,
    %90 = arith.truncf %86 : vector<8x128xf32> to vector<8x128xbf16>
    %91 = arith.index_cast %c1_i32 : i32 to index
    %c0_43 = arith.constant 0 : index
    %c0_44 = arith.constant 0 : index
    %92 = vector.load %arg6[%91, %c0_43, %c0_44] : memref<8x8x128xbf16, #tpu.memory_space<vmem>>, vector<1x8x128xbf16>
    %93 = vector.shape_cast %92 : vector<1x8x128xbf16> to vector<8x128xbf16>
    %94 = vector.shape_cast %90 : vector<8x128xbf16> to vector<1x8x128xbf16>
    tpu.vector_store %arg6[%91, %c0_43, %c0_44], %94 {strides = array<i32>} : memref<8x8x128xbf16, #tpu.memory_space<vmem>>, vector<1x8x128xbf16>,
    %c2_i32 = arith.constant 2 : i32
    %95 = arith.index_cast %c2_i32 : i32 to index
    %c0_45 = arith.constant 0 : index
    %c0_46 = arith.constant 0 : index
    %96 = vector.load %arg7[%95, %c0_45, %c0_46] : memref<8x8x512xf32, #tpu.memory_space<vmem>>, vector<1x8x512xf32>
    %97 = vector.shape_cast %96 : vector<1x8x512xf32> to vector<8x512xf32>
    %98 = vector.broadcast %10 : vector<1x512xf32> to vector<8x512xf32>
    %99 = arith.addf %97, %98 : vector<8x512xf32>
    %c0_47 = arith.constant 0 : index
    %c0_48 = arith.constant 0 : index
    %100 = vector.load %arg8[%c0_47, %c0_48] : memref<8x128xbf16, #tpu.memory_space<vmem>>, vector<8x128xbf16>
    %cst_49 = arith.constant dense<0.000000e+00> : vector<8x512xf32>
    %101 = tpu.matmul %100, %9, %cst_49 {dimension_numbers = #tpu.dot_dimension_numbers<[1], [0], [0], [1], [0, 0, 1, 1], [], []>} : vector<8x128xbf16>, vector<128x512xbf16>, vector<8x512xf32> -> vector<8x512xf32>
    %102 = arith.addf %99, %101 : vector<8x512xf32>
    %103 = vector.extract_strided_slice %102 {offsets = [0, 0], sizes = [8, 128], strides = [1, 1]} : vector<8x512xf32> to vector<8x128xf32>
    %104 = arith.negf %103 : vector<8x128xf32>
    %105 = math.exp %104 : vector<8x128xf32>
    %cst_50 = arith.constant 1.000000e+00 : f32
    %106 = vector.broadcast %cst_50 : f32 to vector<8x128xf32>
    %107 = arith.addf %106, %105 : vector<8x128xf32>
    %108 = arith.divf %106, %107 : vector<8x128xf32>
    %109 = vector.extract_strided_slice %102 {offsets = [0, 128], sizes = [8, 128], strides = [1, 1]} : vector<8x512xf32> to vector<8x128xf32>
    %110 = arith.negf %109 : vector<8x128xf32>
    %111 = math.exp %110 : vector<8x128xf32>
    %cst_51 = arith.constant 1.000000e+00 : f32
    %112 = vector.broadcast %cst_51 : f32 to vector<8x128xf32>
    %113 = arith.addf %112, %111 : vector<8x128xf32>
    %114 = arith.divf %112, %113 : vector<8x128xf32>
    %115 = vector.extract_strided_slice %102 {offsets = [0, 256], sizes = [8, 128], strides = [1, 1]} : vector<8x512xf32> to vector<8x128xf32>
    %116 = math.tanh %115 : vector<8x128xf32>
    %117 = vector.extract_strided_slice %102 {offsets = [0, 384], sizes = [8, 128], strides = [1, 1]} : vector<8x512xf32> to vector<8x128xf32>
    %118 = arith.negf %117 : vector<8x128xf32>
    %119 = math.exp %118 : vector<8x128xf32>
    %cst_52 = arith.constant 1.000000e+00 : f32
    %120 = vector.broadcast %cst_52 : f32 to vector<8x128xf32>
    %121 = arith.addf %120, %119 : vector<8x128xf32>
    %122 = arith.divf %120, %121 : vector<8x128xf32>
    %c0_53 = arith.constant 0 : index
    %c0_54 = arith.constant 0 : index
    %123 = vector.load %arg9[%c0_53, %c0_54] : memref<8x128xf32, #tpu.memory_space<vmem>>, vector<8x128xf32>
    %124 = arith.mulf %114, %123 : vector<8x128xf32>
    %125 = arith.mulf %108, %116 : vector<8x128xf32>
    %126 = arith.addf %124, %125 : vector<8x128xf32>
    %127 = math.tanh %126 : vector<8x128xf32>
    %128 = arith.mulf %122, %127 : vector<8x128xf32>
    %c0_55 = arith.constant 0 : index
    %c0_56 = arith.constant 0 : index
    %129 = vector.load %arg9[%c0_55, %c0_56] : memref<8x128xf32, #tpu.memory_space<vmem>>, vector<8x128xf32>
    tpu.vector_store %arg9[%c0_55, %c0_56], %126 {strides = array<i32>} : memref<8x128xf32, #tpu.memory_space<vmem>>, vector<8x128xf32>,
    %130 = arith.truncf %128 : vector<8x128xf32> to vector<8x128xbf16>
    %c0_57 = arith.constant 0 : index
    %c0_58 = arith.constant 0 : index
    %131 = vector.load %arg8[%c0_57, %c0_58] : memref<8x128xbf16, #tpu.memory_space<vmem>>, vector<8x128xbf16>
    tpu.vector_store %arg8[%c0_57, %c0_58], %130 {strides = array<i32>} : memref<8x128xbf16, #tpu.memory_space<vmem>>, vector<8x128xbf16>,
    %132 = arith.truncf %128 : vector<8x128xf32> to vector<8x128xbf16>
    %133 = arith.index_cast %c2_i32 : i32 to index
    %c0_59 = arith.constant 0 : index
    %c0_60 = arith.constant 0 : index
    %134 = vector.load %arg6[%133, %c0_59, %c0_60] : memref<8x8x128xbf16, #tpu.memory_space<vmem>>, vector<1x8x128xbf16>
    %135 = vector.shape_cast %134 : vector<1x8x128xbf16> to vector<8x128xbf16>
    %136 = vector.shape_cast %132 : vector<8x128xbf16> to vector<1x8x128xbf16>
    tpu.vector_store %arg6[%133, %c0_59, %c0_60], %136 {strides = array<i32>} : memref<8x8x128xbf16, #tpu.memory_space<vmem>>, vector<1x8x128xbf16>,
    %c3_i32 = arith.constant 3 : i32
    %137 = arith.index_cast %c3_i32 : i32 to index
    %c0_61 = arith.constant 0 : index
    %c0_62 = arith.constant 0 : index
    %138 = vector.load %arg7[%137, %c0_61, %c0_62] : memref<8x8x512xf32, #tpu.memory_space<vmem>>, vector<1x8x512xf32>
    %139 = vector.shape_cast %138 : vector<1x8x512xf32> to vector<8x512xf32>
    %140 = vector.broadcast %10 : vector<1x512xf32> to vector<8x512xf32>
    %141 = arith.addf %139, %140 : vector<8x512xf32>
    %c0_63 = arith.constant 0 : index
    %c0_64 = arith.constant 0 : index
    %142 = vector.load %arg8[%c0_63, %c0_64] : memref<8x128xbf16, #tpu.memory_space<vmem>>, vector<8x128xbf16>
    %cst_65 = arith.constant dense<0.000000e+00> : vector<8x512xf32>
    %143 = tpu.matmul %142, %9, %cst_65 {dimension_numbers = #tpu.dot_dimension_numbers<[1], [0], [0], [1], [0, 0, 1, 1], [], []>} : vector<8x128xbf16>, vector<128x512xbf16>, vector<8x512xf32> -> vector<8x512xf32>
    %144 = arith.addf %141, %143 : vector<8x512xf32>
    %145 = vector.extract_strided_slice %144 {offsets = [0, 0], sizes = [8, 128], strides = [1, 1]} : vector<8x512xf32> to vector<8x128xf32>
    %146 = arith.negf %145 : vector<8x128xf32>
    %147 = math.exp %146 : vector<8x128xf32>
    %cst_66 = arith.constant 1.000000e+00 : f32
    %148 = vector.broadcast %cst_66 : f32 to vector<8x128xf32>
    %149 = arith.addf %148, %147 : vector<8x128xf32>
    %150 = arith.divf %148, %149 : vector<8x128xf32>
    %151 = vector.extract_strided_slice %144 {offsets = [0, 128], sizes = [8, 128], strides = [1, 1]} : vector<8x512xf32> to vector<8x128xf32>
    %152 = arith.negf %151 : vector<8x128xf32>
    %153 = math.exp %152 : vector<8x128xf32>
    %cst_67 = arith.constant 1.000000e+00 : f32
    %154 = vector.broadcast %cst_67 : f32 to vector<8x128xf32>
    %155 = arith.addf %154, %153 : vector<8x128xf32>
    %156 = arith.divf %154, %155 : vector<8x128xf32>
    %157 = vector.extract_strided_slice %144 {offsets = [0, 256], sizes = [8, 128], strides = [1, 1]} : vector<8x512xf32> to vector<8x128xf32>
    %158 = math.tanh %157 : vector<8x128xf32>
    %159 = vector.extract_strided_slice %144 {offsets = [0, 384], sizes = [8, 128], strides = [1, 1]} : vector<8x512xf32> to vector<8x128xf32>
    %160 = arith.negf %159 : vector<8x128xf32>
    %161 = math.exp %160 : vector<8x128xf32>
    %cst_68 = arith.constant 1.000000e+00 : f32
    %162 = vector.broadcast %cst_68 : f32 to vector<8x128xf32>
    %163 = arith.addf %162, %161 : vector<8x128xf32>
    %164 = arith.divf %162, %163 : vector<8x128xf32>
    %c0_69 = arith.constant 0 : index
    %c0_70 = arith.constant 0 : index
    %165 = vector.load %arg9[%c0_69, %c0_70] : memref<8x128xf32, #tpu.memory_space<vmem>>, vector<8x128xf32>
    %166 = arith.mulf %156, %165 : vector<8x128xf32>
    %167 = arith.mulf %150, %158 : vector<8x128xf32>
    %168 = arith.addf %166, %167 : vector<8x128xf32>
    %169 = math.tanh %168 : vector<8x128xf32>
    %170 = arith.mulf %164, %169 : vector<8x128xf32>
    %c0_71 = arith.constant 0 : index
    %c0_72 = arith.constant 0 : index
    %171 = vector.load %arg9[%c0_71, %c0_72] : memref<8x128xf32, #tpu.memory_space<vmem>>, vector<8x128xf32>
    tpu.vector_store %arg9[%c0_71, %c0_72], %168 {strides = array<i32>} : memref<8x128xf32, #tpu.memory_space<vmem>>, vector<8x128xf32>,
    %172 = arith.truncf %170 : vector<8x128xf32> to vector<8x128xbf16>
    %c0_73 = arith.constant 0 : index
    %c0_74 = arith.constant 0 : index
    %173 = vector.load %arg8[%c0_73, %c0_74] : memref<8x128xbf16, #tpu.memory_space<vmem>>, vector<8x128xbf16>
    tpu.vector_store %arg8[%c0_73, %c0_74], %172 {strides = array<i32>} : memref<8x128xbf16, #tpu.memory_space<vmem>>, vector<8x128xbf16>,
    %174 = arith.truncf %170 : vector<8x128xf32> to vector<8x128xbf16>
    %175 = arith.index_cast %c3_i32 : i32 to index
    %c0_75 = arith.constant 0 : index
    %c0_76 = arith.constant 0 : index
    %176 = vector.load %arg6[%175, %c0_75, %c0_76] : memref<8x8x128xbf16, #tpu.memory_space<vmem>>, vector<1x8x128xbf16>
    %177 = vector.shape_cast %176 : vector<1x8x128xbf16> to vector<8x128xbf16>
    %178 = vector.shape_cast %174 : vector<8x128xbf16> to vector<1x8x128xbf16>
    tpu.vector_store %arg6[%175, %c0_75, %c0_76], %178 {strides = array<i32>} : memref<8x8x128xbf16, #tpu.memory_space<vmem>>, vector<1x8x128xbf16>,
    %c4_i32 = arith.constant 4 : i32
    %179 = arith.index_cast %c4_i32 : i32 to index
    %c0_77 = arith.constant 0 : index
    %c0_78 = arith.constant 0 : index
    %180 = vector.load %arg7[%179, %c0_77, %c0_78] : memref<8x8x512xf32, #tpu.memory_space<vmem>>, vector<1x8x512xf32>
    %181 = vector.shape_cast %180 : vector<1x8x512xf32> to vector<8x512xf32>
    %182 = vector.broadcast %10 : vector<1x512xf32> to vector<8x512xf32>
    %183 = arith.addf %181, %182 : vector<8x512xf32>
    %c0_79 = arith.constant 0 : index
    %c0_80 = arith.constant 0 : index
    %184 = vector.load %arg8[%c0_79, %c0_80] : memref<8x128xbf16, #tpu.memory_space<vmem>>, vector<8x128xbf16>
    %cst_81 = arith.constant dense<0.000000e+00> : vector<8x512xf32>
    %185 = tpu.matmul %184, %9, %cst_81 {dimension_numbers = #tpu.dot_dimension_numbers<[1], [0], [0], [1], [0, 0, 1, 1], [], []>} : vector<8x128xbf16>, vector<128x512xbf16>, vector<8x512xf32> -> vector<8x512xf32>
    %186 = arith.addf %183, %185 : vector<8x512xf32>
    %187 = vector.extract_strided_slice %186 {offsets = [0, 0], sizes = [8, 128], strides = [1, 1]} : vector<8x512xf32> to vector<8x128xf32>
    %188 = arith.negf %187 : vector<8x128xf32>
    %189 = math.exp %188 : vector<8x128xf32>
    %cst_82 = arith.constant 1.000000e+00 : f32
    %190 = vector.broadcast %cst_82 : f32 to vector<8x128xf32>
    %191 = arith.addf %190, %189 : vector<8x128xf32>
    %192 = arith.divf %190, %191 : vector<8x128xf32>
    %193 = vector.extract_strided_slice %186 {offsets = [0, 128], sizes = [8, 128], strides = [1, 1]} : vector<8x512xf32> to vector<8x128xf32>
    %194 = arith.negf %193 : vector<8x128xf32>
    %195 = math.exp %194 : vector<8x128xf32>
    %cst_83 = arith.constant 1.000000e+00 : f32
    %196 = vector.broadcast %cst_83 : f32 to vector<8x128xf32>
    %197 = arith.addf %196, %195 : vector<8x128xf32>
    %198 = arith.divf %196, %197 : vector<8x128xf32>
    %199 = vector.extract_strided_slice %186 {offsets = [0, 256], sizes = [8, 128], strides = [1, 1]} : vector<8x512xf32> to vector<8x128xf32>
    %200 = math.tanh %199 : vector<8x128xf32>
    %201 = vector.extract_strided_slice %186 {offsets = [0, 384], sizes = [8, 128], strides = [1, 1]} : vector<8x512xf32> to vector<8x128xf32>
    %202 = arith.negf %201 : vector<8x128xf32>
    %203 = math.exp %202 : vector<8x128xf32>
    %cst_84 = arith.constant 1.000000e+00 : f32
    %204 = vector.broadcast %cst_84 : f32 to vector<8x128xf32>
    %205 = arith.addf %204, %203 : vector<8x128xf32>
    %206 = arith.divf %204, %205 : vector<8x128xf32>
    %c0_85 = arith.constant 0 : index
    %c0_86 = arith.constant 0 : index
    %207 = vector.load %arg9[%c0_85, %c0_86] : memref<8x128xf32, #tpu.memory_space<vmem>>, vector<8x128xf32>
    %208 = arith.mulf %198, %207 : vector<8x128xf32>
    %209 = arith.mulf %192, %200 : vector<8x128xf32>
    %210 = arith.addf %208, %209 : vector<8x128xf32>
    %211 = math.tanh %210 : vector<8x128xf32>
    %212 = arith.mulf %206, %211 : vector<8x128xf32>
    %c0_87 = arith.constant 0 : index
    %c0_88 = arith.constant 0 : index
    %213 = vector.load %arg9[%c0_87, %c0_88] : memref<8x128xf32, #tpu.memory_space<vmem>>, vector<8x128xf32>
    tpu.vector_store %arg9[%c0_87, %c0_88], %210 {strides = array<i32>} : memref<8x128xf32, #tpu.memory_space<vmem>>, vector<8x128xf32>,
    %214 = arith.truncf %212 : vector<8x128xf32> to vector<8x128xbf16>
    %c0_89 = arith.constant 0 : index
    %c0_90 = arith.constant 0 : index
    %215 = vector.load %arg8[%c0_89, %c0_90] : memref<8x128xbf16, #tpu.memory_space<vmem>>, vector<8x128xbf16>
    tpu.vector_store %arg8[%c0_89, %c0_90], %214 {strides = array<i32>} : memref<8x128xbf16, #tpu.memory_space<vmem>>, vector<8x128xbf16>,
    %216 = arith.truncf %212 : vector<8x128xf32> to vector<8x128xbf16>
    %217 = arith.index_cast %c4_i32 : i32 to index
    %c0_91 = arith.constant 0 : index
    %c0_92 = arith.constant 0 : index
    %218 = vector.load %arg6[%217, %c0_91, %c0_92] : memref<8x8x128xbf16, #tpu.memory_space<vmem>>, vector<1x8x128xbf16>
    %219 = vector.shape_cast %218 : vector<1x8x128xbf16> to vector<8x128xbf16>
    %220 = vector.shape_cast %216 : vector<8x128xbf16> to vector<1x8x128xbf16>
    tpu.vector_store %arg6[%217, %c0_91, %c0_92], %220 {strides = array<i32>} : memref<8x8x128xbf16, #tpu.memory_space<vmem>>, vector<1x8x128xbf16>,
    %c5_i32 = arith.constant 5 : i32
    %221 = arith.index_cast %c5_i32 : i32 to index
    %c0_93 = arith.constant 0 : index
    %c0_94 = arith.constant 0 : index
    %222 = vector.load %arg7[%221, %c0_93, %c0_94] : memref<8x8x512xf32, #tpu.memory_space<vmem>>, vector<1x8x512xf32>
    %223 = vector.shape_cast %222 : vector<1x8x512xf32> to vector<8x512xf32>
    %224 = vector.broadcast %10 : vector<1x512xf32> to vector<8x512xf32>
    %225 = arith.addf %223, %224 : vector<8x512xf32>
    %c0_95 = arith.constant 0 : index
    %c0_96 = arith.constant 0 : index
    %226 = vector.load %arg8[%c0_95, %c0_96] : memref<8x128xbf16, #tpu.memory_space<vmem>>, vector<8x128xbf16>
    %cst_97 = arith.constant dense<0.000000e+00> : vector<8x512xf32>
    %227 = tpu.matmul %226, %9, %cst_97 {dimension_numbers = #tpu.dot_dimension_numbers<[1], [0], [0], [1], [0, 0, 1, 1], [], []>} : vector<8x128xbf16>, vector<128x512xbf16>, vector<8x512xf32> -> vector<8x512xf32>
    %228 = arith.addf %225, %227 : vector<8x512xf32>
    %229 = vector.extract_strided_slice %228 {offsets = [0, 0], sizes = [8, 128], strides = [1, 1]} : vector<8x512xf32> to vector<8x128xf32>
    %230 = arith.negf %229 : vector<8x128xf32>
    %231 = math.exp %230 : vector<8x128xf32>
    %cst_98 = arith.constant 1.000000e+00 : f32
    %232 = vector.broadcast %cst_98 : f32 to vector<8x128xf32>
    %233 = arith.addf %232, %231 : vector<8x128xf32>
    %234 = arith.divf %232, %233 : vector<8x128xf32>
    %235 = vector.extract_strided_slice %228 {offsets = [0, 128], sizes = [8, 128], strides = [1, 1]} : vector<8x512xf32> to vector<8x128xf32>
    %236 = arith.negf %235 : vector<8x128xf32>
    %237 = math.exp %236 : vector<8x128xf32>
    %cst_99 = arith.constant 1.000000e+00 : f32
    %238 = vector.broadcast %cst_99 : f32 to vector<8x128xf32>
    %239 = arith.addf %238, %237 : vector<8x128xf32>
    %240 = arith.divf %238, %239 : vector<8x128xf32>
    %241 = vector.extract_strided_slice %228 {offsets = [0, 256], sizes = [8, 128], strides = [1, 1]} : vector<8x512xf32> to vector<8x128xf32>
    %242 = math.tanh %241 : vector<8x128xf32>
    %243 = vector.extract_strided_slice %228 {offsets = [0, 384], sizes = [8, 128], strides = [1, 1]} : vector<8x512xf32> to vector<8x128xf32>
    %244 = arith.negf %243 : vector<8x128xf32>
    %245 = math.exp %244 : vector<8x128xf32>
    %cst_100 = arith.constant 1.000000e+00 : f32
    %246 = vector.broadcast %cst_100 : f32 to vector<8x128xf32>
    %247 = arith.addf %246, %245 : vector<8x128xf32>
    %248 = arith.divf %246, %247 : vector<8x128xf32>
    %c0_101 = arith.constant 0 : index
    %c0_102 = arith.constant 0 : index
    %249 = vector.load %arg9[%c0_101, %c0_102] : memref<8x128xf32, #tpu.memory_space<vmem>>, vector<8x128xf32>
    %250 = arith.mulf %240, %249 : vector<8x128xf32>
    %251 = arith.mulf %234, %242 : vector<8x128xf32>
    %252 = arith.addf %250, %251 : vector<8x128xf32>
    %253 = math.tanh %252 : vector<8x128xf32>
    %254 = arith.mulf %248, %253 : vector<8x128xf32>
    %c0_103 = arith.constant 0 : index
    %c0_104 = arith.constant 0 : index
    %255 = vector.load %arg9[%c0_103, %c0_104] : memref<8x128xf32, #tpu.memory_space<vmem>>, vector<8x128xf32>
    tpu.vector_store %arg9[%c0_103, %c0_104], %252 {strides = array<i32>} : memref<8x128xf32, #tpu.memory_space<vmem>>, vector<8x128xf32>,
    %256 = arith.truncf %254 : vector<8x128xf32> to vector<8x128xbf16>
    %c0_105 = arith.constant 0 : index
    %c0_106 = arith.constant 0 : index
    %257 = vector.load %arg8[%c0_105, %c0_106] : memref<8x128xbf16, #tpu.memory_space<vmem>>, vector<8x128xbf16>
    tpu.vector_store %arg8[%c0_105, %c0_106], %256 {strides = array<i32>} : memref<8x128xbf16, #tpu.memory_space<vmem>>, vector<8x128xbf16>,
    %258 = arith.truncf %254 : vector<8x128xf32> to vector<8x128xbf16>
    %259 = arith.index_cast %c5_i32 : i32 to index
    %c0_107 = arith.constant 0 : index
    %c0_108 = arith.constant 0 : index
    %260 = vector.load %arg6[%259, %c0_107, %c0_108] : memref<8x8x128xbf16, #tpu.memory_space<vmem>>, vector<1x8x128xbf16>
    %261 = vector.shape_cast %260 : vector<1x8x128xbf16> to vector<8x128xbf16>
    %262 = vector.shape_cast %258 : vector<8x128xbf16> to vector<1x8x128xbf16>
    tpu.vector_store %arg6[%259, %c0_107, %c0_108], %262 {strides = array<i32>} : memref<8x8x128xbf16, #tpu.memory_space<vmem>>, vector<1x8x128xbf16>,
    %c6_i32 = arith.constant 6 : i32
    %263 = arith.index_cast %c6_i32 : i32 to index
    %c0_109 = arith.constant 0 : index
    %c0_110 = arith.constant 0 : index
    %264 = vector.load %arg7[%263, %c0_109, %c0_110] : memref<8x8x512xf32, #tpu.memory_space<vmem>>, vector<1x8x512xf32>
    %265 = vector.shape_cast %264 : vector<1x8x512xf32> to vector<8x512xf32>
    %266 = vector.broadcast %10 : vector<1x512xf32> to vector<8x512xf32>
    %267 = arith.addf %265, %266 : vector<8x512xf32>
    %c0_111 = arith.constant 0 : index
    %c0_112 = arith.constant 0 : index
    %268 = vector.load %arg8[%c0_111, %c0_112] : memref<8x128xbf16, #tpu.memory_space<vmem>>, vector<8x128xbf16>
    %cst_113 = arith.constant dense<0.000000e+00> : vector<8x512xf32>
    %269 = tpu.matmul %268, %9, %cst_113 {dimension_numbers = #tpu.dot_dimension_numbers<[1], [0], [0], [1], [0, 0, 1, 1], [], []>} : vector<8x128xbf16>, vector<128x512xbf16>, vector<8x512xf32> -> vector<8x512xf32>
    %270 = arith.addf %267, %269 : vector<8x512xf32>
    %271 = vector.extract_strided_slice %270 {offsets = [0, 0], sizes = [8, 128], strides = [1, 1]} : vector<8x512xf32> to vector<8x128xf32>
    %272 = arith.negf %271 : vector<8x128xf32>
    %273 = math.exp %272 : vector<8x128xf32>
    %cst_114 = arith.constant 1.000000e+00 : f32
    %274 = vector.broadcast %cst_114 : f32 to vector<8x128xf32>
    %275 = arith.addf %274, %273 : vector<8x128xf32>
    %276 = arith.divf %274, %275 : vector<8x128xf32>
    %277 = vector.extract_strided_slice %270 {offsets = [0, 128], sizes = [8, 128], strides = [1, 1]} : vector<8x512xf32> to vector<8x128xf32>
    %278 = arith.negf %277 : vector<8x128xf32>
    %279 = math.exp %278 : vector<8x128xf32>
    %cst_115 = arith.constant 1.000000e+00 : f32
    %280 = vector.broadcast %cst_115 : f32 to vector<8x128xf32>
    %281 = arith.addf %280, %279 : vector<8x128xf32>
    %282 = arith.divf %280, %281 : vector<8x128xf32>
    %283 = vector.extract_strided_slice %270 {offsets = [0, 256], sizes = [8, 128], strides = [1, 1]} : vector<8x512xf32> to vector<8x128xf32>
    %284 = math.tanh %283 : vector<8x128xf32>
    %285 = vector.extract_strided_slice %270 {offsets = [0, 384], sizes = [8, 128], strides = [1, 1]} : vector<8x512xf32> to vector<8x128xf32>
    %286 = arith.negf %285 : vector<8x128xf32>
    %287 = math.exp %286 : vector<8x128xf32>
    %cst_116 = arith.constant 1.000000e+00 : f32
    %288 = vector.broadcast %cst_116 : f32 to vector<8x128xf32>
    %289 = arith.addf %288, %287 : vector<8x128xf32>
    %290 = arith.divf %288, %289 : vector<8x128xf32>
    %c0_117 = arith.constant 0 : index
    %c0_118 = arith.constant 0 : index
    %291 = vector.load %arg9[%c0_117, %c0_118] : memref<8x128xf32, #tpu.memory_space<vmem>>, vector<8x128xf32>
    %292 = arith.mulf %282, %291 : vector<8x128xf32>
    %293 = arith.mulf %276, %284 : vector<8x128xf32>
    %294 = arith.addf %292, %293 : vector<8x128xf32>
    %295 = math.tanh %294 : vector<8x128xf32>
    %296 = arith.mulf %290, %295 : vector<8x128xf32>
    %c0_119 = arith.constant 0 : index
    %c0_120 = arith.constant 0 : index
    %297 = vector.load %arg9[%c0_119, %c0_120] : memref<8x128xf32, #tpu.memory_space<vmem>>, vector<8x128xf32>
    tpu.vector_store %arg9[%c0_119, %c0_120], %294 {strides = array<i32>} : memref<8x128xf32, #tpu.memory_space<vmem>>, vector<8x128xf32>,
    %298 = arith.truncf %296 : vector<8x128xf32> to vector<8x128xbf16>
    %c0_121 = arith.constant 0 : index
    %c0_122 = arith.constant 0 : index
    %299 = vector.load %arg8[%c0_121, %c0_122] : memref<8x128xbf16, #tpu.memory_space<vmem>>, vector<8x128xbf16>
    tpu.vector_store %arg8[%c0_121, %c0_122], %298 {strides = array<i32>} : memref<8x128xbf16, #tpu.memory_space<vmem>>, vector<8x128xbf16>,
    %300 = arith.truncf %296 : vector<8x128xf32> to vector<8x128xbf16>
    %301 = arith.index_cast %c6_i32 : i32 to index
    %c0_123 = arith.constant 0 : index
    %c0_124 = arith.constant 0 : index
    %302 = vector.load %arg6[%301, %c0_123, %c0_124] : memref<8x8x128xbf16, #tpu.memory_space<vmem>>, vector<1x8x128xbf16>
    %303 = vector.shape_cast %302 : vector<1x8x128xbf16> to vector<8x128xbf16>
    %304 = vector.shape_cast %300 : vector<8x128xbf16> to vector<1x8x128xbf16>
    tpu.vector_store %arg6[%301, %c0_123, %c0_124], %304 {strides = array<i32>} : memref<8x8x128xbf16, #tpu.memory_space<vmem>>, vector<1x8x128xbf16>,
    %c7_i32 = arith.constant 7 : i32
    %305 = arith.index_cast %c7_i32 : i32 to index
    %c0_125 = arith.constant 0 : index
    %c0_126 = arith.constant 0 : index
    %306 = vector.load %arg7[%305, %c0_125, %c0_126] : memref<8x8x512xf32, #tpu.memory_space<vmem>>, vector<1x8x512xf32>
    %307 = vector.shape_cast %306 : vector<1x8x512xf32> to vector<8x512xf32>
    %308 = vector.broadcast %10 : vector<1x512xf32> to vector<8x512xf32>
    %309 = arith.addf %307, %308 : vector<8x512xf32>
    %c0_127 = arith.constant 0 : index
    %c0_128 = arith.constant 0 : index
    %310 = vector.load %arg8[%c0_127, %c0_128] : memref<8x128xbf16, #tpu.memory_space<vmem>>, vector<8x128xbf16>
    %cst_129 = arith.constant dense<0.000000e+00> : vector<8x512xf32>
    %311 = tpu.matmul %310, %9, %cst_129 {dimension_numbers = #tpu.dot_dimension_numbers<[1], [0], [0], [1], [0, 0, 1, 1], [], []>} : vector<8x128xbf16>, vector<128x512xbf16>, vector<8x512xf32> -> vector<8x512xf32>
    %312 = arith.addf %309, %311 : vector<8x512xf32>
    %313 = vector.extract_strided_slice %312 {offsets = [0, 0], sizes = [8, 128], strides = [1, 1]} : vector<8x512xf32> to vector<8x128xf32>
    %314 = arith.negf %313 : vector<8x128xf32>
    %315 = math.exp %314 : vector<8x128xf32>
    %cst_130 = arith.constant 1.000000e+00 : f32
    %316 = vector.broadcast %cst_130 : f32 to vector<8x128xf32>
    %317 = arith.addf %316, %315 : vector<8x128xf32>
    %318 = arith.divf %316, %317 : vector<8x128xf32>
    %319 = vector.extract_strided_slice %312 {offsets = [0, 128], sizes = [8, 128], strides = [1, 1]} : vector<8x512xf32> to vector<8x128xf32>
    %320 = arith.negf %319 : vector<8x128xf32>
    %321 = math.exp %320 : vector<8x128xf32>
    %cst_131 = arith.constant 1.000000e+00 : f32
    %322 = vector.broadcast %cst_131 : f32 to vector<8x128xf32>
    %323 = arith.addf %322, %321 : vector<8x128xf32>
    %324 = arith.divf %322, %323 : vector<8x128xf32>
    %325 = vector.extract_strided_slice %312 {offsets = [0, 256], sizes = [8, 128], strides = [1, 1]} : vector<8x512xf32> to vector<8x128xf32>
    %326 = math.tanh %325 : vector<8x128xf32>
    %327 = vector.extract_strided_slice %312 {offsets = [0, 384], sizes = [8, 128], strides = [1, 1]} : vector<8x512xf32> to vector<8x128xf32>
    %328 = arith.negf %327 : vector<8x128xf32>
    %329 = math.exp %328 : vector<8x128xf32>
    %cst_132 = arith.constant 1.000000e+00 : f32
    %330 = vector.broadcast %cst_132 : f32 to vector<8x128xf32>
    %331 = arith.addf %330, %329 : vector<8x128xf32>
    %332 = arith.divf %330, %331 : vector<8x128xf32>
    %c0_133 = arith.constant 0 : index
    %c0_134 = arith.constant 0 : index
    %333 = vector.load %arg9[%c0_133, %c0_134] : memref<8x128xf32, #tpu.memory_space<vmem>>, vector<8x128xf32>
    %334 = arith.mulf %324, %333 : vector<8x128xf32>
    %335 = arith.mulf %318, %326 : vector<8x128xf32>
    %336 = arith.addf %334, %335 : vector<8x128xf32>
    %337 = math.tanh %336 : vector<8x128xf32>
    %338 = arith.mulf %332, %337 : vector<8x128xf32>
    %c0_135 = arith.constant 0 : index
    %c0_136 = arith.constant 0 : index
    %339 = vector.load %arg9[%c0_135, %c0_136] : memref<8x128xf32, #tpu.memory_space<vmem>>, vector<8x128xf32>
    tpu.vector_store %arg9[%c0_135, %c0_136], %336 {strides = array<i32>} : memref<8x128xf32, #tpu.memory_space<vmem>>, vector<8x128xf32>,
    %340 = arith.truncf %338 : vector<8x128xf32> to vector<8x128xbf16>
    %c0_137 = arith.constant 0 : index
    %c0_138 = arith.constant 0 : index
    %341 = vector.load %arg8[%c0_137, %c0_138] : memref<8x128xbf16, #tpu.memory_space<vmem>>, vector<8x128xbf16>
    tpu.vector_store %arg8[%c0_137, %c0_138], %340 {strides = array<i32>} : memref<8x128xbf16, #tpu.memory_space<vmem>>, vector<8x128xbf16>,
    %342 = arith.truncf %338 : vector<8x128xf32> to vector<8x128xbf16>
    %343 = arith.index_cast %c7_i32 : i32 to index
    %c0_139 = arith.constant 0 : index
    %c0_140 = arith.constant 0 : index
    %344 = vector.load %arg6[%343, %c0_139, %c0_140] : memref<8x8x128xbf16, #tpu.memory_space<vmem>>, vector<1x8x128xbf16>
    %345 = vector.shape_cast %344 : vector<1x8x128xbf16> to vector<8x128xbf16>
    %346 = vector.shape_cast %342 : vector<8x128xbf16> to vector<1x8x128xbf16>
    tpu.vector_store %arg6[%343, %c0_139, %c0_140], %346 {strides = array<i32>} : memref<8x8x128xbf16, #tpu.memory_space<vmem>>, vector<1x8x128xbf16>,
    %c8_i32 = arith.constant 8 : i32
    return
  }
  func.func @transform_0(%arg0: i32, %arg1: i32) -> (i32, i32, i32) {
    %c0_i32 = arith.constant 0 : i32
    %c0_i32_0 = arith.constant 0 : i32
    return %arg1, %arg0, %c0_i32 : i32, i32, i32
  }
  func.func @transform_1(%arg0: i32, %arg1: i32) -> (i32, i32) {
    %c0_i32 = arith.constant 0 : i32
    %c0_i32_0 = arith.constant 0 : i32
    %c0_i32_1 = arith.constant 0 : i32
    return %c0_i32, %c0_i32_0 : i32, i32
  }
  func.func @transform_2(%arg0: i32, %arg1: i32) -> (i32, i32) {
    %c0_i32 = arith.constant 0 : i32
    %c0_i32_0 = arith.constant 0 : i32
    %c0_i32_1 = arith.constant 0 : i32
    return %c0_i32, %c0_i32_0 : i32, i32
  }
  func.func @transform_3(%arg0: i32, %arg1: i32) -> (i32, i32) {
    %c0_i32 = arith.constant 0 : i32
    %c0_i32_0 = arith.constant 0 : i32
    %c0_i32_1 = arith.constant 0 : i32
    return %c0_i32, %c0_i32_0 : i32, i32
  }
  func.func @transform_4(%arg0: i32, %arg1: i32) -> (i32, i32, i32) {
    %c0_i32 = arith.constant 0 : i32
    %c0_i32_0 = arith.constant 0 : i32
    return %arg1, %arg0, %c0_i32 : i32, i32, i32
  }
}

</mosaic_0001>

<bundles_post_ra>
// kernel: lstm_forward.2
= control target key start
LH: loop header
LB: loop body
LE: loop exit
PB: predicated region body
PF: predicated region fallthrough
CT: control target
= control target key end

     0   :  { %9 = vsyncpa [#allocation6], 0  ;;  %s2722_s0 = inlined_call_operand.vmem [shape: bf16[8,8,128], index: 0, kind: input, shape index: {}]   ;;  %s2723_s1 = inlined_call_operand.hbm [shape: bf16[128,512], index: 1, kind: input, shape index: {}]   ;;  %s2724_s2 = inlined_call_operand.hbm [shape: bf16[128,512], index: 2, kind: input, shape index: {}]   ;;  %s2725_s3 = inlined_call_operand.vmem [shape: f32[1,512], index: 3, kind: input, shape index: {}]   ;;  %s2726_s4 = inlined_call_operand.vmem [shape: bf16[8,8,128], index: 4, kind: output, shape index: {}]  }
   0x1   :  { %10 = vsyncpa [#allocation8], 0  ;;  %s2092_s15 = smov [#allocation5]   ;;  %s2044_s19 = scalar_lea.hbm %s2723_s1, 4096 }
   0x2   :  { %s18_s16 = sshll.u32 %s2092_s15, 4  ;;  %p2045_p0 = scmp.ne.s32.totalorder %s2723_s1, %s2044_s19  ;;  %s19_s16 = int_to_ptr.vmem [resolvable:$true] %s18_s16 }
   0x3   :  { %p2048_p1 = scmp.lt.u32.totalorder %s2044_s19, %s2723_s1 }
   0x5   :  { %p2050_p2 = pnand %p2048_p1, %p2045_p0 }
   0x7   :  { %2053 = shalt.err (!%p2050_p2)
}
   0x8   :  { %s2054_s24 = scalar_lea.vmem %s19_s16, 4096  ;;  %p2059_p4 = scmp.lt.s32.totalorder %s19_s16, %s19_s16 }
   0x9   :  { %p2055_p3 = scmp.ne.s32.totalorder %s19_s16, %s2054_s24  ;;  %p2060_p5 = scmp.lt.s32.totalorder %s2054_s24, %s2054_s24 }
   0xb   :  { %p2061_p6 = por %p2060_p5, %p2059_p4 }
   0xd   :  { %p2062_p7 = pnand %p2061_p6, %p2055_p3 }
   0xf   :  { %2065 = shalt.err (!%p2062_p7)
}
  0x10   :  { %s2093_s25 = smov 256   ;;  %s2094_s26 = smov 16  }
  0x11   :  { %24 = dma.hbm_to_vmem [thread:$0]  %s2723_s1, 4096, %s19_s16, [#allocation6], %s2093_s25, %s2093_s25, %s2094_s26  }
  0x12   :  { %s2095_s29 = smov [#allocation7]   ;;  %s2066_s7 = scalar_lea.hbm %s2724_s2, 4096 }
  0x13   :  { %s30_s30 = sshll.u32 %s2095_s29, 4  ;;  %p2067_p8 = scmp.ne.s32.totalorder %s2724_s2, %s2066_s7  ;;  %s31_s30 = int_to_ptr.vmem [resolvable:$true] %s30_s30 }
  0x14   :  { %p2070_p9 = scmp.lt.u32.totalorder %s2066_s7, %s2724_s2 }
  0x16   :  { %p2072_p10 = pnand %p2070_p9, %p2067_p8 }
  0x18   :  { %2075 = shalt.err (!%p2072_p10)
}
  0x19   :  { %s2076_s12 = scalar_lea.vmem %s31_s30, 4096  ;;  %p2081_p12 = scmp.lt.s32.totalorder %s31_s30, %s31_s30 }
  0x1a   :  { %p2077_p11 = scmp.ne.s32.totalorder %s31_s30, %s2076_s12  ;;  %p2082_p13 = scmp.lt.s32.totalorder %s2076_s12, %s2076_s12 }
  0x1c   :  { %p2083_p0 = por %p2082_p13, %p2081_p12 }
  0x1e   :  { %p2084_p1 = pnand %p2083_p0, %p2077_p11 }
  0x20   :  { %2087 = shalt.err (!%p2084_p1)
}
  0x21   :  { %36 = dma.hbm_to_vmem [thread:$0]  %s2724_s2, 4096, %s31_s30, [#allocation8], %s2093_s25, %s2093_s25, %s2094_s26  }
  0x22   :  { %2088 = dma.done.wait [#allocation6], 4096  }
  0x23   :  { %2089 = vsyncadd [#allocation6], 4294963200 }
  0x24   :  { %2090 = dma.done.wait [#allocation8], 4096  }
  0x25   :  { %2091 = vsyncadd [#allocation8], 4294963200  ;;  %v2727_v0 = vmov 0   ;;  %v1784_v1 = vld [vmem:[#allocation5 + $0x4] ss:$16 sps:$4 sm:$0xff]   ;;  %v1832_v35 = vld [vmem:[%s2722_s0] sm:$0xff]  }
  0x26   :  { %308 = vmatprep.mubr.bf16.mxu0 %v2727_v0  ;;  %50 = vst [vmem:[#allocation3] sm:$0xf] %v2727_v0  ;;  %381 = vmatprep.mubr.bf16.mxu1 %v2727_v0  ;;  %v1786_v2 = vld [vmem:[#allocation5 + $0xc] ss:$16 sps:$4 sm:$0xff]   ;;  %v1788_v3 = vld [vmem:[#allocation5] ss:$16 sps:$4 sm:$0xff]  }
  0x27   :  { %276 = vmatprep.subr.bf16.mxu0 %v1784_v1  ;;  %v1789_v4 = vld [vmem:[#allocation5 + $0x8] ss:$16 sps:$4 sm:$0xff]   ;;  %349 = vmatprep.subr.bf16.mxu1 %v1786_v2  ;;  %v1790_v5 = vld [vmem:[#allocation5 + $0x24] ss:$16 sps:$4 sm:$0xff]   ;;  %v1792_v6 = vld [vmem:[#allocation5 + $0x2c] ss:$16 sps:$4 sm:$0xff]  }
  0x28   :  { %277 = vmatpush1.bf16.msra.mxu0 %v1788_v3  ;;  %350 = vmatpush1.bf16.msra.mxu1 %v1789_v4  ;;  %v1794_v7 = vld [vmem:[#allocation5 + $0x20] ss:$16 sps:$4 sm:$0xff]   ;;  %v1795_v8 = vld [vmem:[#allocation5 + $0x28] ss:$16 sps:$4 sm:$0xff]   ;;  %v1796_v9 = vld [vmem:[#allocation5 + $0x44] ss:$16 sps:$4 sm:$0xff]  }
  0x29   :  { %278 = vmatprep.subr.bf16.mxu0 %v1790_v5  ;;  %351 = vmatprep.subr.bf16.mxu1 %v1792_v6  ;;  %v1798_v10 = vld [vmem:[#allocation5 + $0x4c] ss:$16 sps:$4 sm:$0xff]   ;;  %v1800_v11 = vld [vmem:[#allocation5 + $0x40] ss:$16 sps:$4 sm:$0xff]   ;;  %v1801_v12 = vld [vmem:[#allocation5 + $0x48] ss:$16 sps:$4 sm:$0xff]  }
  0x2a   :  { %v1802_v13 = vld [vmem:[#allocation5 + $0x64] ss:$16 sps:$4 sm:$0xff]   ;;  %v1804_v14 = vld [vmem:[#allocation5 + $0x6c] ss:$16 sps:$4 sm:$0xff]   ;;  %v1806_v15 = vld [vmem:[#allocation5 + $0x60] ss:$16 sps:$4 sm:$0xff]  }
  0x2b   :  { %v1807_v16 = vld [vmem:[#allocation5 + $0x68] ss:$16 sps:$4 sm:$0xff]   ;;  %v1808_v17 = vld [vmem:[#allocation5 + $0x84] ss:$16 sps:$4 sm:$0xff]   ;;  %v1810_v18 = vld [vmem:[#allocation5 + $0x8c] ss:$16 sps:$4 sm:$0xff]  }
  0x2c   :  { %279 = vmatpush1.bf16.msra.mxu0 %v1794_v7  ;;  %352 = vmatpush1.bf16.msra.mxu1 %v1795_v8  ;;  %v1812_v19 = vld [vmem:[#allocation5 + $0x80] ss:$16 sps:$4 sm:$0xff]   ;;  %v1813_v20 = vld [vmem:[#allocation5 + $0x88] ss:$16 sps:$4 sm:$0xff]   ;;  %v1814_v21 = vld [vmem:[#allocation5 + $0xa4] ss:$16 sps:$4 sm:$0xff]   ;;  %v492_v7 = vlaneseq }
  0x2d   :  { %280 = vmatprep.subr.bf16.mxu0 %v1796_v9  ;;  %353 = vmatprep.subr.bf16.mxu1 %v1798_v10  ;;  %v1816_v22 = vld [vmem:[#allocation5 + $0xac] ss:$16 sps:$4 sm:$0xff]   ;;  %v1818_v23 = vld [vmem:[#allocation5 + $0xa0] ss:$16 sps:$4 sm:$0xff]   ;;  %v1819_v24 = vld [vmem:[#allocation5 + $0xa8] ss:$16 sps:$4 sm:$0xff]  }
  0x2e   :  { %v1820_v25 = vld [vmem:[#allocation5 + $0xc4] ss:$16 sps:$4 sm:$0xff]   ;;  %v1822_v26 = vld [vmem:[#allocation5 + $0xcc] ss:$16 sps:$4 sm:$0xff]   ;;  %v1824_v27 = vld [vmem:[#allocation5 + $0xc0] ss:$16 sps:$4 sm:$0xff]  }
  0x2f   :  { %v1825_v28 = vld [vmem:[#allocation5 + $0xc8] ss:$16 sps:$4 sm:$0xff]   ;;  %v1826_v29 = vld [vmem:[#allocation5 + $0xe4] ss:$16 sps:$4 sm:$0xff]   ;;  %v1828_v30 = vld [vmem:[#allocation5 + $0xec] ss:$16 sps:$4 sm:$0xff]  }
  0x30   :  { %281 = vmatpush1.bf16.msra.mxu0 %v1800_v11  ;;  %354 = vmatpush1.bf16.msra.mxu1 %v1801_v12  ;;  %v1830_v31 = vld [vmem:[#allocation5 + $0xe0] ss:$16 sps:$4 sm:$0xff]   ;;  %v1831_v32 = vld [vmem:[#allocation5 + $0xe8] ss:$16 sps:$4 sm:$0xff]   ;;  %v2149_v33 = vld [vmem:[#allocation7 + $0x4] ss:$16 sps:$4 sm:$0xff]  }
  0x31   :  { %282 = vmatprep.subr.bf16.mxu0 %v1802_v13  ;;  %355 = vmatprep.subr.bf16.mxu1 %v1804_v14  ;;  %v2151_v34 = vld [vmem:[#allocation7 + $0xc] ss:$16 sps:$4 sm:$0xff]   ;;  %v2156_v36 = vld [vmem:[#allocation7] ss:$16 sps:$4 sm:$0xff]   ;;  %v2158_v37 = vld [vmem:[#allocation7 + $0x8] ss:$16 sps:$4 sm:$0xff]  }
  0x32   :  { %v2162_v38 = vld [vmem:[#allocation7 + $0x24] ss:$16 sps:$4 sm:$0xff]   ;;  %v2164_v39 = vld [vmem:[#allocation7 + $0x2c] ss:$16 sps:$4 sm:$0xff]   ;;  %v2166_v40 = vld [vmem:[#allocation7 + $0x20] ss:$16 sps:$4 sm:$0xff]  }
  0x33   :  { %v2170_v41 = vld [vmem:[#allocation7 + $0x28] ss:$16 sps:$4 sm:$0xff]   ;;  %v2174_v42 = vld [vmem:[#allocation7 + $0x44] ss:$16 sps:$4 sm:$0xff]   ;;  %v2176_v43 = vld [vmem:[#allocation7 + $0x4c] ss:$16 sps:$4 sm:$0xff]  }
  0x34   :  { %283 = vmatpush1.bf16.msra.mxu0 %v1806_v15  ;;  %356 = vmatpush1.bf16.msra.mxu1 %v1807_v16  ;;  %v1845_v44 = vld [vmem:[%s2722_s0 + $0x8] sm:$0xff]   ;;  %v2183_v45 = vld [vmem:[#allocation7 + $0x40] ss:$16 sps:$4 sm:$0xff]   ;;  %v2193_v48 = vld [vmem:[#allocation7 + $0x6c] ss:$16 sps:$4 sm:$0xff]   ;;  %v493_v8 = vshrl.u32 %v492_v7, 7 }
  0x35   :  { %284 = vmatprep.subr.bf16.mxu0 %v1808_v17  ;;  %357 = vmatprep.subr.bf16.mxu1 %v1810_v18  ;;  %v2185_v46 = vld [vmem:[#allocation7 + $0x48] ss:$16 sps:$4 sm:$0xff]   ;;  %v2189_v47 = vld [vmem:[#allocation7 + $0x64] ss:$16 sps:$4 sm:$0xff]   ;;  %v2195_v49 = vld [vmem:[#allocation7 + $0x60] ss:$16 sps:$4 sm:$0xff]  }
  0x36   :  { %v2197_v50 = vld [vmem:[#allocation7 + $0x68] ss:$16 sps:$4 sm:$0xff]   ;;  %v2201_v51 = vld [vmem:[#allocation7 + $0x84] ss:$16 sps:$4 sm:$0xff]   ;;  %v2205_v52 = vld [vmem:[#allocation7 + $0x8c] ss:$16 sps:$4 sm:$0xff]  }
  0x37   :  { %v1858_v53 = vld [vmem:[%s2722_s0 + $0x10] sm:$0xff]   ;;  %v2216_v55 = vld [vmem:[#allocation7 + $0x88] ss:$16 sps:$4 sm:$0xff]   ;;  %v2220_v56 = vld [vmem:[#allocation7 + $0xa4] ss:$16 sps:$4 sm:$0xff]   ;;  %v502_v9 = vsub.s32 2, %v493_v8 }
  0x38   :  { %285 = vmatpush1.bf16.msra.mxu0 %v1812_v19  ;;  %358 = vmatpush1.bf16.msra.mxu1 %v1813_v20  ;;  %v2214_v54 = vld [vmem:[#allocation7 + $0x80] ss:$16 sps:$4 sm:$0xff]   ;;  %v2222_v57 = vld [vmem:[#allocation7 + $0xac] ss:$16 sps:$4 sm:$0xff]   ;;  %v2228_v59 = vld [vmem:[#allocation7 + $0xa8] ss:$16 sps:$4 sm:$0xff]  }
  0x39   :  { %286 = vmatprep.subr.bf16.mxu0 %v1814_v21  ;;  %359 = vmatprep.subr.bf16.mxu1 %v1816_v22  ;;  %v2226_v58 = vld [vmem:[#allocation7 + $0xa0] ss:$16 sps:$4 sm:$0xff]   ;;  %v2232_v60 = vld [vmem:[#allocation7 + $0xc4] ss:$16 sps:$4 sm:$0xff]   ;;  %v2234_v61 = vld [vmem:[#allocation7 + $0xcc] ss:$16 sps:$4 sm:$0xff]  }
  0x3a   :  { %v1871_v62 = vld [vmem:[%s2722_s0 + $0x18] sm:$0xff]   ;;  %v2243_v63 = vld [vmem:[#allocation7 + $0xc0] ss:$16 sps:$4 sm:$0xff]   ;;  %v2251_v3 = vld [vmem:[#allocation7 + $0xec] ss:$16 sps:$4 sm:$0xff]   ;;  %v506_v10 = vsub.s32 3, %v493_v8 }
  0x3b   :  { %v2245_v1 = vld [vmem:[#allocation7 + $0xc8] ss:$16 sps:$4 sm:$0xff]   ;;  %v2249_v2 = vld [vmem:[#allocation7 + $0xe4] ss:$16 sps:$4 sm:$0xff]   ;;  %v2255_v4 = vld [vmem:[#allocation7 + $0xe0] ss:$16 sps:$4 sm:$0xff]  }
  0x3c   :  { %287 = vmatpush1.bf16.msra.mxu0 %v1818_v23  ;;  %360 = vmatpush1.bf16.msra.mxu1 %v1819_v24  ;;  %v2257_v5 = vld [vmem:[#allocation7 + $0xe8] ss:$16 sps:$4 sm:$0xff]   ;;  %v516_v6 = vld [vmem:[#allocation3] sm:$0xf]  ;;  %v494_v11 = vsub.s32 0, %v493_v8  ;;  %v498_v13 = vsub.s32 1, %v493_v8 }
  0x3d   :  { %288 = vmatprep.subr.bf16.mxu0 %v1820_v25  ;;  %361 = vmatprep.subr.bf16.mxu1 %v1822_v26  ;;  %v486_v12 = vld [vmem:[%s2725_s3] sm:$0xf] }
  0x3e   :  { %v2304_v14 = vrot.slane %v486_v12, %v502_v9  ;;  %v2310_v17 = vrot.slane %v486_v12, %v506_v10  ;;  %v495_v18 = vrot.slane %v486_v12, %v494_v11  ;;  %v499_v21 = vrot.slane %v486_v12, %v498_v13 }
  0x40   :  { %289 = vmatpush1.bf16.msra.mxu0 %v1824_v27  ;;  %362 = vmatpush1.bf16.msra.mxu1 %v1825_v28 }
  0x41   :  { %290 = vmatprep.subr.bf16.mxu0 %v1826_v29  ;;  %363 = vmatprep.subr.bf16.mxu1 %v1828_v30 }
  0x44   :  { %291 = vmatpush1.bf16.msra.mxu0 %v1830_v31  ;;  %364 = vmatpush1.bf16.msra.mxu1 %v1831_v32 }
  0x45   :  { %677 = vmatprep.subr.bf16.mxu0 %v2149_v33  ;;  %718 = vmatprep.subr.bf16.mxu1 %v2151_v34 }
  0x47   :  { %309 = vmatmul.mubr.bf16.vlgmr.msra.gmra.mrb[0].mxu0 %v1832_v35  ;;  %382 = vmatmul.mubr.bf16.vlgmr.msra.gmra.mrb[0].mxu1 %v1832_v35 }
  0x48   :  { %678 = vmatpush1.bf16.msra.mxu0 %v2156_v36  ;;  %719 = vmatpush1.bf16.msra.mxu1 %v2158_v37 }
  0x49   :  { %679 = vmatprep.subr.bf16.mxu0 %v2162_v38  ;;  %720 = vmatprep.subr.bf16.mxu1 %v2164_v39 }
  0x4a   :  { %318 = vmatprep.mubr.bf16.mxu0 %v2727_v0  ;;  %391 = vmatprep.mubr.bf16.mxu1 %v2727_v0 }
  0x4c   :  { %680 = vmatpush1.bf16.msra.mxu0 %v2166_v40  ;;  %721 = vmatpush1.bf16.msra.mxu1 %v2170_v41 }
  0x4d   :  { %681 = vmatprep.subr.bf16.mxu0 %v2174_v42  ;;  %722 = vmatprep.subr.bf16.mxu1 %v2176_v43 }
  0x4f   :  { %319 = vmatmul.mubr.bf16.gmra.mrb[4].mxu0 %v1845_v44  ;;  %392 = vmatmul.mubr.bf16.gmra.mrb[4].mxu1 %v1845_v44 }
  0x50   :  { %682 = vmatpush1.bf16.msra.mxu0 %v2183_v45  ;;  %723 = vmatpush1.bf16.msra.mxu1 %v2185_v46 }
  0x51   :  { %683 = vmatprep.subr.bf16.mxu0 %v2189_v47  ;;  %724 = vmatprep.subr.bf16.mxu1 %v2193_v48 }
  0x52   :  { %328 = vmatprep.mubr.bf16.mxu0 %v2727_v0  ;;  %401 = vmatprep.mubr.bf16.mxu1 %v2727_v0 }
  0x54   :  { %684 = vmatpush1.bf16.msra.mxu0 %v2195_v49  ;;  %725 = vmatpush1.bf16.msra.mxu1 %v2197_v50 }
  0x55   :  { %685 = vmatprep.subr.bf16.mxu0 %v2201_v51  ;;  %726 = vmatprep.subr.bf16.mxu1 %v2205_v52 }
  0x57   :  { %329 = vmatmul.mubr.bf16.gmra.mrb[8].mxu0 %v1858_v53  ;;  %402 = vmatmul.mubr.bf16.gmra.mrb[8].mxu1 %v1858_v53 }
  0x58   :  { %686 = vmatpush1.bf16.msra.mxu0 %v2214_v54  ;;  %727 = vmatpush1.bf16.msra.mxu1 %v2216_v55 }
  0x59   :  { %687 = vmatprep.subr.bf16.mxu0 %v2220_v56  ;;  %728 = vmatprep.subr.bf16.mxu1 %v2222_v57 }
  0x5a   :  { %338 = vmatprep.mubr.bf16.mxu0 %v2727_v0  ;;  %411 = vmatprep.mubr.bf16.mxu1 %v2727_v0 }
  0x5c   :  { %688 = vmatpush1.bf16.msra.mxu0 %v2226_v58  ;;  %729 = vmatpush1.bf16.msra.mxu1 %v2228_v59 }
  0x5d   :  { %689 = vmatprep.subr.bf16.mxu0 %v2232_v60  ;;  %730 = vmatprep.subr.bf16.mxu1 %v2234_v61 }
  0x5f   :  { %339 = vmatmul.mubr.bf16.gmra.mrb[12].mxu0 %v1871_v62  ;;  %412 = vmatmul.mubr.bf16.gmra.mrb[12].mxu1 %v1871_v62 }
  0x60   :  { %690 = vmatpush1.bf16.msra.mxu0 %v2243_v63  ;;  %731 = vmatpush1.bf16.msra.mxu1 %v2245_v1 }
  0x61   :  { %691 = vmatprep.subr.bf16.mxu0 %v2249_v2  ;;  %732 = vmatprep.subr.bf16.mxu1 %v2251_v3 }
  0x62   :  { %709 = vmatprep.mubr.bf16.mxu0 %v2727_v0  ;;  %750 = vmatprep.mubr.bf16.mxu1 %v2727_v0 }
  0x64   :  { %692 = vmatpush1.bf16.msra.mxu0 %v2255_v4  ;;  %733 = vmatpush1.bf16.msra.mxu1 %v2257_v5 }
  0x65   :  { %802 = vmatprep.subr.bf16.mxu0 %v2149_v33  ;;  %843 = vmatprep.subr.bf16.mxu1 %v2151_v34 }
  0x67   :  { %710 = vmatmul.mubr.bf16.vlgmr.msra.gmra.mrb[16].mxu0 %v516_v6  ;;  %751 = vmatmul.mubr.bf16.vlgmr.msra.gmra.mrb[16].mxu1 %v516_v6 }
  0x68   :  { %803 = vmatpush1.bf16.msra.mxu0 %v2156_v36  ;;  %844 = vmatpush1.bf16.msra.mxu1 %v2158_v37 }
  0x69   :  { %804 = vmatprep.subr.bf16.mxu0 %v2162_v38  ;;  %845 = vmatprep.subr.bf16.mxu1 %v2164_v39 }
  0x6a   :  { %834 = vmatprep.mubr.bf16.mxu0 %v2727_v0  ;;  %875 = vmatprep.mubr.bf16.mxu1 %v2727_v0 }
  0x6c   :  { %805 = vmatpush1.bf16.msra.mxu0 %v2166_v40  ;;  %846 = vmatpush1.bf16.msra.mxu1 %v2170_v41 }
  0x6d   :  { %806 = vmatprep.subr.bf16.mxu0 %v2174_v42  ;;  %847 = vmatprep.subr.bf16.mxu1 %v2176_v43 }
  0x70   :  { %807 = vmatpush1.bf16.msra.mxu0 %v2183_v45  ;;  %848 = vmatpush1.bf16.msra.mxu1 %v2185_v46 }
  0x71   :  { %808 = vmatprep.subr.bf16.mxu0 %v2189_v47  ;;  %849 = vmatprep.subr.bf16.mxu1 %v2193_v48 }
  0x74   :  { %809 = vmatpush1.bf16.msra.mxu0 %v2195_v49  ;;  %850 = vmatpush1.bf16.msra.mxu1 %v2197_v50 }
  0x75   :  { %810 = vmatprep.subr.bf16.mxu0 %v2201_v51  ;;  %851 = vmatprep.subr.bf16.mxu1 %v2205_v52 }
  0x78   :  { %811 = vmatpush1.bf16.msra.mxu0 %v2214_v54  ;;  %852 = vmatpush1.bf16.msra.mxu1 %v2216_v55 }
  0x79   :  { %812 = vmatprep.subr.bf16.mxu0 %v2220_v56  ;;  %853 = vmatprep.subr.bf16.mxu1 %v2222_v57 }
  0x7c   :  { %813 = vmatpush1.bf16.msra.mxu0 %v2226_v58  ;;  %854 = vmatpush1.bf16.msra.mxu1 %v2228_v59 }
  0x7d   :  { %814 = vmatprep.subr.bf16.mxu0 %v2232_v60  ;;  %855 = vmatprep.subr.bf16.mxu1 %v2234_v61 }
  0x80   :  { %815 = vmatpush1.bf16.msra.mxu0 %v2243_v63  ;;  %856 = vmatpush1.bf16.msra.mxu1 %v2245_v1 }
  0x81   :  { %816 = vmatprep.subr.bf16.mxu0 %v2249_v2  ;;  %857 = vmatprep.subr.bf16.mxu1 %v2251_v3 }
  0x84   :  { %817 = vmatpush1.bf16.msra.mxu0 %v2255_v4  ;;  %858 = vmatpush1.bf16.msra.mxu1 %v2257_v5 }
  0x85   :  { %928 = vmatprep.subr.bf16.mxu0 %v2149_v33  ;;  %969 = vmatprep.subr.bf16.mxu1 %v2151_v34 }
 0x11a   :  { %v2306_v15 = vpop.f32.mrb[0].mxu0  ;;  %v2308_v16 = vpop.f32.mrb[0].mxu1 }
 0x11b   :  { %v312_v19 = vpop.f32.mrb[1].mxu0  ;;  %v385_v20 = vpop.f32.mrb[1].mxu1 }
 0x11c   :  { %v314_v22 = vpop.f32.mrb[2].mxu0  ;;  %v387_v23 = vpop.f32.mrb[2].mxu1 }
 0x11d   :  { %v2312_v24 = vadd.f32 %v495_v18, %v314_v22  ;;  %v316_v25 = vpop.f32.mrb[3].mxu0  ;;  %v2315_v26 = vadd.f32 %v2304_v14, %v387_v23  ;;  %v389_v27 = vpop.f32.mrb[3].mxu1 }
 0x11e   :  { %v2317_v28 = vadd.f32 %v499_v21, %v316_v25  ;;  %v2320_v29 = vadd.f32 %v2310_v17, %v389_v27 }
 0x122   :  { %v320_v30 = vpop.f32.mrb[4].mxu0  ;;  %v393_v31 = vpop.f32.mrb[4].mxu1 }
 0x123   :  { %v2322_v32 = vadd.f32 %v495_v18, %v320_v30  ;;  %v322_v35 = vpop.f32.mrb[5].mxu0  ;;  %v2325_v44 = vadd.f32 %v2304_v14, %v393_v31  ;;  %v395_v53 = vpop.f32.mrb[5].mxu1 }
 0x124   :  { %v2327_v62 = vadd.f32 %v499_v21, %v322_v35  ;;  %v324_v6 = vpop.f32.mrb[6].mxu0  ;;  %v2330_v7 = vadd.f32 %v2310_v17, %v395_v53  ;;  %v397_v8 = vpop.f32.mrb[6].mxu1 }
 0x125   :  { %v2332_v9 = vadd.f32 %v495_v18, %v324_v6  ;;  %v326_v10 = vpop.f32.mrb[7].mxu0  ;;  %v2335_v11 = vadd.f32 %v2304_v14, %v397_v8  ;;  %v399_v12 = vpop.f32.mrb[7].mxu1 }
 0x126   :  { %2729 = vst [vmem:[#allocation11_spill] sm:$0xff] %v2330_v7  ;;  %v2337_v13 = vadd.f32 %v499_v21, %v326_v10  ;;  %v2340_v22 = vadd.f32 %v2310_v17, %v399_v12 }
 0x127   :  { %2730 = vst [vmem:[#allocation12_spill] sm:$0xff] %v2332_v9  ;;  %2731 = vst [vmem:[#allocation13_spill] sm:$0xff] %v2335_v11 }
 0x128   :  { %2732 = vst [vmem:[#allocation14_spill] sm:$0xff] %v2337_v13  ;;  %2733 = vst [vmem:[#allocation15_spill] sm:$0xff] %v2340_v22 }
 0x12a   :  { %v330_v23 = vpop.f32.mrb[8].mxu0  ;;  %v403_v25 = vpop.f32.mrb[8].mxu1 }
 0x12b   :  { %v2342_v27 = vadd.f32 %v495_v18, %v330_v23  ;;  %v332_v30 = vpop.f32.mrb[9].mxu0  ;;  %v2345_v31 = vadd.f32 %v2304_v14, %v403_v25  ;;  %v405_v35 = vpop.f32.mrb[9].mxu1 }
 0x12c   :  { %v2347_v53 = vadd.f32 %v499_v21, %v332_v30  ;;  %v334_v6 = vpop.f32.mrb[10].mxu0  ;;  %v2350_v8 = vadd.f32 %v2310_v17, %v405_v35  ;;  %v407_v10 = vpop.f32.mrb[10].mxu1 }
 0x12d   :  { %2734 = vst [vmem:[#allocation16_spill] sm:$0xff] %v2342_v27  ;;  %2735 = vst [vmem:[#allocation17_spill] sm:$0xff] %v2345_v31  ;;  %v2352_v0 = vadd.f32 %v495_v18, %v334_v6  ;;  %v336_v12 = vpop.f32.mrb[11].mxu0  ;;  %v2355_v22 = vadd.f32 %v2304_v14, %v407_v10  ;;  %v409_v23 = vpop.f32.mrb[11].mxu1 }
 0x12e   :  { %2736 = vst [vmem:[#allocation18_spill] sm:$0xff] %v2347_v53  ;;  %2737 = vst [vmem:[#allocation19_spill] sm:$0xff] %v2350_v8  ;;  %v2357_v27 = vadd.f32 %v499_v21, %v336_v12  ;;  %v2360_v25 = vadd.f32 %v2310_v17, %v409_v23 }
 0x12f   :  { %2738 = vst [vmem:[#allocation20_spill] sm:$0xff] %v2352_v0  ;;  %2739 = vst [vmem:[#allocation21_spill] sm:$0xff] %v2355_v22 }
 0x130   :  { %2740 = vst [vmem:[#allocation22_spill] sm:$0xff] %v2357_v27  ;;  %2741 = vst [vmem:[#allocation23_spill] sm:$0xff] %v2360_v25 }
 0x132   :  { %v340_v31 = vpop.f32.mrb[12].mxu0  ;;  %v413_v30 = vpop.f32.mrb[12].mxu1 }
 0x133   :  { %v2362_v53 = vadd.f32 %v495_v18, %v340_v31  ;;  %v342_v13 = vpop.f32.mrb[13].mxu0  ;;  %v2365_v35 = vadd.f32 %v2304_v14, %v413_v30  ;;  %v415_v6 = vpop.f32.mrb[13].mxu1 }
 0x134   :  { %v2367_v0 = vadd.f32 %v499_v21, %v342_v13  ;;  %v344_v8 = vpop.f32.mrb[14].mxu0  ;;  %v2370_v10 = vadd.f32 %v2310_v17, %v415_v6  ;;  %v417_v12 = vpop.f32.mrb[14].mxu1  ;;  %v512_v13 = vadd.f32 %v495_v18, %v2306_v15  ;;  %v513_v6 = vadd.f32 %v499_v21, %v312_v19 }
 0x135   :  { %2742 = vst [vmem:[#allocation24_spill] sm:$0xff] %v2362_v53  ;;  %2743 = vst [vmem:[#allocation25_spill] sm:$0xff] %v2365_v35  ;;  %v2372_v27 = vadd.f32 %v495_v18, %v344_v8  ;;  %v346_v23 = vpop.f32.mrb[15].mxu0  ;;  %v2375_v25 = vadd.f32 %v2304_v14, %v417_v12  ;;  %v419_v31 = vpop.f32.mrb[15].mxu1 }
 0x136   :  { %2744 = vst [vmem:[#allocation26_spill] sm:$0xff] %v2367_v0  ;;  %2745 = vst [vmem:[#allocation27_spill] sm:$0xff] %v2370_v10  ;;  %v2377_v53 = vadd.f32 %v499_v21, %v346_v23  ;;  %v2380_v30 = vadd.f32 %v2310_v17, %v419_v31  ;;  %v514_v0 = vadd.f32 %v2304_v14, %v2308_v16 }
 0x137   :  { %2746 = vst [vmem:[#allocation28_spill] sm:$0xff] %v2372_v27  ;;  %2747 = vst [vmem:[#allocation29_spill] sm:$0xff] %v2375_v25  ;;  %v515_v10 = vadd.f32 %v2310_v17, %v385_v20 }
 0x138   :  { %2748 = vst [vmem:[#allocation30_spill] sm:$0xff] %v2377_v53  ;;  %2749 = vst [vmem:[#allocation31_spill] sm:$0xff] %v2380_v30 }
 0x13a   :  { %v711_v8 = vpop.f32.mrb[16].mxu0  ;;  %v752_v27 = vpop.f32.mrb[16].mxu1 }
 0x13b   :  { %v759_v35 = vadd.f32 %v711_v8, %v512_v13  ;;  %v761_v22 = vadd.f32 %v752_v27, %v514_v0  ;;  %v713_v12 = vpop.f32.mrb[17].mxu0  ;;  %v754_v25 = vpop.f32.mrb[17].mxu1  ;;  %v2750_v13 = vmov 0  }
 0x13c   :  { %v760_v11 = vadd.f32 %v713_v12, %v513_v6  ;;  %v762_v23 = vadd.f32 %v754_v25, %v515_v10  ;;  %v715_v53 = vpop.f32.mrb[18].mxu0  ;;  %v756_v9 = vpop.f32.mrb[18].mxu1 }
 0x13d   :  { %v1748_v31 = vmul.f32 -1.442695, %v759_v35  ;;  %v716_v30 = vpop.f32.mrb[19].mxu0  ;;  %v757_v7 = vpop.f32.mrb[19].mxu1 }
 0x13e   :  { %v1749_v15 = vmul.f32 -1.442695, %v760_v11  ;;  %v1750_v14 = vmul.f32 -1.442695, %v762_v23 }
 0x13f   :  { %1884 = vpow2.f32 %v1748_v31 }
 0x140   :  { %1886 = vpow2.f32 %v1749_v15 }
 0x141   :  { %1888 = vpow2.f32 %v1750_v14 }
 0x142   :  { %1890 = vtanh.f32 %v761_v22 }
 0x149   :  { %v1885_v16 = vpop.eup %1884 }
 0x14a   :  { %v1887_v18 = vpop.eup %1886  ;;  %v766_v17 = vadd.f32 1.0, %v1885_v16 }
 0x14b   :  { %v772_v19 = vadd.f32 1.0, %v1887_v18  ;;  %v1889_v0 = vpop.eup %1888 }
 0x14c   :  { %1892 = vrcp.f32 %v766_v17  ;;  %v1891_v20 = vpop.eup %1890  ;;  %v779_v53 = vadd.f32 1.0, %v1889_v0 }
 0x14d   :  { %1894 = vrcp.f32 %v772_v19 }
 0x14e   :  { %1896 = vrcp.f32 %v779_v53 }
 0x156   :  { %v1893_v21 = vpop.eup %1892 }
 0x157   :  { %v1895_v27 = vpop.eup %1894  ;;  %v784_v9 = vmul.f32 %v1893_v21, %v1891_v20 }
 0x158   :  { %v783_v25 = vmul.f32 0.0, %v1895_v27  ;;  %v1897_v11 = vpop.eup %1896 }
 0x15a   :  { %v2386_v7 = vadd.f32 %v784_v9, %v783_v25 }
 0x15c   :  { %1898 = vtanh.f32 %v2386_v7 }
 0x166   :  { %v1899_v35 = vpop.eup %1898 }
 0x167   :  { %v787_v10 = vmul.f32 %v1899_v35, %v1897_v11 }
 0x169   :  { %v789_v30 = vpack.c.bf16 %v787_v10, %v787_v10 }
 0x16b   :  { %790 = vst [vmem:[#allocation3] sm:$0xf] %v789_v30  ;;  %791 = vst [vmem:[%s2726_s4] sm:$0xf] %v789_v30 }
 0x172   :  { %v801_v22 = vld [vmem:[#allocation3] sm:$0xf] }
 0x173   :  { %835 = vmatmul.mubr.bf16.vlgmr.msra.gmra.mrb[20].mxu0 %v801_v22  ;;  %876 = vmatmul.mubr.bf16.vlgmr.msra.gmra.mrb[20].mxu1 %v801_v22 }
 0x174   :  { %929 = vmatpush1.bf16.msra.mxu0 %v2156_v36  ;;  %970 = vmatpush1.bf16.msra.mxu1 %v2158_v37 }
 0x175   :  { %930 = vmatprep.subr.bf16.mxu0 %v2162_v38  ;;  %971 = vmatprep.subr.bf16.mxu1 %v2164_v39 }
 0x176   :  { %960 = vmatprep.mubr.bf16.mxu0 %v2750_v13  ;;  %1001 = vmatprep.mubr.bf16.mxu1 %v2750_v13 }
 0x178   :  { %931 = vmatpush1.bf16.msra.mxu0 %v2166_v40  ;;  %972 = vmatpush1.bf16.msra.mxu1 %v2170_v41 }
 0x179   :  { %932 = vmatprep.subr.bf16.mxu0 %v2174_v42  ;;  %973 = vmatprep.subr.bf16.mxu1 %v2176_v43 }
 0x17c   :  { %933 = vmatpush1.bf16.msra.mxu0 %v2183_v45  ;;  %974 = vmatpush1.bf16.msra.mxu1 %v2185_v46 }
 0x17d   :  { %934 = vmatprep.subr.bf16.mxu0 %v2189_v47  ;;  %975 = vmatprep.subr.bf16.mxu1 %v2193_v48 }
 0x180   :  { %935 = vmatpush1.bf16.msra.mxu0 %v2195_v49  ;;  %976 = vmatpush1.bf16.msra.mxu1 %v2197_v50 }
 0x181   :  { %936 = vmatprep.subr.bf16.mxu0 %v2201_v51  ;;  %977 = vmatprep.subr.bf16.mxu1 %v2205_v52 }
 0x184   :  { %937 = vmatpush1.bf16.msra.mxu0 %v2214_v54  ;;  %978 = vmatpush1.bf16.msra.mxu1 %v2216_v55 }
 0x185   :  { %938 = vmatprep.subr.bf16.mxu0 %v2220_v56  ;;  %979 = vmatprep.subr.bf16.mxu1 %v2222_v57 }
 0x188   :  { %939 = vmatpush1.bf16.msra.mxu0 %v2226_v58  ;;  %980 = vmatpush1.bf16.msra.mxu1 %v2228_v59 }
 0x189   :  { %940 = vmatprep.subr.bf16.mxu0 %v2232_v60  ;;  %981 = vmatprep.subr.bf16.mxu1 %v2234_v61 }
 0x18c   :  { %941 = vmatpush1.bf16.msra.mxu0 %v2243_v63  ;;  %982 = vmatpush1.bf16.msra.mxu1 %v2245_v1 }
 0x18d   :  { %942 = vmatprep.subr.bf16.mxu0 %v2249_v2  ;;  %983 = vmatprep.subr.bf16.mxu1 %v2251_v3 }
 0x190   :  { %943 = vmatpush1.bf16.msra.mxu0 %v2255_v4  ;;  %984 = vmatpush1.bf16.msra.mxu1 %v2257_v5 }
 0x191   :  { %1054 = vmatprep.subr.bf16.mxu0 %v2149_v33  ;;  %1095 = vmatprep.subr.bf16.mxu1 %v2151_v34 }
 0x246   :  { %v836_v6 = vpop.f32.mrb[20].mxu0  ;;  %v877_v8 = vpop.f32.mrb[20].mxu1 }
 0x247   :  { %v884_v12 = vadd.f32 %v836_v6, %v2312_v24  ;;  %v886_v23 = vadd.f32 %v877_v8, %v2315_v26  ;;  %v838_v31 = vpop.f32.mrb[21].mxu0  ;;  %v879_v15 = vpop.f32.mrb[21].mxu1 }
 0x248   :  { %v885_v14 = vadd.f32 %v838_v31, %v2317_v28  ;;  %v887_v16 = vadd.f32 %v879_v15, %v2320_v29  ;;  %v840_v18 = vpop.f32.mrb[22].mxu0  ;;  %v881_v17 = vpop.f32.mrb[22].mxu1 }
 0x249   :  { %v1751_v19 = vmul.f32 -1.442695, %v884_v12  ;;  %v841_v0 = vpop.f32.mrb[23].mxu0  ;;  %v882_v20 = vpop.f32.mrb[23].mxu1 }
 0x24a   :  { %v1752_v21 = vmul.f32 -1.442695, %v885_v14  ;;  %v1753_v27 = vmul.f32 -1.442695, %v887_v16  ;;  %v2751_v0 = vld [vmem:[#allocation11_spill] sm:$0xff] }
 0x24b   :  { %1900 = vpow2.f32 %v1751_v19 }
 0x24c   :  { %1902 = vpow2.f32 %v1752_v21 }
 0x24d   :  { %1904 = vpow2.f32 %v1753_v27 }
 0x24e   :  { %1906 = vtanh.f32 %v886_v23 }
 0x255   :  { %v1901_v9 = vpop.eup %1900 }
 0x256   :  { %v1903_v53 = vpop.eup %1902  ;;  %v891_v24 = vadd.f32 1.0, %v1901_v9 }
 0x257   :  { %v897_v26 = vadd.f32 1.0, %v1903_v53  ;;  %v1905_v28 = vpop.eup %1904 }
 0x258   :  { %1908 = vrcp.f32 %v891_v24  ;;  %v1907_v25 = vpop.eup %1906  ;;  %v904_v10 = vadd.f32 1.0, %v1905_v28 }
 0x259   :  { %1910 = vrcp.f32 %v897_v26 }
 0x25a   :  { %1912 = vrcp.f32 %v904_v10 }
 0x262   :  { %v1909_v29 = vpop.eup %1908 }
 0x263   :  { %v1911_v11 = vpop.eup %1910  ;;  %v909_v35 = vmul.f32 %v1909_v29, %v1907_v25 }
 0x264   :  { %v908_v30 = vmul.f32 %v1911_v11, %v2386_v7  ;;  %v1913_v6 = vpop.eup %1912 }
 0x266   :  { %v2431_v22 = vadd.f32 %v909_v35, %v908_v30 }
 0x268   :  { %1914 = vtanh.f32 %v2431_v22 }
 0x272   :  { %v1915_v8 = vpop.eup %1914 }
 0x273   :  { %v912_v12 = vmul.f32 %v1915_v8, %v1913_v6 }
 0x275   :  { %v914_v23 = vpack.c.bf16 %v912_v12, %v912_v12 }
 0x277   :  { %915 = vst [vmem:[#allocation3] sm:$0xf] %v914_v23  ;;  %1754 = vst [vmem:[%s2726_s4 + $0x4] sm:$0xf] %v914_v23 }
 0x27e   :  { %v927_v31 = vld [vmem:[#allocation3] sm:$0xf] }
 0x27f   :  { %961 = vmatmul.mubr.bf16.vlgmr.msra.gmra.mrb[24].mxu0 %v927_v31  ;;  %1002 = vmatmul.mubr.bf16.vlgmr.msra.gmra.mrb[24].mxu1 %v927_v31 }
 0x280   :  { %1055 = vmatpush1.bf16.msra.mxu0 %v2156_v36  ;;  %1096 = vmatpush1.bf16.msra.mxu1 %v2158_v37 }
 0x281   :  { %1056 = vmatprep.subr.bf16.mxu0 %v2162_v38  ;;  %1097 = vmatprep.subr.bf16.mxu1 %v2164_v39 }
 0x282   :  { %1086 = vmatprep.mubr.bf16.mxu0 %v2750_v13  ;;  %1127 = vmatprep.mubr.bf16.mxu1 %v2750_v13 }
 0x284   :  { %1057 = vmatpush1.bf16.msra.mxu0 %v2166_v40  ;;  %1098 = vmatpush1.bf16.msra.mxu1 %v2170_v41 }
 0x285   :  { %1058 = vmatprep.subr.bf16.mxu0 %v2174_v42  ;;  %1099 = vmatprep.subr.bf16.mxu1 %v2176_v43 }
 0x288   :  { %1059 = vmatpush1.bf16.msra.mxu0 %v2183_v45  ;;  %1100 = vmatpush1.bf16.msra.mxu1 %v2185_v46 }
 0x289   :  { %1060 = vmatprep.subr.bf16.mxu0 %v2189_v47  ;;  %1101 = vmatprep.subr.bf16.mxu1 %v2193_v48 }
 0x28c   :  { %1061 = vmatpush1.bf16.msra.mxu0 %v2195_v49  ;;  %1102 = vmatpush1.bf16.msra.mxu1 %v2197_v50 }
 0x28d   :  { %1062 = vmatprep.subr.bf16.mxu0 %v2201_v51  ;;  %1103 = vmatprep.subr.bf16.mxu1 %v2205_v52 }
 0x290   :  { %1063 = vmatpush1.bf16.msra.mxu0 %v2214_v54  ;;  %1104 = vmatpush1.bf16.msra.mxu1 %v2216_v55 }
 0x291   :  { %1064 = vmatprep.subr.bf16.mxu0 %v2220_v56  ;;  %1105 = vmatprep.subr.bf16.mxu1 %v2222_v57 }
 0x294   :  { %1065 = vmatpush1.bf16.msra.mxu0 %v2226_v58  ;;  %1106 = vmatpush1.bf16.msra.mxu1 %v2228_v59 }
 0x295   :  { %1066 = vmatprep.subr.bf16.mxu0 %v2232_v60  ;;  %1107 = vmatprep.subr.bf16.mxu1 %v2234_v61 }
 0x298   :  { %1067 = vmatpush1.bf16.msra.mxu0 %v2243_v63  ;;  %1108 = vmatpush1.bf16.msra.mxu1 %v2245_v1 }
 0x299   :  { %1068 = vmatprep.subr.bf16.mxu0 %v2249_v2  ;;  %1109 = vmatprep.subr.bf16.mxu1 %v2251_v3 }
 0x29c   :  { %1069 = vmatpush1.bf16.msra.mxu0 %v2255_v4  ;;  %1110 = vmatpush1.bf16.msra.mxu1 %v2257_v5 }
 0x29d   :  { %1180 = vmatprep.subr.bf16.mxu0 %v2149_v33  ;;  %1221 = vmatprep.subr.bf16.mxu1 %v2151_v34 }
 0x352   :  { %v962_v7 = vpop.f32.mrb[24].mxu0  ;;  %v1003_v15 = vpop.f32.mrb[24].mxu1 }
 0x353   :  { %v1010_v14 = vadd.f32 %v962_v7, %v2322_v32  ;;  %v1012_v16 = vadd.f32 %v1003_v15, %v2325_v44  ;;  %v964_v18 = vpop.f32.mrb[25].mxu0  ;;  %v1005_v17 = vpop.f32.mrb[25].mxu1 }
 0x354   :  { %v1011_v19 = vadd.f32 %v964_v18, %v2327_v62  ;;  %v1013_v20 = vadd.f32 %v1005_v17, %v2751_v0  ;;  %v966_v21 = vpop.f32.mrb[26].mxu0  ;;  %v1007_v27 = vpop.f32.mrb[26].mxu1  ;;  %v2752_v18 = vld [vmem:[#allocation12_spill] sm:$0xff] }
 0x355   :  { %v1755_v9 = vmul.f32 -1.442695, %v1010_v14  ;;  %v967_v53 = vpop.f32.mrb[27].mxu0  ;;  %v1008_v24 = vpop.f32.mrb[27].mxu1  ;;  %v2754_v27 = vld [vmem:[#allocation14_spill] sm:$0xff] }
 0x356   :  { %v1756_v26 = vmul.f32 -1.442695, %v1011_v19  ;;  %v1757_v28 = vmul.f32 -1.442695, %v1013_v20  ;;  %v2753_v19 = vld [vmem:[#allocation13_spill] sm:$0xff]  ;;  %v2755_v53 = vld [vmem:[#allocation15_spill] sm:$0xff] }
 0x357   :  { %1916 = vpow2.f32 %v1755_v9 }
 0x358   :  { %1918 = vpow2.f32 %v1756_v26 }
 0x359   :  { %1920 = vpow2.f32 %v1757_v28 }
 0x35a   :  { %1922 = vtanh.f32 %v1012_v16 }
 0x361   :  { %v1917_v25 = vpop.eup %1916 }
 0x362   :  { %v1919_v29 = vpop.eup %1918  ;;  %v1017_v32 = vadd.f32 1.0, %v1917_v25 }
 0x363   :  { %v1023_v44 = vadd.f32 1.0, %v1919_v29  ;;  %v1921_v62 = vpop.eup %1920 }
 0x364   :  { %1924 = vrcp.f32 %v1017_v32  ;;  %v1923_v11 = vpop.eup %1922  ;;  %v1030_v6 = vadd.f32 1.0, %v1921_v62 }
 0x365   :  { %1926 = vrcp.f32 %v1023_v44 }
 0x366   :  { %1928 = vrcp.f32 %v1030_v6 }
 0x36e   :  { %v1925_v35 = vpop.eup %1924 }
 0x36f   :  { %v1927_v10 = vpop.eup %1926  ;;  %v1035_v30 = vmul.f32 %v1925_v35, %v1923_v11 }
 0x370   :  { %v1034_v8 = vmul.f32 %v1927_v10, %v2431_v22  ;;  %v1929_v23 = vpop.eup %1928 }
 0x372   :  { %v2476_v12 = vadd.f32 %v1035_v30, %v1034_v8 }
 0x374   :  { %1930 = vtanh.f32 %v2476_v12 }
 0x37e   :  { %v1931_v31 = vpop.eup %1930 }
 0x37f   :  { %v1038_v7 = vmul.f32 %v1931_v31, %v1929_v23 }
 0x381   :  { %v1040_v15 = vpack.c.bf16 %v1038_v7, %v1038_v7 }
 0x383   :  { %1041 = vst [vmem:[#allocation3] sm:$0xf] %v1040_v15  ;;  %1758 = vst [vmem:[%s2726_s4 + $0x8] sm:$0xf] %v1040_v15 }
 0x38a   :  { %v1053_v14 = vld [vmem:[#allocation3] sm:$0xf] }
 0x38b   :  { %1087 = vmatmul.mubr.bf16.vlgmr.msra.gmra.mrb[28].mxu0 %v1053_v14  ;;  %1128 = vmatmul.mubr.bf16.vlgmr.msra.gmra.mrb[28].mxu1 %v1053_v14 }
 0x38c   :  { %1181 = vmatpush1.bf16.msra.mxu0 %v2156_v36  ;;  %1222 = vmatpush1.bf16.msra.mxu1 %v2158_v37 }
 0x38d   :  { %1182 = vmatprep.subr.bf16.mxu0 %v2162_v38  ;;  %1223 = vmatprep.subr.bf16.mxu1 %v2164_v39 }
 0x38e   :  { %1212 = vmatprep.mubr.bf16.mxu0 %v2750_v13  ;;  %1253 = vmatprep.mubr.bf16.mxu1 %v2750_v13 }
 0x390   :  { %1183 = vmatpush1.bf16.msra.mxu0 %v2166_v40  ;;  %1224 = vmatpush1.bf16.msra.mxu1 %v2170_v41 }
 0x391   :  { %1184 = vmatprep.subr.bf16.mxu0 %v2174_v42  ;;  %1225 = vmatprep.subr.bf16.mxu1 %v2176_v43 }
 0x394   :  { %1185 = vmatpush1.bf16.msra.mxu0 %v2183_v45  ;;  %1226 = vmatpush1.bf16.msra.mxu1 %v2185_v46 }
 0x395   :  { %1186 = vmatprep.subr.bf16.mxu0 %v2189_v47  ;;  %1227 = vmatprep.subr.bf16.mxu1 %v2193_v48 }
 0x398   :  { %1187 = vmatpush1.bf16.msra.mxu0 %v2195_v49  ;;  %1228 = vmatpush1.bf16.msra.mxu1 %v2197_v50 }
 0x399   :  { %1188 = vmatprep.subr.bf16.mxu0 %v2201_v51  ;;  %1229 = vmatprep.subr.bf16.mxu1 %v2205_v52 }
 0x39c   :  { %1189 = vmatpush1.bf16.msra.mxu0 %v2214_v54  ;;  %1230 = vmatpush1.bf16.msra.mxu1 %v2216_v55 }
 0x39d   :  { %1190 = vmatprep.subr.bf16.mxu0 %v2220_v56  ;;  %1231 = vmatprep.subr.bf16.mxu1 %v2222_v57 }
 0x3a0   :  { %1191 = vmatpush1.bf16.msra.mxu0 %v2226_v58  ;;  %1232 = vmatpush1.bf16.msra.mxu1 %v2228_v59 }
 0x3a1   :  { %1192 = vmatprep.subr.bf16.mxu0 %v2232_v60  ;;  %1233 = vmatprep.subr.bf16.mxu1 %v2234_v61 }
 0x3a4   :  { %1193 = vmatpush1.bf16.msra.mxu0 %v2243_v63  ;;  %1234 = vmatpush1.bf16.msra.mxu1 %v2245_v1 }
 0x3a5   :  { %1194 = vmatprep.subr.bf16.mxu0 %v2249_v2  ;;  %1235 = vmatprep.subr.bf16.mxu1 %v2251_v3 }
 0x3a8   :  { %1195 = vmatpush1.bf16.msra.mxu0 %v2255_v4  ;;  %1236 = vmatpush1.bf16.msra.mxu1 %v2257_v5 }
 0x3a9   :  { %1306 = vmatprep.subr.bf16.mxu0 %v2149_v33  ;;  %1347 = vmatprep.subr.bf16.mxu1 %v2151_v34 }
 0x45e   :  { %v1088_v22 = vpop.f32.mrb[28].mxu0  ;;  %v1129_v16 = vpop.f32.mrb[28].mxu1 }
 0x45f   :  { %v1136_v17 = vadd.f32 %v1088_v22, %v2752_v18  ;;  %v1138_v0 = vadd.f32 %v1129_v16, %v2753_v19  ;;  %v1090_v20 = vpop.f32.mrb[29].mxu0  ;;  %v1131_v21 = vpop.f32.mrb[29].mxu1 }
 0x460   :  { %v1137_v9 = vadd.f32 %v1090_v20, %v2754_v27  ;;  %v1139_v24 = vadd.f32 %v1131_v21, %v2755_v53  ;;  %v1092_v26 = vpop.f32.mrb[30].mxu0  ;;  %v1133_v28 = vpop.f32.mrb[30].mxu1 }
 0x461   :  { %v1759_v25 = vmul.f32 -1.442695, %v1136_v17  ;;  %v1093_v29 = vpop.f32.mrb[31].mxu0  ;;  %v1134_v32 = vpop.f32.mrb[31].mxu1  ;;  %v2576_v28 = vld [vmem:[#allocation7] ss:$16 sps:$4 sm:$0xff]  }
 0x462   :  { %v1760_v33 = vmul.f32 -1.442695, %v1137_v9  ;;  %v1761_v34 = vmul.f32 -1.442695, %v1139_v24  ;;  %v2582_v29 = vld [vmem:[#allocation7 + $0x24] ss:$16 sps:$4 sm:$0xff]  }
 0x463   :  { %1932 = vpow2.f32 %v1759_v25  ;;  %v2579_v25 = vld [vmem:[#allocation7 + $0x8] ss:$16 sps:$4 sm:$0xff]   ;;  %v2585_v32 = vld [vmem:[#allocation7 + $0x2c] ss:$16 sps:$4 sm:$0xff]  }
 0x464   :  { %1934 = vpow2.f32 %v1760_v33  ;;  %v2590_v33 = vld [vmem:[#allocation7 + $0x20] ss:$16 sps:$4 sm:$0xff]  }
 0x465   :  { %1936 = vpow2.f32 %v1761_v34  ;;  %v2593_v34 = vld [vmem:[#allocation7 + $0x28] ss:$16 sps:$4 sm:$0xff]  }
 0x466   :  { %1938 = vtanh.f32 %v1138_v0 }
 0x46d   :  { %v1933_v44 = vpop.eup %1932 }
 0x46e   :  { %v1935_v62 = vpop.eup %1934  ;;  %v1143_v11 = vadd.f32 1.0, %v1933_v44  ;;  %v2596_v44 = vld [vmem:[#allocation7 + $0x44] ss:$16 sps:$4 sm:$0xff]  }
 0x46f   :  { %v1149_v35 = vadd.f32 1.0, %v1935_v62  ;;  %v1937_v10 = vpop.eup %1936  ;;  %v2599_v62 = vld [vmem:[#allocation7 + $0x4c] ss:$16 sps:$4 sm:$0xff]  }
 0x470   :  { %1940 = vrcp.f32 %v1143_v11  ;;  %v1939_v30 = vpop.eup %1938  ;;  %v1156_v31 = vadd.f32 1.0, %v1937_v10  ;;  %v2602_v11 = vld [vmem:[#allocation7 + $0x40] ss:$16 sps:$4 sm:$0xff]   ;;  %v2608_v10 = vld [vmem:[#allocation7 + $0x64] ss:$16 sps:$4 sm:$0xff]  }
 0x471   :  { %1942 = vrcp.f32 %v1149_v35  ;;  %v2605_v35 = vld [vmem:[#allocation7 + $0x48] ss:$16 sps:$4 sm:$0xff]  }
 0x472   :  { %1944 = vrcp.f32 %v1156_v31  ;;  %v2623_v31 = vld [vmem:[#allocation7 + $0x8c] ss:$16 sps:$4 sm:$0xff]  }
 0x47a   :  { %v1941_v6 = vpop.eup %1940 }
 0x47b   :  { %v1943_v8 = vpop.eup %1942  ;;  %v1161_v23 = vmul.f32 %v1941_v6, %v1939_v30  ;;  %v2611_v30 = vld [vmem:[#allocation7 + $0x6c] ss:$16 sps:$4 sm:$0xff]   ;;  %v2614_v6 = vld [vmem:[#allocation7 + $0x60] ss:$16 sps:$4 sm:$0xff]  }
 0x47c   :  { %v1160_v7 = vmul.f32 %v1943_v8, %v2476_v12  ;;  %v1945_v14 = vpop.eup %1944  ;;  %v2617_v8 = vld [vmem:[#allocation7 + $0x68] ss:$16 sps:$4 sm:$0xff]  }
 0x47e   :  { %v2521_v15 = vadd.f32 %v1161_v23, %v1160_v7  ;;  %v2620_v23 = vld [vmem:[#allocation7 + $0x84] ss:$16 sps:$4 sm:$0xff]   ;;  %v2626_v7 = vld [vmem:[#allocation7 + $0x80] ss:$16 sps:$4 sm:$0xff]  }
 0x480   :  { %1946 = vtanh.f32 %v2521_v15 }
 0x48a   :  { %v1947_v22 = vpop.eup %1946 }
 0x48b   :  { %v1164_v16 = vmul.f32 %v1947_v22, %v1945_v14  ;;  %v2632_v14 = vld [vmem:[#allocation7 + $0xa4] ss:$16 sps:$4 sm:$0xff]   ;;  %v2635_v22 = vld [vmem:[#allocation7 + $0xac] ss:$16 sps:$4 sm:$0xff]  }
 0x48d   :  { %v1166_v18 = vpack.c.bf16 %v1164_v16, %v1164_v16  ;;  %v2638_v16 = vld [vmem:[#allocation7 + $0xa0] ss:$16 sps:$4 sm:$0xff]  }
 0x48f   :  { %1762 = vst [vmem:[%s2726_s4 + $0xc] sm:$0xf] %v1166_v18  ;;  %1167 = vst [vmem:[#allocation3] sm:$0xf] %v1166_v18  ;;  %v2641_v18 = vld [vmem:[#allocation7 + $0xa8] ss:$16 sps:$4 sm:$0xff]  }
 0x496   :  { %v1179_v17 = vld [vmem:[#allocation3] sm:$0xf] }
 0x497   :  { %1213 = vmatmul.mubr.bf16.vlgmr.msra.gmra.mrb[32].mxu0 %v1179_v17  ;;  %1254 = vmatmul.mubr.bf16.vlgmr.msra.gmra.mrb[32].mxu1 %v1179_v17  ;;  %v2644_v17 = vld [vmem:[#allocation7 + $0xc4] ss:$16 sps:$4 sm:$0xff]  }
 0x498   :  { %1307 = vmatpush1.bf16.msra.mxu0 %v2156_v36  ;;  %1348 = vmatpush1.bf16.msra.mxu1 %v2158_v37  ;;  %v2559_v36 = vld [vmem:[#allocation7 + $0x4] ss:$16 sps:$4 sm:$0xff]   ;;  %v2562_v37 = vld [vmem:[#allocation7 + $0xc] ss:$16 sps:$4 sm:$0xff]  }
 0x499   :  { %1308 = vmatprep.subr.bf16.mxu0 %v2162_v38  ;;  %1349 = vmatprep.subr.bf16.mxu1 %v2164_v39 }
 0x49a   :  { %1338 = vmatprep.mubr.bf16.mxu0 %v2750_v13  ;;  %1379 = vmatprep.mubr.bf16.mxu1 %v2750_v13 }
 0x49c   :  { %1309 = vmatpush1.bf16.msra.mxu0 %v2166_v40  ;;  %1350 = vmatpush1.bf16.msra.mxu1 %v2170_v41  ;;  %v2756_v40 = vld [vmem:[#allocation16_spill] sm:$0xff] }
 0x49d   :  { %1310 = vmatprep.subr.bf16.mxu0 %v2174_v42  ;;  %1351 = vmatprep.subr.bf16.mxu1 %v2176_v43  ;;  %v2757_v42 = vld [vmem:[#allocation17_spill] sm:$0xff] }
 0x4a0   :  { %1311 = vmatpush1.bf16.msra.mxu0 %v2183_v45  ;;  %1352 = vmatpush1.bf16.msra.mxu1 %v2185_v46 }
 0x4a1   :  { %1312 = vmatprep.subr.bf16.mxu0 %v2189_v47  ;;  %1353 = vmatprep.subr.bf16.mxu1 %v2193_v48  ;;  %v2758_v47 = vld [vmem:[#allocation18_spill] sm:$0xff] }
 0x4a4   :  { %1313 = vmatpush1.bf16.msra.mxu0 %v2195_v49  ;;  %1354 = vmatpush1.bf16.msra.mxu1 %v2197_v50  ;;  %v2759_v49 = vld [vmem:[#allocation19_spill] sm:$0xff] }
 0x4a5   :  { %1314 = vmatprep.subr.bf16.mxu0 %v2201_v51  ;;  %1355 = vmatprep.subr.bf16.mxu1 %v2205_v52 }
 0x4a8   :  { %1315 = vmatpush1.bf16.msra.mxu0 %v2214_v54  ;;  %1356 = vmatpush1.bf16.msra.mxu1 %v2216_v55 }
 0x4a9   :  { %1316 = vmatprep.subr.bf16.mxu0 %v2220_v56  ;;  %1357 = vmatprep.subr.bf16.mxu1 %v2222_v57 }
 0x4ac   :  { %1317 = vmatpush1.bf16.msra.mxu0 %v2226_v58  ;;  %1358 = vmatpush1.bf16.msra.mxu1 %v2228_v59 }
 0x4ad   :  { %1318 = vmatprep.subr.bf16.mxu0 %v2232_v60  ;;  %1359 = vmatprep.subr.bf16.mxu1 %v2234_v61 }
 0x4b0   :  { %1319 = vmatpush1.bf16.msra.mxu0 %v2243_v63  ;;  %1360 = vmatpush1.bf16.msra.mxu1 %v2245_v1 }
 0x4b1   :  { %1320 = vmatprep.subr.bf16.mxu0 %v2249_v2  ;;  %1361 = vmatprep.subr.bf16.mxu1 %v2251_v3 }
 0x4b4   :  { %1321 = vmatpush1.bf16.msra.mxu0 %v2255_v4  ;;  %1362 = vmatpush1.bf16.msra.mxu1 %v2257_v5 }
 0x4b5   :  { %1432 = vmatprep.subr.bf16.mxu0 %v2559_v36  ;;  %1473 = vmatprep.subr.bf16.mxu1 %v2562_v37 }
 0x56a   :  { %v1214_v38 = vpop.f32.mrb[32].mxu0  ;;  %v1255_v39 = vpop.f32.mrb[32].mxu1 }
 0x56b   :  { %v1262_v41 = vadd.f32 %v1214_v38, %v2756_v40  ;;  %v1264_v43 = vadd.f32 %v1255_v39, %v2757_v42  ;;  %v1216_v45 = vpop.f32.mrb[33].mxu0  ;;  %v1257_v46 = vpop.f32.mrb[33].mxu1  ;;  %v2647_v38 = vld [vmem:[#allocation7 + $0xcc] ss:$16 sps:$4 sm:$0xff]   ;;  %v2650_v39 = vld [vmem:[#allocation7 + $0xc0] ss:$16 sps:$4 sm:$0xff]  }
 0x56c   :  { %v1263_v48 = vadd.f32 %v1216_v45, %v2758_v47  ;;  %v1265_v50 = vadd.f32 %v1257_v46, %v2759_v49  ;;  %v1218_v51 = vpop.f32.mrb[34].mxu0  ;;  %v1259_v52 = vpop.f32.mrb[34].mxu1  ;;  %v2653_v40 = vld [vmem:[#allocation7 + $0xc8] ss:$16 sps:$4 sm:$0xff]   ;;  %v2659_v42 = vld [vmem:[#allocation7 + $0xec] ss:$16 sps:$4 sm:$0xff]  }
 0x56d   :  { %v1763_v54 = vmul.f32 -1.442695, %v1262_v41  ;;  %v1219_v55 = vpop.f32.mrb[35].mxu0  ;;  %v1260_v56 = vpop.f32.mrb[35].mxu1  ;;  %v2656_v41 = vld [vmem:[#allocation7 + $0xe4] ss:$16 sps:$4 sm:$0xff]  }
 0x56e   :  { %v1764_v57 = vmul.f32 -1.442695, %v1263_v48  ;;  %v1765_v58 = vmul.f32 -1.442695, %v1265_v50  ;;  %v2760_v46 = vld [vmem:[#allocation20_spill] sm:$0xff]  ;;  %v2761_v48 = vld [vmem:[#allocation21_spill] sm:$0xff] }
 0x56f   :  { %1948 = vpow2.f32 %v1763_v54  ;;  %v2762_v52 = vld [vmem:[#allocation22_spill] sm:$0xff]  ;;  %v2763_v55 = vld [vmem:[#allocation23_spill] sm:$0xff] }
 0x570   :  { %1950 = vpow2.f32 %v1764_v57 }
 0x571   :  { %1952 = vpow2.f32 %v1765_v58 }
 0x572   :  { %1954 = vtanh.f32 %v1264_v43 }
 0x579   :  { %v1949_v59 = vpop.eup %1948 }
 0x57a   :  { %v1951_v60 = vpop.eup %1950  ;;  %v1269_v61 = vadd.f32 1.0, %v1949_v59 }
 0x57b   :  { %v1275_v63 = vadd.f32 1.0, %v1951_v60  ;;  %v1953_v1 = vpop.eup %1952 }
 0x57c   :  { %1956 = vrcp.f32 %v1269_v61  ;;  %v1955_v2 = vpop.eup %1954  ;;  %v1282_v0 = vadd.f32 1.0, %v1953_v1 }
 0x57d   :  { %1958 = vrcp.f32 %v1275_v63 }
 0x57e   :  { %1960 = vrcp.f32 %v1282_v0 }
 0x586   :  { %v1957_v3 = vpop.eup %1956 }
 0x587   :  { %v1959_v12 = vpop.eup %1958  ;;  %v1287_v19 = vmul.f32 %v1957_v3, %v1955_v2 }
 0x588   :  { %v1286_v20 = vmul.f32 %v1959_v12, %v2521_v15  ;;  %v1961_v27 = vpop.eup %1960  ;;  %v2629_v15 = vld [vmem:[#allocation7 + $0x88] ss:$16 sps:$4 sm:$0xff]  }
 0x58a   :  { %v2570_v21 = vadd.f32 %v1287_v19, %v1286_v20 }
 0x58c   :  { %1962 = vtanh.f32 %v2570_v21 }
 0x596   :  { %v1963_v9 = vpop.eup %1962 }
 0x597   :  { %v1290_v53 = vmul.f32 %v1963_v9, %v1961_v27 }
 0x599   :  { %v1292_v24 = vpack.c.bf16 %v1290_v53, %v1290_v53 }
 0x59b   :  { %1766 = vst [vmem:[%s2726_s4 + $0x10] sm:$0xf] %v1292_v24  ;;  %1293 = vst [vmem:[#allocation3] sm:$0xf] %v1292_v24 }
 0x5a2   :  { %v1305_v26 = vld [vmem:[#allocation3] sm:$0xf] }
 0x5a3   :  { %1339 = vmatmul.mubr.bf16.vlgmr.msra.gmra.mrb[36].mxu0 %v1305_v26  ;;  %1380 = vmatmul.mubr.bf16.vlgmr.msra.gmra.mrb[36].mxu1 %v1305_v26 }
 0x5a4   :  { %1433 = vmatpush1.bf16.msra.mxu0 %v2576_v28  ;;  %1474 = vmatpush1.bf16.msra.mxu1 %v2579_v25 }
 0x5a5   :  { %1434 = vmatprep.subr.bf16.mxu0 %v2582_v29  ;;  %1475 = vmatprep.subr.bf16.mxu1 %v2585_v32 }
 0x5a6   :  { %1464 = vmatprep.mubr.bf16.mxu0 %v2750_v13  ;;  %1505 = vmatprep.mubr.bf16.mxu1 %v2750_v13 }
 0x5a8   :  { %1435 = vmatpush1.bf16.msra.mxu0 %v2590_v33  ;;  %1476 = vmatpush1.bf16.msra.mxu1 %v2593_v34 }
 0x5a9   :  { %1436 = vmatprep.subr.bf16.mxu0 %v2596_v44  ;;  %1477 = vmatprep.subr.bf16.mxu1 %v2599_v62 }
 0x5ac   :  { %1437 = vmatpush1.bf16.msra.mxu0 %v2602_v11  ;;  %1478 = vmatpush1.bf16.msra.mxu1 %v2605_v35 }
 0x5ad   :  { %1438 = vmatprep.subr.bf16.mxu0 %v2608_v10  ;;  %1479 = vmatprep.subr.bf16.mxu1 %v2611_v30 }
 0x5b0   :  { %1439 = vmatpush1.bf16.msra.mxu0 %v2614_v6  ;;  %1480 = vmatpush1.bf16.msra.mxu1 %v2617_v8 }
 0x5b1   :  { %1440 = vmatprep.subr.bf16.mxu0 %v2620_v23  ;;  %1481 = vmatprep.subr.bf16.mxu1 %v2623_v31 }
 0x5b4   :  { %1441 = vmatpush1.bf16.msra.mxu0 %v2626_v7  ;;  %1482 = vmatpush1.bf16.msra.mxu1 %v2629_v15 }
 0x5b5   :  { %1442 = vmatprep.subr.bf16.mxu0 %v2632_v14  ;;  %1483 = vmatprep.subr.bf16.mxu1 %v2635_v22 }
 0x5b8   :  { %1443 = vmatpush1.bf16.msra.mxu0 %v2638_v16  ;;  %1484 = vmatpush1.bf16.msra.mxu1 %v2641_v18 }
 0x5b9   :  { %1444 = vmatprep.subr.bf16.mxu0 %v2644_v17  ;;  %1485 = vmatprep.subr.bf16.mxu1 %v2647_v38 }
 0x5bc   :  { %1445 = vmatpush1.bf16.msra.mxu0 %v2650_v39  ;;  %1486 = vmatpush1.bf16.msra.mxu1 %v2653_v40 }
 0x5bd   :  { %1446 = vmatprep.subr.bf16.mxu0 %v2656_v41  ;;  %1487 = vmatprep.subr.bf16.mxu1 %v2659_v42 }
 0x5c0   :  { %1447 = vmatpush1.bf16.msra.mxu0 %v2255_v4  ;;  %1488 = vmatpush1.bf16.msra.mxu1 %v2257_v5 }
 0x5c1   :  { %1558 = vmatprep.subr.bf16.mxu0 %v2559_v36  ;;  %1599 = vmatprep.subr.bf16.mxu1 %v2562_v37 }
 0x676   :  { %v1340_v43 = vpop.f32.mrb[36].mxu0  ;;  %v1381_v45 = vpop.f32.mrb[36].mxu1 }
 0x677   :  { %v1388_v47 = vadd.f32 %v1340_v43, %v2760_v46  ;;  %v1390_v49 = vadd.f32 %v1381_v45, %v2761_v48  ;;  %v1342_v50 = vpop.f32.mrb[37].mxu0  ;;  %v1383_v51 = vpop.f32.mrb[37].mxu1 }
 0x678   :  { %v1389_v54 = vadd.f32 %v1342_v50, %v2762_v52  ;;  %v1391_v56 = vadd.f32 %v1383_v51, %v2763_v55  ;;  %v1344_v57 = vpop.f32.mrb[38].mxu0  ;;  %v1385_v4 = vpop.f32.mrb[38].mxu1 }
 0x679   :  { %v1767_v58 = vmul.f32 -1.442695, %v1388_v47  ;;  %v1345_v5 = vpop.f32.mrb[39].mxu0  ;;  %v1386_v59 = vpop.f32.mrb[39].mxu1  ;;  %v2768_v57 = vld [vmem:[#allocation28_spill] sm:$0xff] }
 0x67a   :  { %v1768_v36 = vmul.f32 -1.442695, %v1389_v54  ;;  %v1769_v37 = vmul.f32 -1.442695, %v1391_v56 }
 0x67b   :  { %1964 = vpow2.f32 %v1767_v58  ;;  %v2769_v58 = vld [vmem:[#allocation29_spill] sm:$0xff] }
 0x67c   :  { %1966 = vpow2.f32 %v1768_v36 }
 0x67d   :  { %1968 = vpow2.f32 %v1769_v37  ;;  %v2770_v37 = vld [vmem:[#allocation30_spill] sm:$0xff] }
 0x67e   :  { %1970 = vtanh.f32 %v1390_v49 }
 0x685   :  { %v1965_v60 = vpop.eup %1964 }
 0x686   :  { %v1967_v61 = vpop.eup %1966  ;;  %v1395_v63 = vadd.f32 1.0, %v1965_v60 }
 0x687   :  { %v1401_v1 = vadd.f32 1.0, %v1967_v61  ;;  %v1969_v2 = vpop.eup %1968  ;;  %v2771_v61 = vld [vmem:[#allocation31_spill] sm:$0xff] }
 0x688   :  { %1972 = vrcp.f32 %v1395_v63  ;;  %v1971_v3 = vpop.eup %1970  ;;  %v1408_v20 = vadd.f32 1.0, %v1969_v2 }
 0x689   :  { %1974 = vrcp.f32 %v1401_v1 }
 0x68a   :  { %1976 = vrcp.f32 %v1408_v20 }
 0x692   :  { %v1973_v12 = vpop.eup %1972 }
 0x693   :  { %v1975_v19 = vpop.eup %1974  ;;  %v1413_v0 = vmul.f32 %v1973_v12, %v1971_v3 }
 0x694   :  { %v1412_v27 = vmul.f32 %v1975_v19, %v2570_v21  ;;  %v1977_v53 = vpop.eup %1976  ;;  %v2043_v21 = vld [vmem:[#allocation7 + $0xe8] ss:$16 sps:$4 sm:$0xff]  }
 0x696   :  { %v2671_v9 = vadd.f32 %v1413_v0, %v1412_v27 }
 0x698   :  { %1978 = vtanh.f32 %v2671_v9 }
 0x6a2   :  { %v1979_v24 = vpop.eup %1978 }
 0x6a3   :  { %v1416_v26 = vmul.f32 %v1979_v24, %v1977_v53 }
 0x6a5   :  { %v1418_v43 = vpack.c.bf16 %v1416_v26, %v1416_v26 }
 0x6a7   :  { %1770 = vst [vmem:[%s2726_s4 + $0x14] sm:$0xf] %v1418_v43  ;;  %1419 = vst [vmem:[#allocation3] sm:$0xf] %v1418_v43 }
 0x6ae   :  { %v1431_v45 = vld [vmem:[#allocation3] sm:$0xf] }
 0x6af   :  { %1465 = vmatmul.mubr.bf16.vlgmr.msra.gmra.mrb[40].mxu0 %v1431_v45  ;;  %1506 = vmatmul.mubr.bf16.vlgmr.msra.gmra.mrb[40].mxu1 %v1431_v45 }
 0x6b0   :  { %1559 = vmatpush1.bf16.msra.mxu0 %v2576_v28  ;;  %1600 = vmatpush1.bf16.msra.mxu1 %v2579_v25 }
 0x6b1   :  { %1560 = vmatprep.subr.bf16.mxu0 %v2582_v29  ;;  %1601 = vmatprep.subr.bf16.mxu1 %v2585_v32  ;;  %v2764_v29 = vld [vmem:[#allocation24_spill] sm:$0xff] }
 0x6b2   :  { %1590 = vmatprep.mubr.bf16.mxu0 %v2750_v13  ;;  %1631 = vmatprep.mubr.bf16.mxu1 %v2750_v13  ;;  %v2042_v13 = vld [vmem:[#allocation7 + $0xe0] ss:$16 sps:$4 sm:$0xff]  }
 0x6b4   :  { %1561 = vmatpush1.bf16.msra.mxu0 %v2590_v33  ;;  %1602 = vmatpush1.bf16.msra.mxu1 %v2593_v34  ;;  %v2765_v33 = vld [vmem:[#allocation25_spill] sm:$0xff] }
 0x6b5   :  { %1562 = vmatprep.subr.bf16.mxu0 %v2596_v44  ;;  %1603 = vmatprep.subr.bf16.mxu1 %v2599_v62 }
 0x6b8   :  { %1563 = vmatpush1.bf16.msra.mxu0 %v2602_v11  ;;  %1604 = vmatpush1.bf16.msra.mxu1 %v2605_v35  ;;  %v2766_v11 = vld [vmem:[#allocation26_spill] sm:$0xff] }
 0x6b9   :  { %1564 = vmatprep.subr.bf16.mxu0 %v2608_v10  ;;  %1605 = vmatprep.subr.bf16.mxu1 %v2611_v30  ;;  %v2767_v10 = vld [vmem:[#allocation27_spill] sm:$0xff] }
 0x6bc   :  { %1565 = vmatpush1.bf16.msra.mxu0 %v2614_v6  ;;  %1606 = vmatpush1.bf16.msra.mxu1 %v2617_v8 }
 0x6bd   :  { %1566 = vmatprep.subr.bf16.mxu0 %v2620_v23  ;;  %1607 = vmatprep.subr.bf16.mxu1 %v2623_v31 }
 0x6c0   :  { %1567 = vmatpush1.bf16.msra.mxu0 %v2626_v7  ;;  %1608 = vmatpush1.bf16.msra.mxu1 %v2629_v15 }
 0x6c1   :  { %1568 = vmatprep.subr.bf16.mxu0 %v2632_v14  ;;  %1609 = vmatprep.subr.bf16.mxu1 %v2635_v22 }
 0x6c4   :  { %1569 = vmatpush1.bf16.msra.mxu0 %v2638_v16  ;;  %1610 = vmatpush1.bf16.msra.mxu1 %v2641_v18 }
 0x6c5   :  { %1570 = vmatprep.subr.bf16.mxu0 %v2644_v17  ;;  %1611 = vmatprep.subr.bf16.mxu1 %v2647_v38 }
 0x6c8   :  { %1571 = vmatpush1.bf16.msra.mxu0 %v2650_v39  ;;  %1612 = vmatpush1.bf16.msra.mxu1 %v2653_v40 }
 0x6c9   :  { %1572 = vmatprep.subr.bf16.mxu0 %v2656_v41  ;;  %1613 = vmatprep.subr.bf16.mxu1 %v2659_v42 }
 0x6cc   :  { %1573 = vmatpush1.bf16.msra.mxu0 %v2042_v13  ;;  %1614 = vmatpush1.bf16.msra.mxu1 %v2043_v21 }
 0x782   :  { %v1466_v28 = vpop.f32.mrb[40].mxu0  ;;  %v1507_v25 = vpop.f32.mrb[40].mxu1 }
 0x783   :  { %v1514_v32 = vadd.f32 %v1466_v28, %v2764_v29  ;;  %v1516_v34 = vadd.f32 %v1507_v25, %v2765_v33  ;;  %v1468_v44 = vpop.f32.mrb[41].mxu0  ;;  %v1509_v62 = vpop.f32.mrb[41].mxu1 }
 0x784   :  { %v1515_v35 = vadd.f32 %v1468_v44, %v2766_v11  ;;  %v1517_v30 = vadd.f32 %v1509_v62, %v2767_v10  ;;  %v1470_v6 = vpop.f32.mrb[42].mxu0  ;;  %v1511_v8 = vpop.f32.mrb[42].mxu1 }
 0x785   :  { %v1771_v23 = vmul.f32 -1.442695, %v1514_v32  ;;  %v1471_v31 = vpop.f32.mrb[43].mxu0  ;;  %v1512_v7 = vpop.f32.mrb[43].mxu1 }
 0x786   :  { %v1772_v15 = vmul.f32 -1.442695, %v1515_v35  ;;  %v1773_v14 = vmul.f32 -1.442695, %v1517_v30 }
 0x787   :  { %1980 = vpow2.f32 %v1771_v23 }
 0x788   :  { %1982 = vpow2.f32 %v1772_v15 }
 0x789   :  { %1984 = vpow2.f32 %v1773_v14 }
 0x78a   :  { %1986 = vtanh.f32 %v1516_v34 }
 0x791   :  { %v1981_v22 = vpop.eup %1980 }
 0x792   :  { %v1983_v16 = vpop.eup %1982  ;;  %v1521_v18 = vadd.f32 1.0, %v1981_v22 }
 0x793   :  { %v1527_v17 = vadd.f32 1.0, %v1983_v16  ;;  %v1985_v38 = vpop.eup %1984 }
 0x794   :  { %1988 = vrcp.f32 %v1521_v18  ;;  %v1987_v39 = vpop.eup %1986  ;;  %v1534_v46 = vadd.f32 1.0, %v1985_v38 }
 0x795   :  { %1990 = vrcp.f32 %v1527_v17 }
 0x796   :  { %1992 = vrcp.f32 %v1534_v46 }
 0x79e   :  { %v1989_v40 = vpop.eup %1988 }
 0x79f   :  { %v1991_v41 = vpop.eup %1990  ;;  %v1539_v42 = vmul.f32 %v1989_v40, %v1987_v39 }
 0x7a0   :  { %v1538_v47 = vmul.f32 %v1991_v41, %v2671_v9  ;;  %v1993_v49 = vpop.eup %1992 }
 0x7a2   :  { %v1540_v48 = vadd.f32 %v1539_v42, %v1538_v47 }
 0x7a4   :  { %1994 = vtanh.f32 %v1540_v48 }
 0x7ae   :  { %v1995_v50 = vpop.eup %1994 }
 0x7af   :  { %v1542_v51 = vmul.f32 %v1995_v50, %v1993_v49 }
 0x7b1   :  { %v1544_v52 = vpack.c.bf16 %v1542_v51, %v1542_v51 }
 0x7b3   :  { %1774 = vst [vmem:[%s2726_s4 + $0x18] sm:$0xf] %v1544_v52  ;;  %1545 = vst [vmem:[#allocation3] sm:$0xf] %v1544_v52 }
 0x7ba   :  { %v1557_v54 = vld [vmem:[#allocation3] sm:$0xf] }
 0x7bb   :  { %1591 = vmatmul.mubr.bf16.vlgmr.msra.gmra.mrb[44].mxu0 %v1557_v54  ;;  %1632 = vmatmul.mubr.bf16.vlgmr.msra.gmra.mrb[44].mxu1 %v1557_v54 }
 0x88e   :  { %v1592_v55 = vpop.f32.mrb[44].mxu0  ;;  %v1633_v56 = vpop.f32.mrb[44].mxu1 }
 0x88f   :  { %v1640_v4 = vadd.f32 %v1592_v55, %v2768_v57  ;;  %v1642_v5 = vadd.f32 %v1633_v56, %v2769_v58  ;;  %v1594_v59 = vpop.f32.mrb[45].mxu0  ;;  %v1635_v36 = vpop.f32.mrb[45].mxu1 }
 0x890   :  { %v1641_v60 = vadd.f32 %v1594_v59, %v2770_v37  ;;  %v1643_v63 = vadd.f32 %v1635_v36, %v2771_v61  ;;  %v1596_v1 = vpop.f32.mrb[46].mxu0  ;;  %v1637_v2 = vpop.f32.mrb[46].mxu1 }
 0x891   :  { %v1775_v3 = vmul.f32 -1.442695, %v1640_v4  ;;  %v1597_v12 = vpop.f32.mrb[47].mxu0  ;;  %v1638_v19 = vpop.f32.mrb[47].mxu1 }
 0x892   :  { %v1776_v0 = vmul.f32 -1.442695, %v1641_v60  ;;  %v1777_v20 = vmul.f32 -1.442695, %v1643_v63 }
 0x893   :  { %1996 = vpow2.f32 %v1775_v3 }
 0x894   :  { %1998 = vpow2.f32 %v1776_v0 }
 0x895   :  { %2000 = vpow2.f32 %v1777_v20 }
 0x896   :  { %2002 = vtanh.f32 %v1642_v5 }
 0x89d   :  { %v1997_v27 = vpop.eup %1996 }
 0x89e   :  { %v1999_v9 = vpop.eup %1998  ;;  %v1647_v53 = vadd.f32 1.0, %v1997_v27 }
 0x89f   :  { %v1653_v24 = vadd.f32 1.0, %v1999_v9  ;;  %v2001_v26 = vpop.eup %2000 }
 0x8a0   :  { %2004 = vrcp.f32 %v1647_v53  ;;  %v2003_v43 = vpop.eup %2002  ;;  %v1660_v28 = vadd.f32 1.0, %v2001_v26 }
 0x8a1   :  { %2006 = vrcp.f32 %v1653_v24 }
 0x8a2   :  { %2008 = vrcp.f32 %v1660_v28 }
 0x8aa   :  { %v2005_v45 = vpop.eup %2004 }
 0x8ab   :  { %v2007_v13 = vpop.eup %2006  ;;  %v1665_v21 = vmul.f32 %v2005_v45, %v2003_v43 }
 0x8ac   :  { %v1664_v25 = vmul.f32 %v2007_v13, %v1540_v48  ;;  %v2009_v32 = vpop.eup %2008 }
 0x8ae   :  { %v1666_v29 = vadd.f32 %v1665_v21, %v1664_v25 }
 0x8b0   :  { %2010 = vtanh.f32 %v1666_v29 }
 0x8ba   :  { %v2011_v33 = vpop.eup %2010 }
 0x8bb   :  { %v1668_v34 = vmul.f32 %v2011_v33, %v2009_v32 }
 0x8bd   :  { %v1670_v44 = vpack.c.bf16 %v1668_v34, %v1668_v34 }
 0x8bf   :  { %1671 = vst [vmem:[#allocation3] sm:$0xf] %v1670_v44  ;;  %1778 = vst [vmem:[%s2726_s4 + $0x1c] sm:$0xf] %v1670_v44 }
 0x8c0   :  { %1678 = vsyncpa [#allocation6], 1 }
 0x8c1   :  { %1679 = vsyncpa [#allocation8], 1 }

// kernel: lstm_forward.3
= control target key start
LH: loop header
LB: loop body
LE: loop exit
PB: predicated region body
PF: predicated region fallthrough
CT: control target
= control target key end

     0   :  { %v2905_v1 = vmov 0   ;;  %s2900_s1 = inlined_call_operand.vmem [shape: bf16[128,512], index: 1, kind: input, shape index: {}]   ;;  %s2901_s0 = inlined_call_operand.vmem [shape: bf16[8,8,128], index: 0, kind: input, shape index: {}]   ;;  %s2902_s2 = inlined_call_operand.vmem [shape: bf16[128,512], index: 2, kind: input, shape index: {}]   ;;  %s2903_s3 = inlined_call_operand.vmem [shape: f32[1,512], index: 3, kind: input, shape index: {}]   ;;  %s2904_s4 = inlined_call_operand.vmem [shape: f32[8,8,128], index: 4, kind: output, shape index: {}]  }
   0x1   :  { %v1750_v0 = vld [vmem:[%s2900_s1 + $0x4] ss:$16 sps:$4 sm:$0xff]   ;;  %280 = vmatprep.mubr.bf16.mxu0 %v2905_v1  ;;  %22 = vst [vmem:[#allocation3] sm:$0xf] %v2905_v1  ;;  %353 = vmatprep.mubr.bf16.mxu1 %v2905_v1  ;;  %v1752_v2 = vld [vmem:[%s2900_s1 + $0xc] ss:$16 sps:$4 sm:$0xff]  }
   0x2   :  { %248 = vmatprep.subr.bf16.mxu0 %v1750_v0  ;;  %v1754_v3 = vld [vmem:[%s2900_s1] ss:$16 sps:$4 sm:$0xff]   ;;  %v1755_v4 = vld [vmem:[%s2900_s1 + $0x8] ss:$16 sps:$4 sm:$0xff]   ;;  %321 = vmatprep.subr.bf16.mxu1 %v1752_v2  ;;  %v1756_v5 = vld [vmem:[%s2900_s1 + $0x24] ss:$16 sps:$4 sm:$0xff]  }
   0x3   :  { %249 = vmatpush1.bf16.msra.mxu0 %v1754_v3  ;;  %322 = vmatpush1.bf16.msra.mxu1 %v1755_v4  ;;  %v1758_v6 = vld [vmem:[%s2900_s1 + $0x2c] ss:$16 sps:$4 sm:$0xff]   ;;  %v1760_v7 = vld [vmem:[%s2900_s1 + $0x20] ss:$16 sps:$4 sm:$0xff]   ;;  %v1761_v8 = vld [vmem:[%s2900_s1 + $0x28] ss:$16 sps:$4 sm:$0xff]  }
   0x4   :  { %250 = vmatprep.subr.bf16.mxu0 %v1756_v5  ;;  %323 = vmatprep.subr.bf16.mxu1 %v1758_v6  ;;  %v1762_v9 = vld [vmem:[%s2900_s1 + $0x44] ss:$16 sps:$4 sm:$0xff]   ;;  %v1764_v10 = vld [vmem:[%s2900_s1 + $0x4c] ss:$16 sps:$4 sm:$0xff]   ;;  %v1766_v11 = vld [vmem:[%s2900_s1 + $0x40] ss:$16 sps:$4 sm:$0xff]  }
   0x5   :  { %v1767_v12 = vld [vmem:[%s2900_s1 + $0x48] ss:$16 sps:$4 sm:$0xff]   ;;  %v1768_v13 = vld [vmem:[%s2900_s1 + $0x64] ss:$16 sps:$4 sm:$0xff]   ;;  %v1770_v14 = vld [vmem:[%s2900_s1 + $0x6c] ss:$16 sps:$4 sm:$0xff]  }
   0x6   :  { %v1772_v15 = vld [vmem:[%s2900_s1 + $0x60] ss:$16 sps:$4 sm:$0xff]   ;;  %v1773_v16 = vld [vmem:[%s2900_s1 + $0x68] ss:$16 sps:$4 sm:$0xff]   ;;  %v1774_v17 = vld [vmem:[%s2900_s1 + $0x84] ss:$16 sps:$4 sm:$0xff]  }
   0x7   :  { %251 = vmatpush1.bf16.msra.mxu0 %v1760_v7  ;;  %324 = vmatpush1.bf16.msra.mxu1 %v1761_v8  ;;  %v1776_v18 = vld [vmem:[%s2900_s1 + $0x8c] ss:$16 sps:$4 sm:$0xff]   ;;  %v1778_v19 = vld [vmem:[%s2900_s1 + $0x80] ss:$16 sps:$4 sm:$0xff]   ;;  %v1779_v20 = vld [vmem:[%s2900_s1 + $0x88] ss:$16 sps:$4 sm:$0xff]   ;;  %v464_v7 = vlaneseq }
   0x8   :  { %252 = vmatprep.subr.bf16.mxu0 %v1762_v9  ;;  %325 = vmatprep.subr.bf16.mxu1 %v1764_v10  ;;  %v1780_v21 = vld [vmem:[%s2900_s1 + $0xa4] ss:$16 sps:$4 sm:$0xff]   ;;  %v1782_v22 = vld [vmem:[%s2900_s1 + $0xac] ss:$16 sps:$4 sm:$0xff]   ;;  %v1784_v23 = vld [vmem:[%s2900_s1 + $0xa0] ss:$16 sps:$4 sm:$0xff]  }
   0x9   :  { %v1785_v24 = vld [vmem:[%s2900_s1 + $0xa8] ss:$16 sps:$4 sm:$0xff]   ;;  %v1786_v25 = vld [vmem:[%s2900_s1 + $0xc4] ss:$16 sps:$4 sm:$0xff]   ;;  %v1788_v26 = vld [vmem:[%s2900_s1 + $0xcc] ss:$16 sps:$4 sm:$0xff]  }
   0xa   :  { %v1790_v27 = vld [vmem:[%s2900_s1 + $0xc0] ss:$16 sps:$4 sm:$0xff]   ;;  %v1791_v28 = vld [vmem:[%s2900_s1 + $0xc8] ss:$16 sps:$4 sm:$0xff]   ;;  %v1792_v29 = vld [vmem:[%s2900_s1 + $0xe4] ss:$16 sps:$4 sm:$0xff]  }
   0xb   :  { %253 = vmatpush1.bf16.msra.mxu0 %v1766_v11  ;;  %326 = vmatpush1.bf16.msra.mxu1 %v1767_v12  ;;  %v1794_v30 = vld [vmem:[%s2900_s1 + $0xec] ss:$16 sps:$4 sm:$0xff]   ;;  %v1796_v31 = vld [vmem:[%s2900_s1 + $0xe0] ss:$16 sps:$4 sm:$0xff]   ;;  %v1797_v32 = vld [vmem:[%s2900_s1 + $0xe8] ss:$16 sps:$4 sm:$0xff]  }
   0xc   :  { %254 = vmatprep.subr.bf16.mxu0 %v1768_v13  ;;  %327 = vmatprep.subr.bf16.mxu1 %v1770_v14  ;;  %v2138_v33 = vld [vmem:[%s2902_s2 + $0x4] ss:$16 sps:$4 sm:$0xff]   ;;  %v2143_v34 = vld [vmem:[%s2902_s2 + $0xc] ss:$16 sps:$4 sm:$0xff]   ;;  %v2151_v36 = vld [vmem:[%s2902_s2] ss:$16 sps:$4 sm:$0xff]  }
   0xd   :  { %v1798_v35 = vld [vmem:[%s2901_s0] sm:$0xff]   ;;  %v2156_v37 = vld [vmem:[%s2902_s2 + $0x8] ss:$16 sps:$4 sm:$0xff]   ;;  %v2168_v39 = vld [vmem:[%s2902_s2 + $0x2c] ss:$16 sps:$4 sm:$0xff]   ;;  %v465_v8 = vshrl.u32 %v464_v7, 7 }
   0xe   :  { %v2163_v38 = vld [vmem:[%s2902_s2 + $0x24] ss:$16 sps:$4 sm:$0xff]   ;;  %v2173_v40 = vld [vmem:[%s2902_s2 + $0x20] ss:$16 sps:$4 sm:$0xff]   ;;  %v2180_v41 = vld [vmem:[%s2902_s2 + $0x28] ss:$16 sps:$4 sm:$0xff]  }
   0xf   :  { %255 = vmatpush1.bf16.msra.mxu0 %v1772_v15  ;;  %328 = vmatpush1.bf16.msra.mxu1 %v1773_v16  ;;  %v2187_v42 = vld [vmem:[%s2902_s2 + $0x44] ss:$16 sps:$4 sm:$0xff]   ;;  %v2192_v43 = vld [vmem:[%s2902_s2 + $0x4c] ss:$16 sps:$4 sm:$0xff]   ;;  %v2202_v45 = vld [vmem:[%s2902_s2 + $0x40] ss:$16 sps:$4 sm:$0xff]  }
  0x10   :  { %256 = vmatprep.subr.bf16.mxu0 %v1774_v17  ;;  %329 = vmatprep.subr.bf16.mxu1 %v1776_v18  ;;  %v1811_v44 = vld [vmem:[%s2901_s0 + $0x8] sm:$0xff]   ;;  %v2214_v47 = vld [vmem:[%s2902_s2 + $0x64] ss:$16 sps:$4 sm:$0xff]   ;;  %v2226_v49 = vld [vmem:[%s2902_s2 + $0x60] ss:$16 sps:$4 sm:$0xff]   ;;  %v474_v9 = vsub.s32 2, %v465_v8 }
  0x11   :  { %v2207_v46 = vld [vmem:[%s2902_s2 + $0x48] ss:$16 sps:$4 sm:$0xff]   ;;  %v2221_v48 = vld [vmem:[%s2902_s2 + $0x6c] ss:$16 sps:$4 sm:$0xff]   ;;  %v2238_v51 = vld [vmem:[%s2902_s2 + $0x84] ss:$16 sps:$4 sm:$0xff]  }
  0x12   :  { %v2231_v50 = vld [vmem:[%s2902_s2 + $0x68] ss:$16 sps:$4 sm:$0xff]   ;;  %v2245_v52 = vld [vmem:[%s2902_s2 + $0x8c] ss:$16 sps:$4 sm:$0xff]   ;;  %v1824_v53 = vld [vmem:[%s2901_s0 + $0x10] sm:$0xff]   ;;  %v478_v10 = vsub.s32 3, %v465_v8 }
  0x13   :  { %257 = vmatpush1.bf16.msra.mxu0 %v1778_v19  ;;  %330 = vmatpush1.bf16.msra.mxu1 %v1779_v20  ;;  %v2257_v54 = vld [vmem:[%s2902_s2 + $0x80] ss:$16 sps:$4 sm:$0xff]   ;;  %v2262_v55 = vld [vmem:[%s2902_s2 + $0x88] ss:$16 sps:$4 sm:$0xff]   ;;  %v2269_v56 = vld [vmem:[%s2902_s2 + $0xa4] ss:$16 sps:$4 sm:$0xff]  }
  0x14   :  { %258 = vmatprep.subr.bf16.mxu0 %v1780_v21  ;;  %331 = vmatprep.subr.bf16.mxu1 %v1782_v22  ;;  %v2274_v57 = vld [vmem:[%s2902_s2 + $0xac] ss:$16 sps:$4 sm:$0xff]   ;;  %v2281_v58 = vld [vmem:[%s2902_s2 + $0xa0] ss:$16 sps:$4 sm:$0xff]   ;;  %v2286_v59 = vld [vmem:[%s2902_s2 + $0xa8] ss:$16 sps:$4 sm:$0xff]  }
  0x15   :  { %v2293_v60 = vld [vmem:[%s2902_s2 + $0xc4] ss:$16 sps:$4 sm:$0xff]   ;;  %v2298_v61 = vld [vmem:[%s2902_s2 + $0xcc] ss:$16 sps:$4 sm:$0xff]   ;;  %v2310_v63 = vld [vmem:[%s2902_s2 + $0xc0] ss:$16 sps:$4 sm:$0xff]  }
  0x16   :  { %v1837_v62 = vld [vmem:[%s2901_s0 + $0x18] sm:$0xff]   ;;  %v2322_v2 = vld [vmem:[%s2902_s2 + $0xe4] ss:$16 sps:$4 sm:$0xff]   ;;  %v2334_v4 = vld [vmem:[%s2902_s2 + $0xe0] ss:$16 sps:$4 sm:$0xff]   ;;  %v466_v11 = vsub.s32 0, %v465_v8 }
  0x17   :  { %259 = vmatpush1.bf16.msra.mxu0 %v1784_v23  ;;  %332 = vmatpush1.bf16.msra.mxu1 %v1785_v24  ;;  %v2315_v0 = vld [vmem:[%s2902_s2 + $0xc8] ss:$16 sps:$4 sm:$0xff]   ;;  %v2327_v3 = vld [vmem:[%s2902_s2 + $0xec] ss:$16 sps:$4 sm:$0xff]   ;;  %v488_v6 = vld [vmem:[#allocation3] sm:$0xf] }
  0x18   :  { %260 = vmatprep.subr.bf16.mxu0 %v1786_v25  ;;  %333 = vmatprep.subr.bf16.mxu1 %v1788_v26  ;;  %v2339_v5 = vld [vmem:[%s2902_s2 + $0xe8] ss:$16 sps:$4 sm:$0xff]   ;;  %v458_v12 = vld [vmem:[%s2903_s3] sm:$0xf]  ;;  %v470_v13 = vsub.s32 1, %v465_v8 }
  0x19   :  { %v2386_v14 = vrot.slane %v458_v12, %v474_v9  ;;  %v2392_v17 = vrot.slane %v458_v12, %v478_v10  ;;  %v467_v18 = vrot.slane %v458_v12, %v466_v11 }
  0x1a   :  { %v471_v21 = vrot.slane %v458_v12, %v470_v13 }
  0x1b   :  { %261 = vmatpush1.bf16.msra.mxu0 %v1790_v27  ;;  %334 = vmatpush1.bf16.msra.mxu1 %v1791_v28 }
  0x1c   :  { %262 = vmatprep.subr.bf16.mxu0 %v1792_v29  ;;  %335 = vmatprep.subr.bf16.mxu1 %v1794_v30 }
  0x1f   :  { %263 = vmatpush1.bf16.msra.mxu0 %v1796_v31  ;;  %336 = vmatpush1.bf16.msra.mxu1 %v1797_v32 }
  0x20   :  { %649 = vmatprep.subr.bf16.mxu0 %v2138_v33  ;;  %690 = vmatprep.subr.bf16.mxu1 %v2143_v34 }
  0x22   :  { %281 = vmatmul.mubr.bf16.vlgmr.msra.gmra.mrb[0].mxu0 %v1798_v35  ;;  %354 = vmatmul.mubr.bf16.vlgmr.msra.gmra.mrb[0].mxu1 %v1798_v35 }
  0x23   :  { %650 = vmatpush1.bf16.msra.mxu0 %v2151_v36  ;;  %691 = vmatpush1.bf16.msra.mxu1 %v2156_v37 }
  0x24   :  { %651 = vmatprep.subr.bf16.mxu0 %v2163_v38  ;;  %692 = vmatprep.subr.bf16.mxu1 %v2168_v39 }
  0x25   :  { %290 = vmatprep.mubr.bf16.mxu0 %v2905_v1  ;;  %363 = vmatprep.mubr.bf16.mxu1 %v2905_v1 }
  0x27   :  { %652 = vmatpush1.bf16.msra.mxu0 %v2173_v40  ;;  %693 = vmatpush1.bf16.msra.mxu1 %v2180_v41 }
  0x28   :  { %653 = vmatprep.subr.bf16.mxu0 %v2187_v42  ;;  %694 = vmatprep.subr.bf16.mxu1 %v2192_v43 }
  0x2a   :  { %291 = vmatmul.mubr.bf16.gmra.mrb[4].mxu0 %v1811_v44  ;;  %364 = vmatmul.mubr.bf16.gmra.mrb[4].mxu1 %v1811_v44 }
  0x2b   :  { %654 = vmatpush1.bf16.msra.mxu0 %v2202_v45  ;;  %695 = vmatpush1.bf16.msra.mxu1 %v2207_v46 }
  0x2c   :  { %655 = vmatprep.subr.bf16.mxu0 %v2214_v47  ;;  %696 = vmatprep.subr.bf16.mxu1 %v2221_v48 }
  0x2d   :  { %300 = vmatprep.mubr.bf16.mxu0 %v2905_v1  ;;  %373 = vmatprep.mubr.bf16.mxu1 %v2905_v1 }
  0x2f   :  { %656 = vmatpush1.bf16.msra.mxu0 %v2226_v49  ;;  %697 = vmatpush1.bf16.msra.mxu1 %v2231_v50 }
  0x30   :  { %657 = vmatprep.subr.bf16.mxu0 %v2238_v51  ;;  %698 = vmatprep.subr.bf16.mxu1 %v2245_v52 }
  0x32   :  { %301 = vmatmul.mubr.bf16.gmra.mrb[8].mxu0 %v1824_v53  ;;  %374 = vmatmul.mubr.bf16.gmra.mrb[8].mxu1 %v1824_v53 }
  0x33   :  { %658 = vmatpush1.bf16.msra.mxu0 %v2257_v54  ;;  %699 = vmatpush1.bf16.msra.mxu1 %v2262_v55 }
  0x34   :  { %659 = vmatprep.subr.bf16.mxu0 %v2269_v56  ;;  %700 = vmatprep.subr.bf16.mxu1 %v2274_v57 }
  0x35   :  { %310 = vmatprep.mubr.bf16.mxu0 %v2905_v1  ;;  %383 = vmatprep.mubr.bf16.mxu1 %v2905_v1 }
  0x37   :  { %660 = vmatpush1.bf16.msra.mxu0 %v2281_v58  ;;  %701 = vmatpush1.bf16.msra.mxu1 %v2286_v59 }
  0x38   :  { %661 = vmatprep.subr.bf16.mxu0 %v2293_v60  ;;  %702 = vmatprep.subr.bf16.mxu1 %v2298_v61 }
  0x3a   :  { %311 = vmatmul.mubr.bf16.gmra.mrb[12].mxu0 %v1837_v62  ;;  %384 = vmatmul.mubr.bf16.gmra.mrb[12].mxu1 %v1837_v62 }
  0x3b   :  { %662 = vmatpush1.bf16.msra.mxu0 %v2310_v63  ;;  %703 = vmatpush1.bf16.msra.mxu1 %v2315_v0 }
  0x3c   :  { %663 = vmatprep.subr.bf16.mxu0 %v2322_v2  ;;  %704 = vmatprep.subr.bf16.mxu1 %v2327_v3 }
  0x3d   :  { %681 = vmatprep.mubr.bf16.mxu0 %v2905_v1  ;;  %722 = vmatprep.mubr.bf16.mxu1 %v2905_v1 }
  0x3f   :  { %664 = vmatpush1.bf16.msra.mxu0 %v2334_v4  ;;  %705 = vmatpush1.bf16.msra.mxu1 %v2339_v5 }
  0x40   :  { %774 = vmatprep.subr.bf16.mxu0 %v2138_v33  ;;  %815 = vmatprep.subr.bf16.mxu1 %v2143_v34 }
  0x42   :  { %682 = vmatmul.mubr.bf16.vlgmr.msra.gmra.mrb[16].mxu0 %v488_v6  ;;  %723 = vmatmul.mubr.bf16.vlgmr.msra.gmra.mrb[16].mxu1 %v488_v6 }
  0x43   :  { %775 = vmatpush1.bf16.msra.mxu0 %v2151_v36  ;;  %816 = vmatpush1.bf16.msra.mxu1 %v2156_v37 }
  0x44   :  { %776 = vmatprep.subr.bf16.mxu0 %v2163_v38  ;;  %817 = vmatprep.subr.bf16.mxu1 %v2168_v39 }
  0x45   :  { %806 = vmatprep.mubr.bf16.mxu0 %v2905_v1  ;;  %847 = vmatprep.mubr.bf16.mxu1 %v2905_v1 }
  0x47   :  { %777 = vmatpush1.bf16.msra.mxu0 %v2173_v40  ;;  %818 = vmatpush1.bf16.msra.mxu1 %v2180_v41 }
  0x48   :  { %778 = vmatprep.subr.bf16.mxu0 %v2187_v42  ;;  %819 = vmatprep.subr.bf16.mxu1 %v2192_v43 }
  0x4b   :  { %779 = vmatpush1.bf16.msra.mxu0 %v2202_v45  ;;  %820 = vmatpush1.bf16.msra.mxu1 %v2207_v46 }
  0x4c   :  { %780 = vmatprep.subr.bf16.mxu0 %v2214_v47  ;;  %821 = vmatprep.subr.bf16.mxu1 %v2221_v48 }
  0x4f   :  { %781 = vmatpush1.bf16.msra.mxu0 %v2226_v49  ;;  %822 = vmatpush1.bf16.msra.mxu1 %v2231_v50 }
  0x50   :  { %782 = vmatprep.subr.bf16.mxu0 %v2238_v51  ;;  %823 = vmatprep.subr.bf16.mxu1 %v2245_v52 }
  0x53   :  { %783 = vmatpush1.bf16.msra.mxu0 %v2257_v54  ;;  %824 = vmatpush1.bf16.msra.mxu1 %v2262_v55 }
  0x54   :  { %784 = vmatprep.subr.bf16.mxu0 %v2269_v56  ;;  %825 = vmatprep.subr.bf16.mxu1 %v2274_v57 }
  0x57   :  { %785 = vmatpush1.bf16.msra.mxu0 %v2281_v58  ;;  %826 = vmatpush1.bf16.msra.mxu1 %v2286_v59 }
  0x58   :  { %786 = vmatprep.subr.bf16.mxu0 %v2293_v60  ;;  %827 = vmatprep.subr.bf16.mxu1 %v2298_v61 }
  0x5b   :  { %787 = vmatpush1.bf16.msra.mxu0 %v2310_v63  ;;  %828 = vmatpush1.bf16.msra.mxu1 %v2315_v0 }
  0x5c   :  { %788 = vmatprep.subr.bf16.mxu0 %v2322_v2  ;;  %829 = vmatprep.subr.bf16.mxu1 %v2327_v3 }
  0x5f   :  { %789 = vmatpush1.bf16.msra.mxu0 %v2334_v4  ;;  %830 = vmatpush1.bf16.msra.mxu1 %v2339_v5 }
  0x60   :  { %900 = vmatprep.subr.bf16.mxu0 %v2138_v33  ;;  %941 = vmatprep.subr.bf16.mxu1 %v2143_v34 }
  0xf5   :  { %v2388_v15 = vpop.f32.mrb[0].mxu0  ;;  %v2390_v16 = vpop.f32.mrb[0].mxu1 }
  0xf6   :  { %v284_v19 = vpop.f32.mrb[1].mxu0  ;;  %v357_v20 = vpop.f32.mrb[1].mxu1 }
  0xf7   :  { %v286_v22 = vpop.f32.mrb[2].mxu0  ;;  %v359_v23 = vpop.f32.mrb[2].mxu1 }
  0xf8   :  { %v2394_v24 = vadd.f32 %v467_v18, %v286_v22  ;;  %v288_v25 = vpop.f32.mrb[3].mxu0  ;;  %v2397_v26 = vadd.f32 %v2386_v14, %v359_v23  ;;  %v361_v27 = vpop.f32.mrb[3].mxu1 }
  0xf9   :  { %v2399_v28 = vadd.f32 %v471_v21, %v288_v25  ;;  %v2402_v29 = vadd.f32 %v2392_v17, %v361_v27 }
  0xfd   :  { %v292_v30 = vpop.f32.mrb[4].mxu0  ;;  %v365_v31 = vpop.f32.mrb[4].mxu1 }
  0xfe   :  { %v2404_v32 = vadd.f32 %v467_v18, %v292_v30  ;;  %v294_v35 = vpop.f32.mrb[5].mxu0  ;;  %v2407_v44 = vadd.f32 %v2386_v14, %v365_v31  ;;  %v367_v53 = vpop.f32.mrb[5].mxu1 }
  0xff   :  { %v2409_v62 = vadd.f32 %v471_v21, %v294_v35  ;;  %v296_v6 = vpop.f32.mrb[6].mxu0  ;;  %v2412_v7 = vadd.f32 %v2392_v17, %v367_v53  ;;  %v369_v8 = vpop.f32.mrb[6].mxu1 }
 0x100   :  { %v2414_v9 = vadd.f32 %v467_v18, %v296_v6  ;;  %v298_v10 = vpop.f32.mrb[7].mxu0  ;;  %v2417_v11 = vadd.f32 %v2386_v14, %v369_v8  ;;  %v371_v12 = vpop.f32.mrb[7].mxu1 }
 0x101   :  { %2907 = vst [vmem:[#allocation5_spill] sm:$0xff] %v2412_v7  ;;  %v2419_v13 = vadd.f32 %v471_v21, %v298_v10  ;;  %v2422_v22 = vadd.f32 %v2392_v17, %v371_v12 }
 0x102   :  { %2908 = vst [vmem:[#allocation6_spill] sm:$0xff] %v2414_v9  ;;  %2909 = vst [vmem:[#allocation7_spill] sm:$0xff] %v2417_v11 }
 0x103   :  { %2910 = vst [vmem:[#allocation8_spill] sm:$0xff] %v2419_v13  ;;  %2911 = vst [vmem:[#allocation9_spill] sm:$0xff] %v2422_v22 }
 0x105   :  { %v302_v23 = vpop.f32.mrb[8].mxu0  ;;  %v375_v25 = vpop.f32.mrb[8].mxu1 }
 0x106   :  { %v2424_v27 = vadd.f32 %v467_v18, %v302_v23  ;;  %v304_v30 = vpop.f32.mrb[9].mxu0  ;;  %v2427_v31 = vadd.f32 %v2386_v14, %v375_v25  ;;  %v377_v35 = vpop.f32.mrb[9].mxu1 }
 0x107   :  { %v2429_v53 = vadd.f32 %v471_v21, %v304_v30  ;;  %v306_v6 = vpop.f32.mrb[10].mxu0  ;;  %v2432_v8 = vadd.f32 %v2392_v17, %v377_v35  ;;  %v379_v10 = vpop.f32.mrb[10].mxu1 }
 0x108   :  { %2912 = vst [vmem:[#allocation10_spill] sm:$0xff] %v2424_v27  ;;  %2913 = vst [vmem:[#allocation11_spill] sm:$0xff] %v2427_v31  ;;  %v2434_v1 = vadd.f32 %v467_v18, %v306_v6  ;;  %v308_v12 = vpop.f32.mrb[11].mxu0  ;;  %v2437_v22 = vadd.f32 %v2386_v14, %v379_v10  ;;  %v381_v23 = vpop.f32.mrb[11].mxu1 }
 0x109   :  { %2914 = vst [vmem:[#allocation12_spill] sm:$0xff] %v2429_v53  ;;  %2915 = vst [vmem:[#allocation13_spill] sm:$0xff] %v2432_v8  ;;  %v2439_v27 = vadd.f32 %v471_v21, %v308_v12  ;;  %v2442_v25 = vadd.f32 %v2392_v17, %v381_v23 }
 0x10a   :  { %2916 = vst [vmem:[#allocation14_spill] sm:$0xff] %v2434_v1  ;;  %2917 = vst [vmem:[#allocation15_spill] sm:$0xff] %v2437_v22 }
 0x10b   :  { %2918 = vst [vmem:[#allocation16_spill] sm:$0xff] %v2439_v27  ;;  %2919 = vst [vmem:[#allocation17_spill] sm:$0xff] %v2442_v25 }
 0x10d   :  { %v312_v31 = vpop.f32.mrb[12].mxu0  ;;  %v385_v30 = vpop.f32.mrb[12].mxu1 }
 0x10e   :  { %v2444_v53 = vadd.f32 %v467_v18, %v312_v31  ;;  %v314_v13 = vpop.f32.mrb[13].mxu0  ;;  %v2447_v35 = vadd.f32 %v2386_v14, %v385_v30  ;;  %v387_v6 = vpop.f32.mrb[13].mxu1 }
 0x10f   :  { %v2449_v1 = vadd.f32 %v471_v21, %v314_v13  ;;  %v316_v8 = vpop.f32.mrb[14].mxu0  ;;  %v2452_v10 = vadd.f32 %v2392_v17, %v387_v6  ;;  %v389_v12 = vpop.f32.mrb[14].mxu1  ;;  %v484_v13 = vadd.f32 %v467_v18, %v2388_v15  ;;  %v485_v6 = vadd.f32 %v471_v21, %v284_v19 }
 0x110   :  { %2920 = vst [vmem:[#allocation18_spill] sm:$0xff] %v2444_v53  ;;  %2921 = vst [vmem:[#allocation19_spill] sm:$0xff] %v2447_v35  ;;  %v2454_v27 = vadd.f32 %v467_v18, %v316_v8  ;;  %v318_v23 = vpop.f32.mrb[15].mxu0  ;;  %v2457_v25 = vadd.f32 %v2386_v14, %v389_v12  ;;  %v391_v31 = vpop.f32.mrb[15].mxu1 }
 0x111   :  { %2922 = vst [vmem:[#allocation20_spill] sm:$0xff] %v2449_v1  ;;  %2923 = vst [vmem:[#allocation21_spill] sm:$0xff] %v2452_v10  ;;  %v2459_v53 = vadd.f32 %v471_v21, %v318_v23  ;;  %v2462_v30 = vadd.f32 %v2392_v17, %v391_v31  ;;  %v486_v1 = vadd.f32 %v2386_v14, %v2390_v16 }
 0x112   :  { %2924 = vst [vmem:[#allocation22_spill] sm:$0xff] %v2454_v27  ;;  %2925 = vst [vmem:[#allocation23_spill] sm:$0xff] %v2457_v25  ;;  %v487_v10 = vadd.f32 %v2392_v17, %v357_v20 }
 0x113   :  { %2926 = vst [vmem:[#allocation24_spill] sm:$0xff] %v2459_v53  ;;  %2927 = vst [vmem:[#allocation25_spill] sm:$0xff] %v2462_v30 }
 0x115   :  { %v683_v8 = vpop.f32.mrb[16].mxu0  ;;  %v724_v27 = vpop.f32.mrb[16].mxu1 }
 0x116   :  { %v731_v35 = vadd.f32 %v683_v8, %v484_v13  ;;  %v733_v22 = vadd.f32 %v724_v27, %v486_v1  ;;  %v685_v12 = vpop.f32.mrb[17].mxu0  ;;  %v726_v25 = vpop.f32.mrb[17].mxu1  ;;  %v2928_v13 = vmov 0  }
 0x117   :  { %v732_v11 = vadd.f32 %v685_v12, %v485_v6  ;;  %v734_v23 = vadd.f32 %v726_v25, %v487_v10  ;;  %v687_v53 = vpop.f32.mrb[18].mxu0  ;;  %v728_v9 = vpop.f32.mrb[18].mxu1 }
 0x118   :  { %v1718_v31 = vmul.f32 -1.442695, %v731_v35  ;;  %v688_v30 = vpop.f32.mrb[19].mxu0  ;;  %v729_v7 = vpop.f32.mrb[19].mxu1 }
 0x119   :  { %v1719_v15 = vmul.f32 -1.442695, %v732_v11  ;;  %v1720_v14 = vmul.f32 -1.442695, %v734_v23 }
 0x11a   :  { %1850 = vpow2.f32 %v1718_v31 }
 0x11b   :  { %1852 = vpow2.f32 %v1719_v15 }
 0x11c   :  { %1854 = vpow2.f32 %v1720_v14 }
 0x11d   :  { %1856 = vtanh.f32 %v733_v22 }
 0x124   :  { %v1851_v16 = vpop.eup %1850 }
 0x125   :  { %v1853_v18 = vpop.eup %1852  ;;  %v738_v17 = vadd.f32 1.0, %v1851_v16 }
 0x126   :  { %v744_v19 = vadd.f32 1.0, %v1853_v18  ;;  %v1855_v1 = vpop.eup %1854 }
 0x127   :  { %1858 = vrcp.f32 %v738_v17  ;;  %v1857_v20 = vpop.eup %1856  ;;  %v751_v53 = vadd.f32 1.0, %v1855_v1 }
 0x128   :  { %1860 = vrcp.f32 %v744_v19 }
 0x129   :  { %1862 = vrcp.f32 %v751_v53 }
 0x131   :  { %v1859_v21 = vpop.eup %1858 }
 0x132   :  { %v1861_v27 = vpop.eup %1860  ;;  %v756_v9 = vmul.f32 %v1859_v21, %v1857_v20 }
 0x133   :  { %v755_v25 = vmul.f32 0.0, %v1861_v27  ;;  %v1863_v11 = vpop.eup %1862 }
 0x135   :  { %v2468_v7 = vadd.f32 %v756_v9, %v755_v25 }
 0x137   :  { %1864 = vtanh.f32 %v2468_v7 }
 0x141   :  { %v1865_v35 = vpop.eup %1864 }
 0x142   :  { %v759_v10 = vmul.f32 %v1865_v35, %v1863_v11 }
 0x144   :  { %v761_v30 = vpack.c.bf16 %v759_v10, %v759_v10  ;;  %763 = vst [vmem:[%s2904_s4] sm:$0xff] %v759_v10 }
 0x146   :  { %762 = vst [vmem:[#allocation3] sm:$0xf] %v761_v30 }
 0x14d   :  { %v773_v22 = vld [vmem:[#allocation3] sm:$0xf] }
 0x14e   :  { %807 = vmatmul.mubr.bf16.vlgmr.msra.gmra.mrb[20].mxu0 %v773_v22  ;;  %848 = vmatmul.mubr.bf16.vlgmr.msra.gmra.mrb[20].mxu1 %v773_v22 }
 0x14f   :  { %901 = vmatpush1.bf16.msra.mxu0 %v2151_v36  ;;  %942 = vmatpush1.bf16.msra.mxu1 %v2156_v37 }
 0x150   :  { %902 = vmatprep.subr.bf16.mxu0 %v2163_v38  ;;  %943 = vmatprep.subr.bf16.mxu1 %v2168_v39 }
 0x151   :  { %932 = vmatprep.mubr.bf16.mxu0 %v2928_v13  ;;  %973 = vmatprep.mubr.bf16.mxu1 %v2928_v13 }
 0x153   :  { %903 = vmatpush1.bf16.msra.mxu0 %v2173_v40  ;;  %944 = vmatpush1.bf16.msra.mxu1 %v2180_v41 }
 0x154   :  { %904 = vmatprep.subr.bf16.mxu0 %v2187_v42  ;;  %945 = vmatprep.subr.bf16.mxu1 %v2192_v43 }
 0x157   :  { %905 = vmatpush1.bf16.msra.mxu0 %v2202_v45  ;;  %946 = vmatpush1.bf16.msra.mxu1 %v2207_v46 }
 0x158   :  { %906 = vmatprep.subr.bf16.mxu0 %v2214_v47  ;;  %947 = vmatprep.subr.bf16.mxu1 %v2221_v48 }
 0x15b   :  { %907 = vmatpush1.bf16.msra.mxu0 %v2226_v49  ;;  %948 = vmatpush1.bf16.msra.mxu1 %v2231_v50 }
 0x15c   :  { %908 = vmatprep.subr.bf16.mxu0 %v2238_v51  ;;  %949 = vmatprep.subr.bf16.mxu1 %v2245_v52 }
 0x15f   :  { %909 = vmatpush1.bf16.msra.mxu0 %v2257_v54  ;;  %950 = vmatpush1.bf16.msra.mxu1 %v2262_v55 }
 0x160   :  { %910 = vmatprep.subr.bf16.mxu0 %v2269_v56  ;;  %951 = vmatprep.subr.bf16.mxu1 %v2274_v57 }
 0x163   :  { %911 = vmatpush1.bf16.msra.mxu0 %v2281_v58  ;;  %952 = vmatpush1.bf16.msra.mxu1 %v2286_v59 }
 0x164   :  { %912 = vmatprep.subr.bf16.mxu0 %v2293_v60  ;;  %953 = vmatprep.subr.bf16.mxu1 %v2298_v61 }
 0x167   :  { %913 = vmatpush1.bf16.msra.mxu0 %v2310_v63  ;;  %954 = vmatpush1.bf16.msra.mxu1 %v2315_v0 }
 0x168   :  { %914 = vmatprep.subr.bf16.mxu0 %v2322_v2  ;;  %955 = vmatprep.subr.bf16.mxu1 %v2327_v3 }
 0x16b   :  { %915 = vmatpush1.bf16.msra.mxu0 %v2334_v4  ;;  %956 = vmatpush1.bf16.msra.mxu1 %v2339_v5 }
 0x16c   :  { %1026 = vmatprep.subr.bf16.mxu0 %v2138_v33  ;;  %1067 = vmatprep.subr.bf16.mxu1 %v2143_v34 }
 0x221   :  { %v808_v6 = vpop.f32.mrb[20].mxu0  ;;  %v849_v8 = vpop.f32.mrb[20].mxu1 }
 0x222   :  { %v856_v12 = vadd.f32 %v808_v6, %v2394_v24  ;;  %v858_v23 = vadd.f32 %v849_v8, %v2397_v26  ;;  %v810_v31 = vpop.f32.mrb[21].mxu0  ;;  %v851_v15 = vpop.f32.mrb[21].mxu1 }
 0x223   :  { %v857_v14 = vadd.f32 %v810_v31, %v2399_v28  ;;  %v859_v16 = vadd.f32 %v851_v15, %v2402_v29  ;;  %v812_v18 = vpop.f32.mrb[22].mxu0  ;;  %v853_v17 = vpop.f32.mrb[22].mxu1 }
 0x224   :  { %v1721_v19 = vmul.f32 -1.442695, %v856_v12  ;;  %v813_v1 = vpop.f32.mrb[23].mxu0  ;;  %v854_v20 = vpop.f32.mrb[23].mxu1 }
 0x225   :  { %v1722_v21 = vmul.f32 -1.442695, %v857_v14  ;;  %v1723_v27 = vmul.f32 -1.442695, %v859_v16  ;;  %v2929_v1 = vld [vmem:[#allocation5_spill] sm:$0xff] }
 0x226   :  { %1866 = vpow2.f32 %v1721_v19 }
 0x227   :  { %1868 = vpow2.f32 %v1722_v21 }
 0x228   :  { %1870 = vpow2.f32 %v1723_v27 }
 0x229   :  { %1872 = vtanh.f32 %v858_v23 }
 0x230   :  { %v1867_v9 = vpop.eup %1866 }
 0x231   :  { %v1869_v53 = vpop.eup %1868  ;;  %v863_v24 = vadd.f32 1.0, %v1867_v9 }
 0x232   :  { %v869_v26 = vadd.f32 1.0, %v1869_v53  ;;  %v1871_v28 = vpop.eup %1870 }
 0x233   :  { %1874 = vrcp.f32 %v863_v24  ;;  %v1873_v25 = vpop.eup %1872  ;;  %v876_v10 = vadd.f32 1.0, %v1871_v28 }
 0x234   :  { %1876 = vrcp.f32 %v869_v26 }
 0x235   :  { %1878 = vrcp.f32 %v876_v10 }
 0x23d   :  { %v1875_v29 = vpop.eup %1874 }
 0x23e   :  { %v1877_v11 = vpop.eup %1876  ;;  %v881_v35 = vmul.f32 %v1875_v29, %v1873_v25 }
 0x23f   :  { %v880_v30 = vmul.f32 %v1877_v11, %v2468_v7  ;;  %v1879_v6 = vpop.eup %1878 }
 0x241   :  { %v2513_v22 = vadd.f32 %v881_v35, %v880_v30 }
 0x243   :  { %1880 = vtanh.f32 %v2513_v22 }
 0x24d   :  { %v1881_v8 = vpop.eup %1880 }
 0x24e   :  { %v884_v12 = vmul.f32 %v1881_v8, %v1879_v6 }
 0x250   :  { %v886_v23 = vpack.c.bf16 %v884_v12, %v884_v12  ;;  %1724 = vst [vmem:[%s2904_s4 + $0x8] sm:$0xff] %v884_v12 }
 0x252   :  { %887 = vst [vmem:[#allocation3] sm:$0xf] %v886_v23 }
 0x259   :  { %v899_v31 = vld [vmem:[#allocation3] sm:$0xf] }
 0x25a   :  { %933 = vmatmul.mubr.bf16.vlgmr.msra.gmra.mrb[24].mxu0 %v899_v31  ;;  %974 = vmatmul.mubr.bf16.vlgmr.msra.gmra.mrb[24].mxu1 %v899_v31 }
 0x25b   :  { %1027 = vmatpush1.bf16.msra.mxu0 %v2151_v36  ;;  %1068 = vmatpush1.bf16.msra.mxu1 %v2156_v37 }
 0x25c   :  { %1028 = vmatprep.subr.bf16.mxu0 %v2163_v38  ;;  %1069 = vmatprep.subr.bf16.mxu1 %v2168_v39 }
 0x25d   :  { %1058 = vmatprep.mubr.bf16.mxu0 %v2928_v13  ;;  %1099 = vmatprep.mubr.bf16.mxu1 %v2928_v13 }
 0x25f   :  { %1029 = vmatpush1.bf16.msra.mxu0 %v2173_v40  ;;  %1070 = vmatpush1.bf16.msra.mxu1 %v2180_v41 }
 0x260   :  { %1030 = vmatprep.subr.bf16.mxu0 %v2187_v42  ;;  %1071 = vmatprep.subr.bf16.mxu1 %v2192_v43 }
 0x263   :  { %1031 = vmatpush1.bf16.msra.mxu0 %v2202_v45  ;;  %1072 = vmatpush1.bf16.msra.mxu1 %v2207_v46 }
 0x264   :  { %1032 = vmatprep.subr.bf16.mxu0 %v2214_v47  ;;  %1073 = vmatprep.subr.bf16.mxu1 %v2221_v48 }
 0x267   :  { %1033 = vmatpush1.bf16.msra.mxu0 %v2226_v49  ;;  %1074 = vmatpush1.bf16.msra.mxu1 %v2231_v50 }
 0x268   :  { %1034 = vmatprep.subr.bf16.mxu0 %v2238_v51  ;;  %1075 = vmatprep.subr.bf16.mxu1 %v2245_v52 }
 0x26b   :  { %1035 = vmatpush1.bf16.msra.mxu0 %v2257_v54  ;;  %1076 = vmatpush1.bf16.msra.mxu1 %v2262_v55 }
 0x26c   :  { %1036 = vmatprep.subr.bf16.mxu0 %v2269_v56  ;;  %1077 = vmatprep.subr.bf16.mxu1 %v2274_v57 }
 0x26f   :  { %1037 = vmatpush1.bf16.msra.mxu0 %v2281_v58  ;;  %1078 = vmatpush1.bf16.msra.mxu1 %v2286_v59 }
 0x270   :  { %1038 = vmatprep.subr.bf16.mxu0 %v2293_v60  ;;  %1079 = vmatprep.subr.bf16.mxu1 %v2298_v61 }
 0x273   :  { %1039 = vmatpush1.bf16.msra.mxu0 %v2310_v63  ;;  %1080 = vmatpush1.bf16.msra.mxu1 %v2315_v0 }
 0x274   :  { %1040 = vmatprep.subr.bf16.mxu0 %v2322_v2  ;;  %1081 = vmatprep.subr.bf16.mxu1 %v2327_v3 }
 0x277   :  { %1041 = vmatpush1.bf16.msra.mxu0 %v2334_v4  ;;  %1082 = vmatpush1.bf16.msra.mxu1 %v2339_v5 }
 0x278   :  { %1152 = vmatprep.subr.bf16.mxu0 %v2138_v33  ;;  %1193 = vmatprep.subr.bf16.mxu1 %v2143_v34 }
 0x32d   :  { %v934_v7 = vpop.f32.mrb[24].mxu0  ;;  %v975_v15 = vpop.f32.mrb[24].mxu1 }
 0x32e   :  { %v982_v14 = vadd.f32 %v934_v7, %v2404_v32  ;;  %v984_v16 = vadd.f32 %v975_v15, %v2407_v44  ;;  %v936_v18 = vpop.f32.mrb[25].mxu0  ;;  %v977_v17 = vpop.f32.mrb[25].mxu1 }
 0x32f   :  { %v983_v19 = vadd.f32 %v936_v18, %v2409_v62  ;;  %v985_v20 = vadd.f32 %v977_v17, %v2929_v1  ;;  %v938_v21 = vpop.f32.mrb[26].mxu0  ;;  %v979_v27 = vpop.f32.mrb[26].mxu1  ;;  %v2930_v18 = vld [vmem:[#allocation6_spill] sm:$0xff] }
 0x330   :  { %v1725_v9 = vmul.f32 -1.442695, %v982_v14  ;;  %v939_v53 = vpop.f32.mrb[27].mxu0  ;;  %v980_v24 = vpop.f32.mrb[27].mxu1  ;;  %v2932_v27 = vld [vmem:[#allocation8_spill] sm:$0xff] }
 0x331   :  { %v1726_v26 = vmul.f32 -1.442695, %v983_v19  ;;  %v1727_v28 = vmul.f32 -1.442695, %v985_v20  ;;  %v2931_v19 = vld [vmem:[#allocation7_spill] sm:$0xff]  ;;  %v2933_v53 = vld [vmem:[#allocation9_spill] sm:$0xff] }
 0x332   :  { %1882 = vpow2.f32 %v1725_v9 }
 0x333   :  { %1884 = vpow2.f32 %v1726_v26 }
 0x334   :  { %1886 = vpow2.f32 %v1727_v28 }
 0x335   :  { %1888 = vtanh.f32 %v984_v16 }
 0x33c   :  { %v1883_v25 = vpop.eup %1882 }
 0x33d   :  { %v1885_v29 = vpop.eup %1884  ;;  %v989_v32 = vadd.f32 1.0, %v1883_v25 }
 0x33e   :  { %v995_v44 = vadd.f32 1.0, %v1885_v29  ;;  %v1887_v62 = vpop.eup %1886 }
 0x33f   :  { %1890 = vrcp.f32 %v989_v32  ;;  %v1889_v11 = vpop.eup %1888  ;;  %v1002_v6 = vadd.f32 1.0, %v1887_v62 }
 0x340   :  { %1892 = vrcp.f32 %v995_v44 }
 0x341   :  { %1894 = vrcp.f32 %v1002_v6 }
 0x349   :  { %v1891_v35 = vpop.eup %1890 }
 0x34a   :  { %v1893_v10 = vpop.eup %1892  ;;  %v1007_v30 = vmul.f32 %v1891_v35, %v1889_v11 }
 0x34b   :  { %v1006_v8 = vmul.f32 %v1893_v10, %v2513_v22  ;;  %v1895_v23 = vpop.eup %1894 }
 0x34d   :  { %v2558_v12 = vadd.f32 %v1007_v30, %v1006_v8 }
 0x34f   :  { %1896 = vtanh.f32 %v2558_v12 }
 0x359   :  { %v1897_v31 = vpop.eup %1896 }
 0x35a   :  { %v1010_v7 = vmul.f32 %v1897_v31, %v1895_v23 }
 0x35c   :  { %v1012_v15 = vpack.c.bf16 %v1010_v7, %v1010_v7  ;;  %1728 = vst [vmem:[%s2904_s4 + $0x10] sm:$0xff] %v1010_v7 }
 0x35e   :  { %1013 = vst [vmem:[#allocation3] sm:$0xf] %v1012_v15 }
 0x365   :  { %v1025_v14 = vld [vmem:[#allocation3] sm:$0xf] }
 0x366   :  { %1059 = vmatmul.mubr.bf16.vlgmr.msra.gmra.mrb[28].mxu0 %v1025_v14  ;;  %1100 = vmatmul.mubr.bf16.vlgmr.msra.gmra.mrb[28].mxu1 %v1025_v14 }
 0x367   :  { %1153 = vmatpush1.bf16.msra.mxu0 %v2151_v36  ;;  %1194 = vmatpush1.bf16.msra.mxu1 %v2156_v37 }
 0x368   :  { %1154 = vmatprep.subr.bf16.mxu0 %v2163_v38  ;;  %1195 = vmatprep.subr.bf16.mxu1 %v2168_v39 }
 0x369   :  { %1184 = vmatprep.mubr.bf16.mxu0 %v2928_v13  ;;  %1225 = vmatprep.mubr.bf16.mxu1 %v2928_v13 }
 0x36b   :  { %1155 = vmatpush1.bf16.msra.mxu0 %v2173_v40  ;;  %1196 = vmatpush1.bf16.msra.mxu1 %v2180_v41 }
 0x36c   :  { %1156 = vmatprep.subr.bf16.mxu0 %v2187_v42  ;;  %1197 = vmatprep.subr.bf16.mxu1 %v2192_v43 }
 0x36f   :  { %1157 = vmatpush1.bf16.msra.mxu0 %v2202_v45  ;;  %1198 = vmatpush1.bf16.msra.mxu1 %v2207_v46 }
 0x370   :  { %1158 = vmatprep.subr.bf16.mxu0 %v2214_v47  ;;  %1199 = vmatprep.subr.bf16.mxu1 %v2221_v48 }
 0x373   :  { %1159 = vmatpush1.bf16.msra.mxu0 %v2226_v49  ;;  %1200 = vmatpush1.bf16.msra.mxu1 %v2231_v50 }
 0x374   :  { %1160 = vmatprep.subr.bf16.mxu0 %v2238_v51  ;;  %1201 = vmatprep.subr.bf16.mxu1 %v2245_v52 }
 0x377   :  { %1161 = vmatpush1.bf16.msra.mxu0 %v2257_v54  ;;  %1202 = vmatpush1.bf16.msra.mxu1 %v2262_v55 }
 0x378   :  { %1162 = vmatprep.subr.bf16.mxu0 %v2269_v56  ;;  %1203 = vmatprep.subr.bf16.mxu1 %v2274_v57 }
 0x37b   :  { %1163 = vmatpush1.bf16.msra.mxu0 %v2281_v58  ;;  %1204 = vmatpush1.bf16.msra.mxu1 %v2286_v59 }
 0x37c   :  { %1164 = vmatprep.subr.bf16.mxu0 %v2293_v60  ;;  %1205 = vmatprep.subr.bf16.mxu1 %v2298_v61 }
 0x37f   :  { %1165 = vmatpush1.bf16.msra.mxu0 %v2310_v63  ;;  %1206 = vmatpush1.bf16.msra.mxu1 %v2315_v0 }
 0x380   :  { %1166 = vmatprep.subr.bf16.mxu0 %v2322_v2  ;;  %1207 = vmatprep.subr.bf16.mxu1 %v2327_v3 }
 0x383   :  { %1167 = vmatpush1.bf16.msra.mxu0 %v2334_v4  ;;  %1208 = vmatpush1.bf16.msra.mxu1 %v2339_v5 }
 0x384   :  { %1278 = vmatprep.subr.bf16.mxu0 %v2138_v33  ;;  %1319 = vmatprep.subr.bf16.mxu1 %v2143_v34 }
 0x439   :  { %v1060_v22 = vpop.f32.mrb[28].mxu0  ;;  %v1101_v16 = vpop.f32.mrb[28].mxu1 }
 0x43a   :  { %v1108_v17 = vadd.f32 %v1060_v22, %v2930_v18  ;;  %v1110_v1 = vadd.f32 %v1101_v16, %v2931_v19  ;;  %v1062_v20 = vpop.f32.mrb[29].mxu0  ;;  %v1103_v21 = vpop.f32.mrb[29].mxu1 }
 0x43b   :  { %v1109_v9 = vadd.f32 %v1062_v20, %v2932_v27  ;;  %v1111_v24 = vadd.f32 %v1103_v21, %v2933_v53  ;;  %v1064_v26 = vpop.f32.mrb[30].mxu0  ;;  %v1105_v28 = vpop.f32.mrb[30].mxu1 }
 0x43c   :  { %v1729_v25 = vmul.f32 -1.442695, %v1108_v17  ;;  %v1065_v29 = vpop.f32.mrb[31].mxu0  ;;  %v1106_v32 = vpop.f32.mrb[31].mxu1  ;;  %v2667_v28 = vld [vmem:[%s2902_s2] ss:$16 sps:$4 sm:$0xff]  }
 0x43d   :  { %v1730_v33 = vmul.f32 -1.442695, %v1109_v9  ;;  %v1731_v34 = vmul.f32 -1.442695, %v1111_v24  ;;  %v2679_v29 = vld [vmem:[%s2902_s2 + $0x24] ss:$16 sps:$4 sm:$0xff]  }
 0x43e   :  { %1898 = vpow2.f32 %v1729_v25  ;;  %v2673_v25 = vld [vmem:[%s2902_s2 + $0x8] ss:$16 sps:$4 sm:$0xff]   ;;  %v2685_v32 = vld [vmem:[%s2902_s2 + $0x2c] ss:$16 sps:$4 sm:$0xff]  }
 0x43f   :  { %1900 = vpow2.f32 %v1730_v33  ;;  %v2693_v33 = vld [vmem:[%s2902_s2 + $0x20] ss:$16 sps:$4 sm:$0xff]  }
 0x440   :  { %1902 = vpow2.f32 %v1731_v34  ;;  %v2699_v34 = vld [vmem:[%s2902_s2 + $0x28] ss:$16 sps:$4 sm:$0xff]  }
 0x441   :  { %1904 = vtanh.f32 %v1110_v1 }
 0x448   :  { %v1899_v44 = vpop.eup %1898 }
 0x449   :  { %v1901_v62 = vpop.eup %1900  ;;  %v1115_v11 = vadd.f32 1.0, %v1899_v44  ;;  %v2705_v44 = vld [vmem:[%s2902_s2 + $0x44] ss:$16 sps:$4 sm:$0xff]  }
 0x44a   :  { %v1121_v35 = vadd.f32 1.0, %v1901_v62  ;;  %v1903_v10 = vpop.eup %1902  ;;  %v2711_v62 = vld [vmem:[%s2902_s2 + $0x4c] ss:$16 sps:$4 sm:$0xff]  }
 0x44b   :  { %1906 = vrcp.f32 %v1115_v11  ;;  %v1905_v30 = vpop.eup %1904  ;;  %v1128_v31 = vadd.f32 1.0, %v1903_v10  ;;  %v2717_v11 = vld [vmem:[%s2902_s2 + $0x40] ss:$16 sps:$4 sm:$0xff]   ;;  %v2729_v10 = vld [vmem:[%s2902_s2 + $0x64] ss:$16 sps:$4 sm:$0xff]  }
 0x44c   :  { %1908 = vrcp.f32 %v1121_v35  ;;  %v2723_v35 = vld [vmem:[%s2902_s2 + $0x48] ss:$16 sps:$4 sm:$0xff]  }
 0x44d   :  { %1910 = vrcp.f32 %v1128_v31  ;;  %v2759_v31 = vld [vmem:[%s2902_s2 + $0x8c] ss:$16 sps:$4 sm:$0xff]  }
 0x455   :  { %v1907_v6 = vpop.eup %1906 }
 0x456   :  { %v1909_v8 = vpop.eup %1908  ;;  %v1133_v23 = vmul.f32 %v1907_v6, %v1905_v30  ;;  %v2735_v30 = vld [vmem:[%s2902_s2 + $0x6c] ss:$16 sps:$4 sm:$0xff]   ;;  %v2741_v6 = vld [vmem:[%s2902_s2 + $0x60] ss:$16 sps:$4 sm:$0xff]  }
 0x457   :  { %v1132_v7 = vmul.f32 %v1909_v8, %v2558_v12  ;;  %v1911_v14 = vpop.eup %1910  ;;  %v2747_v8 = vld [vmem:[%s2902_s2 + $0x68] ss:$16 sps:$4 sm:$0xff]  }
 0x459   :  { %v2603_v15 = vadd.f32 %v1133_v23, %v1132_v7  ;;  %v2753_v23 = vld [vmem:[%s2902_s2 + $0x84] ss:$16 sps:$4 sm:$0xff]   ;;  %v2765_v7 = vld [vmem:[%s2902_s2 + $0x80] ss:$16 sps:$4 sm:$0xff]  }
 0x45b   :  { %1912 = vtanh.f32 %v2603_v15 }
 0x465   :  { %v1913_v22 = vpop.eup %1912 }
 0x466   :  { %v1136_v16 = vmul.f32 %v1913_v22, %v1911_v14  ;;  %v2777_v14 = vld [vmem:[%s2902_s2 + $0xa4] ss:$16 sps:$4 sm:$0xff]   ;;  %v2783_v22 = vld [vmem:[%s2902_s2 + $0xac] ss:$16 sps:$4 sm:$0xff]  }
 0x468   :  { %v1138_v18 = vpack.c.bf16 %v1136_v16, %v1136_v16  ;;  %1732 = vst [vmem:[%s2904_s4 + $0x18] sm:$0xff] %v1136_v16  ;;  %v2789_v16 = vld [vmem:[%s2902_s2 + $0xa0] ss:$16 sps:$4 sm:$0xff]  }
 0x46a   :  { %1139 = vst [vmem:[#allocation3] sm:$0xf] %v1138_v18  ;;  %v2795_v18 = vld [vmem:[%s2902_s2 + $0xa8] ss:$16 sps:$4 sm:$0xff]  }
 0x471   :  { %v1151_v17 = vld [vmem:[#allocation3] sm:$0xf] }
 0x472   :  { %1185 = vmatmul.mubr.bf16.vlgmr.msra.gmra.mrb[32].mxu0 %v1151_v17  ;;  %1226 = vmatmul.mubr.bf16.vlgmr.msra.gmra.mrb[32].mxu1 %v1151_v17  ;;  %v2801_v17 = vld [vmem:[%s2902_s2 + $0xc4] ss:$16 sps:$4 sm:$0xff]  }
 0x473   :  { %1279 = vmatpush1.bf16.msra.mxu0 %v2151_v36  ;;  %1320 = vmatpush1.bf16.msra.mxu1 %v2156_v37  ;;  %v2644_v36 = vld [vmem:[%s2902_s2 + $0x4] ss:$16 sps:$4 sm:$0xff]   ;;  %v2650_v37 = vld [vmem:[%s2902_s2 + $0xc] ss:$16 sps:$4 sm:$0xff]  }
 0x474   :  { %1280 = vmatprep.subr.bf16.mxu0 %v2163_v38  ;;  %1321 = vmatprep.subr.bf16.mxu1 %v2168_v39 }
 0x475   :  { %1310 = vmatprep.mubr.bf16.mxu0 %v2928_v13  ;;  %1351 = vmatprep.mubr.bf16.mxu1 %v2928_v13 }
 0x477   :  { %1281 = vmatpush1.bf16.msra.mxu0 %v2173_v40  ;;  %1322 = vmatpush1.bf16.msra.mxu1 %v2180_v41  ;;  %v2934_v40 = vld [vmem:[#allocation10_spill] sm:$0xff] }
 0x478   :  { %1282 = vmatprep.subr.bf16.mxu0 %v2187_v42  ;;  %1323 = vmatprep.subr.bf16.mxu1 %v2192_v43  ;;  %v2935_v42 = vld [vmem:[#allocation11_spill] sm:$0xff] }
 0x47b   :  { %1283 = vmatpush1.bf16.msra.mxu0 %v2202_v45  ;;  %1324 = vmatpush1.bf16.msra.mxu1 %v2207_v46 }
 0x47c   :  { %1284 = vmatprep.subr.bf16.mxu0 %v2214_v47  ;;  %1325 = vmatprep.subr.bf16.mxu1 %v2221_v48  ;;  %v2936_v47 = vld [vmem:[#allocation12_spill] sm:$0xff] }
 0x47f   :  { %1285 = vmatpush1.bf16.msra.mxu0 %v2226_v49  ;;  %1326 = vmatpush1.bf16.msra.mxu1 %v2231_v50  ;;  %v2937_v49 = vld [vmem:[#allocation13_spill] sm:$0xff] }
 0x480   :  { %1286 = vmatprep.subr.bf16.mxu0 %v2238_v51  ;;  %1327 = vmatprep.subr.bf16.mxu1 %v2245_v52 }
 0x483   :  { %1287 = vmatpush1.bf16.msra.mxu0 %v2257_v54  ;;  %1328 = vmatpush1.bf16.msra.mxu1 %v2262_v55 }
 0x484   :  { %1288 = vmatprep.subr.bf16.mxu0 %v2269_v56  ;;  %1329 = vmatprep.subr.bf16.mxu1 %v2274_v57 }
 0x487   :  { %1289 = vmatpush1.bf16.msra.mxu0 %v2281_v58  ;;  %1330 = vmatpush1.bf16.msra.mxu1 %v2286_v59 }
 0x488   :  { %1290 = vmatprep.subr.bf16.mxu0 %v2293_v60  ;;  %1331 = vmatprep.subr.bf16.mxu1 %v2298_v61 }
 0x48b   :  { %1291 = vmatpush1.bf16.msra.mxu0 %v2310_v63  ;;  %1332 = vmatpush1.bf16.msra.mxu1 %v2315_v0 }
 0x48c   :  { %1292 = vmatprep.subr.bf16.mxu0 %v2322_v2  ;;  %1333 = vmatprep.subr.bf16.mxu1 %v2327_v3 }
 0x48f   :  { %1293 = vmatpush1.bf16.msra.mxu0 %v2334_v4  ;;  %1334 = vmatpush1.bf16.msra.mxu1 %v2339_v5 }
 0x490   :  { %1404 = vmatprep.subr.bf16.mxu0 %v2644_v36  ;;  %1445 = vmatprep.subr.bf16.mxu1 %v2650_v37 }
 0x545   :  { %v1186_v38 = vpop.f32.mrb[32].mxu0  ;;  %v1227_v39 = vpop.f32.mrb[32].mxu1 }
 0x546   :  { %v1234_v41 = vadd.f32 %v1186_v38, %v2934_v40  ;;  %v1236_v43 = vadd.f32 %v1227_v39, %v2935_v42  ;;  %v1188_v45 = vpop.f32.mrb[33].mxu0  ;;  %v1229_v46 = vpop.f32.mrb[33].mxu1  ;;  %v2807_v38 = vld [vmem:[%s2902_s2 + $0xcc] ss:$16 sps:$4 sm:$0xff]   ;;  %v2813_v39 = vld [vmem:[%s2902_s2 + $0xc0] ss:$16 sps:$4 sm:$0xff]  }
 0x547   :  { %v1235_v48 = vadd.f32 %v1188_v45, %v2936_v47  ;;  %v1237_v50 = vadd.f32 %v1229_v46, %v2937_v49  ;;  %v1190_v51 = vpop.f32.mrb[34].mxu0  ;;  %v1231_v52 = vpop.f32.mrb[34].mxu1  ;;  %v2819_v40 = vld [vmem:[%s2902_s2 + $0xc8] ss:$16 sps:$4 sm:$0xff]   ;;  %v2831_v42 = vld [vmem:[%s2902_s2 + $0xec] ss:$16 sps:$4 sm:$0xff]  }
 0x548   :  { %v1733_v54 = vmul.f32 -1.442695, %v1234_v41  ;;  %v1191_v55 = vpop.f32.mrb[35].mxu0  ;;  %v1232_v56 = vpop.f32.mrb[35].mxu1  ;;  %v2825_v41 = vld [vmem:[%s2902_s2 + $0xe4] ss:$16 sps:$4 sm:$0xff]  }
 0x549   :  { %v1734_v57 = vmul.f32 -1.442695, %v1235_v48  ;;  %v1735_v58 = vmul.f32 -1.442695, %v1237_v50  ;;  %v2938_v46 = vld [vmem:[#allocation14_spill] sm:$0xff]  ;;  %v2939_v48 = vld [vmem:[#allocation15_spill] sm:$0xff] }
 0x54a   :  { %1914 = vpow2.f32 %v1733_v54  ;;  %v2940_v52 = vld [vmem:[#allocation16_spill] sm:$0xff]  ;;  %v2941_v55 = vld [vmem:[#allocation17_spill] sm:$0xff] }
 0x54b   :  { %1916 = vpow2.f32 %v1734_v57 }
 0x54c   :  { %1918 = vpow2.f32 %v1735_v58 }
 0x54d   :  { %1920 = vtanh.f32 %v1236_v43 }
 0x554   :  { %v1915_v59 = vpop.eup %1914 }
 0x555   :  { %v1917_v60 = vpop.eup %1916  ;;  %v1241_v61 = vadd.f32 1.0, %v1915_v59 }
 0x556   :  { %v1247_v63 = vadd.f32 1.0, %v1917_v60  ;;  %v1919_v0 = vpop.eup %1918 }
 0x557   :  { %1922 = vrcp.f32 %v1241_v61  ;;  %v1921_v2 = vpop.eup %1920  ;;  %v1254_v1 = vadd.f32 1.0, %v1919_v0 }
 0x558   :  { %1924 = vrcp.f32 %v1247_v63 }
 0x559   :  { %1926 = vrcp.f32 %v1254_v1 }
 0x561   :  { %v1923_v3 = vpop.eup %1922 }
 0x562   :  { %v1925_v12 = vpop.eup %1924  ;;  %v1259_v19 = vmul.f32 %v1923_v3, %v1921_v2 }
 0x563   :  { %v1258_v20 = vmul.f32 %v1925_v12, %v2603_v15  ;;  %v1927_v27 = vpop.eup %1926  ;;  %v2771_v15 = vld [vmem:[%s2902_s2 + $0x88] ss:$16 sps:$4 sm:$0xff]  }
 0x565   :  { %v2658_v21 = vadd.f32 %v1259_v19, %v1258_v20 }
 0x567   :  { %1928 = vtanh.f32 %v2658_v21 }
 0x571   :  { %v1929_v9 = vpop.eup %1928 }
 0x572   :  { %v1262_v53 = vmul.f32 %v1929_v9, %v1927_v27 }
 0x574   :  { %v1264_v24 = vpack.c.bf16 %v1262_v53, %v1262_v53  ;;  %1736 = vst [vmem:[%s2904_s4 + $0x20] sm:$0xff] %v1262_v53 }
 0x576   :  { %1265 = vst [vmem:[#allocation3] sm:$0xf] %v1264_v24 }
 0x57d   :  { %v1277_v26 = vld [vmem:[#allocation3] sm:$0xf] }
 0x57e   :  { %1311 = vmatmul.mubr.bf16.vlgmr.msra.gmra.mrb[36].mxu0 %v1277_v26  ;;  %1352 = vmatmul.mubr.bf16.vlgmr.msra.gmra.mrb[36].mxu1 %v1277_v26 }
 0x57f   :  { %1405 = vmatpush1.bf16.msra.mxu0 %v2667_v28  ;;  %1446 = vmatpush1.bf16.msra.mxu1 %v2673_v25 }
 0x580   :  { %1406 = vmatprep.subr.bf16.mxu0 %v2679_v29  ;;  %1447 = vmatprep.subr.bf16.mxu1 %v2685_v32 }
 0x581   :  { %1436 = vmatprep.mubr.bf16.mxu0 %v2928_v13  ;;  %1477 = vmatprep.mubr.bf16.mxu1 %v2928_v13 }
 0x583   :  { %1407 = vmatpush1.bf16.msra.mxu0 %v2693_v33  ;;  %1448 = vmatpush1.bf16.msra.mxu1 %v2699_v34 }
 0x584   :  { %1408 = vmatprep.subr.bf16.mxu0 %v2705_v44  ;;  %1449 = vmatprep.subr.bf16.mxu1 %v2711_v62 }
 0x587   :  { %1409 = vmatpush1.bf16.msra.mxu0 %v2717_v11  ;;  %1450 = vmatpush1.bf16.msra.mxu1 %v2723_v35 }
 0x588   :  { %1410 = vmatprep.subr.bf16.mxu0 %v2729_v10  ;;  %1451 = vmatprep.subr.bf16.mxu1 %v2735_v30 }
 0x58b   :  { %1411 = vmatpush1.bf16.msra.mxu0 %v2741_v6  ;;  %1452 = vmatpush1.bf16.msra.mxu1 %v2747_v8 }
 0x58c   :  { %1412 = vmatprep.subr.bf16.mxu0 %v2753_v23  ;;  %1453 = vmatprep.subr.bf16.mxu1 %v2759_v31 }
 0x58f   :  { %1413 = vmatpush1.bf16.msra.mxu0 %v2765_v7  ;;  %1454 = vmatpush1.bf16.msra.mxu1 %v2771_v15 }
 0x590   :  { %1414 = vmatprep.subr.bf16.mxu0 %v2777_v14  ;;  %1455 = vmatprep.subr.bf16.mxu1 %v2783_v22 }
 0x593   :  { %1415 = vmatpush1.bf16.msra.mxu0 %v2789_v16  ;;  %1456 = vmatpush1.bf16.msra.mxu1 %v2795_v18 }
 0x594   :  { %1416 = vmatprep.subr.bf16.mxu0 %v2801_v17  ;;  %1457 = vmatprep.subr.bf16.mxu1 %v2807_v38 }
 0x597   :  { %1417 = vmatpush1.bf16.msra.mxu0 %v2813_v39  ;;  %1458 = vmatpush1.bf16.msra.mxu1 %v2819_v40 }
 0x598   :  { %1418 = vmatprep.subr.bf16.mxu0 %v2825_v41  ;;  %1459 = vmatprep.subr.bf16.mxu1 %v2831_v42 }
 0x59b   :  { %1419 = vmatpush1.bf16.msra.mxu0 %v2334_v4  ;;  %1460 = vmatpush1.bf16.msra.mxu1 %v2339_v5 }
 0x59c   :  { %1530 = vmatprep.subr.bf16.mxu0 %v2644_v36  ;;  %1571 = vmatprep.subr.bf16.mxu1 %v2650_v37 }
 0x651   :  { %v1312_v43 = vpop.f32.mrb[36].mxu0  ;;  %v1353_v45 = vpop.f32.mrb[36].mxu1 }
 0x652   :  { %v1360_v47 = vadd.f32 %v1312_v43, %v2938_v46  ;;  %v1362_v49 = vadd.f32 %v1353_v45, %v2939_v48  ;;  %v1314_v50 = vpop.f32.mrb[37].mxu0  ;;  %v1355_v51 = vpop.f32.mrb[37].mxu1 }
 0x653   :  { %v1361_v54 = vadd.f32 %v1314_v50, %v2940_v52  ;;  %v1363_v56 = vadd.f32 %v1355_v51, %v2941_v55  ;;  %v1316_v57 = vpop.f32.mrb[38].mxu0  ;;  %v1357_v4 = vpop.f32.mrb[38].mxu1 }
 0x654   :  { %v1737_v58 = vmul.f32 -1.442695, %v1360_v47  ;;  %v1317_v5 = vpop.f32.mrb[39].mxu0  ;;  %v1358_v59 = vpop.f32.mrb[39].mxu1  ;;  %v2946_v57 = vld [vmem:[#allocation22_spill] sm:$0xff] }
 0x655   :  { %v1738_v36 = vmul.f32 -1.442695, %v1361_v54  ;;  %v1739_v37 = vmul.f32 -1.442695, %v1363_v56 }
 0x656   :  { %1930 = vpow2.f32 %v1737_v58  ;;  %v2947_v58 = vld [vmem:[#allocation23_spill] sm:$0xff] }
 0x657   :  { %1932 = vpow2.f32 %v1738_v36 }
 0x658   :  { %1934 = vpow2.f32 %v1739_v37  ;;  %v2948_v37 = vld [vmem:[#allocation24_spill] sm:$0xff] }
 0x659   :  { %1936 = vtanh.f32 %v1362_v49 }
 0x660   :  { %v1931_v60 = vpop.eup %1930 }
 0x661   :  { %v1933_v61 = vpop.eup %1932  ;;  %v1367_v63 = vadd.f32 1.0, %v1931_v60 }
 0x662   :  { %v1373_v0 = vadd.f32 1.0, %v1933_v61  ;;  %v1935_v2 = vpop.eup %1934  ;;  %v2949_v61 = vld [vmem:[#allocation25_spill] sm:$0xff] }
 0x663   :  { %1938 = vrcp.f32 %v1367_v63  ;;  %v1937_v3 = vpop.eup %1936  ;;  %v1380_v20 = vadd.f32 1.0, %v1935_v2 }
 0x664   :  { %1940 = vrcp.f32 %v1373_v0 }
 0x665   :  { %1942 = vrcp.f32 %v1380_v20 }
 0x66d   :  { %v1939_v12 = vpop.eup %1938 }
 0x66e   :  { %v1941_v19 = vpop.eup %1940  ;;  %v1385_v1 = vmul.f32 %v1939_v12, %v1937_v3 }
 0x66f   :  { %v1384_v27 = vmul.f32 %v1941_v19, %v2658_v21  ;;  %v1943_v53 = vpop.eup %1942  ;;  %v2009_v21 = vld [vmem:[%s2902_s2 + $0xe8] ss:$16 sps:$4 sm:$0xff]  }
 0x671   :  { %v2843_v9 = vadd.f32 %v1385_v1, %v1384_v27 }
 0x673   :  { %1944 = vtanh.f32 %v2843_v9 }
 0x67d   :  { %v1945_v24 = vpop.eup %1944 }
 0x67e   :  { %v1388_v26 = vmul.f32 %v1945_v24, %v1943_v53 }
 0x680   :  { %v1390_v43 = vpack.c.bf16 %v1388_v26, %v1388_v26  ;;  %1740 = vst [vmem:[%s2904_s4 + $0x28] sm:$0xff] %v1388_v26 }
 0x682   :  { %1391 = vst [vmem:[#allocation3] sm:$0xf] %v1390_v43 }
 0x689   :  { %v1403_v45 = vld [vmem:[#allocation3] sm:$0xf] }
 0x68a   :  { %1437 = vmatmul.mubr.bf16.vlgmr.msra.gmra.mrb[40].mxu0 %v1403_v45  ;;  %1478 = vmatmul.mubr.bf16.vlgmr.msra.gmra.mrb[40].mxu1 %v1403_v45 }
 0x68b   :  { %1531 = vmatpush1.bf16.msra.mxu0 %v2667_v28  ;;  %1572 = vmatpush1.bf16.msra.mxu1 %v2673_v25 }
 0x68c   :  { %1532 = vmatprep.subr.bf16.mxu0 %v2679_v29  ;;  %1573 = vmatprep.subr.bf16.mxu1 %v2685_v32  ;;  %v2942_v29 = vld [vmem:[#allocation18_spill] sm:$0xff] }
 0x68d   :  { %1562 = vmatprep.mubr.bf16.mxu0 %v2928_v13  ;;  %1603 = vmatprep.mubr.bf16.mxu1 %v2928_v13  ;;  %v2008_v13 = vld [vmem:[%s2902_s2 + $0xe0] ss:$16 sps:$4 sm:$0xff]  }
 0x68f   :  { %1533 = vmatpush1.bf16.msra.mxu0 %v2693_v33  ;;  %1574 = vmatpush1.bf16.msra.mxu1 %v2699_v34  ;;  %v2943_v33 = vld [vmem:[#allocation19_spill] sm:$0xff] }
 0x690   :  { %1534 = vmatprep.subr.bf16.mxu0 %v2705_v44  ;;  %1575 = vmatprep.subr.bf16.mxu1 %v2711_v62 }
 0x693   :  { %1535 = vmatpush1.bf16.msra.mxu0 %v2717_v11  ;;  %1576 = vmatpush1.bf16.msra.mxu1 %v2723_v35  ;;  %v2944_v11 = vld [vmem:[#allocation20_spill] sm:$0xff] }
 0x694   :  { %1536 = vmatprep.subr.bf16.mxu0 %v2729_v10  ;;  %1577 = vmatprep.subr.bf16.mxu1 %v2735_v30  ;;  %v2945_v10 = vld [vmem:[#allocation21_spill] sm:$0xff] }
 0x697   :  { %1537 = vmatpush1.bf16.msra.mxu0 %v2741_v6  ;;  %1578 = vmatpush1.bf16.msra.mxu1 %v2747_v8 }
 0x698   :  { %1538 = vmatprep.subr.bf16.mxu0 %v2753_v23  ;;  %1579 = vmatprep.subr.bf16.mxu1 %v2759_v31 }
 0x69b   :  { %1539 = vmatpush1.bf16.msra.mxu0 %v2765_v7  ;;  %1580 = vmatpush1.bf16.msra.mxu1 %v2771_v15 }
 0x69c   :  { %1540 = vmatprep.subr.bf16.mxu0 %v2777_v14  ;;  %1581 = vmatprep.subr.bf16.mxu1 %v2783_v22 }
 0x69f   :  { %1541 = vmatpush1.bf16.msra.mxu0 %v2789_v16  ;;  %1582 = vmatpush1.bf16.msra.mxu1 %v2795_v18 }
 0x6a0   :  { %1542 = vmatprep.subr.bf16.mxu0 %v2801_v17  ;;  %1583 = vmatprep.subr.bf16.mxu1 %v2807_v38 }
 0x6a3   :  { %1543 = vmatpush1.bf16.msra.mxu0 %v2813_v39  ;;  %1584 = vmatpush1.bf16.msra.mxu1 %v2819_v40 }
 0x6a4   :  { %1544 = vmatprep.subr.bf16.mxu0 %v2825_v41  ;;  %1585 = vmatprep.subr.bf16.mxu1 %v2831_v42 }
 0x6a7   :  { %1545 = vmatpush1.bf16.msra.mxu0 %v2008_v13  ;;  %1586 = vmatpush1.bf16.msra.mxu1 %v2009_v21 }
 0x75d   :  { %v1438_v28 = vpop.f32.mrb[40].mxu0  ;;  %v1479_v25 = vpop.f32.mrb[40].mxu1 }
 0x75e   :  { %v1486_v32 = vadd.f32 %v1438_v28, %v2942_v29  ;;  %v1488_v34 = vadd.f32 %v1479_v25, %v2943_v33  ;;  %v1440_v44 = vpop.f32.mrb[41].mxu0  ;;  %v1481_v62 = vpop.f32.mrb[41].mxu1 }
 0x75f   :  { %v1487_v35 = vadd.f32 %v1440_v44, %v2944_v11  ;;  %v1489_v30 = vadd.f32 %v1481_v62, %v2945_v10  ;;  %v1442_v6 = vpop.f32.mrb[42].mxu0  ;;  %v1483_v8 = vpop.f32.mrb[42].mxu1 }
 0x760   :  { %v1741_v23 = vmul.f32 -1.442695, %v1486_v32  ;;  %v1443_v31 = vpop.f32.mrb[43].mxu0  ;;  %v1484_v7 = vpop.f32.mrb[43].mxu1 }
 0x761   :  { %v1742_v15 = vmul.f32 -1.442695, %v1487_v35  ;;  %v1743_v14 = vmul.f32 -1.442695, %v1489_v30 }
 0x762   :  { %1946 = vpow2.f32 %v1741_v23 }
 0x763   :  { %1948 = vpow2.f32 %v1742_v15 }
 0x764   :  { %1950 = vpow2.f32 %v1743_v14 }
 0x765   :  { %1952 = vtanh.f32 %v1488_v34 }
 0x76c   :  { %v1947_v22 = vpop.eup %1946 }
 0x76d   :  { %v1949_v16 = vpop.eup %1948  ;;  %v1493_v18 = vadd.f32 1.0, %v1947_v22 }
 0x76e   :  { %v1499_v17 = vadd.f32 1.0, %v1949_v16  ;;  %v1951_v38 = vpop.eup %1950 }
 0x76f   :  { %1954 = vrcp.f32 %v1493_v18  ;;  %v1953_v39 = vpop.eup %1952  ;;  %v1506_v46 = vadd.f32 1.0, %v1951_v38 }
 0x770   :  { %1956 = vrcp.f32 %v1499_v17 }
 0x771   :  { %1958 = vrcp.f32 %v1506_v46 }
 0x779   :  { %v1955_v40 = vpop.eup %1954 }
 0x77a   :  { %v1957_v41 = vpop.eup %1956  ;;  %v1511_v42 = vmul.f32 %v1955_v40, %v1953_v39 }
 0x77b   :  { %v1510_v47 = vmul.f32 %v1957_v41, %v2843_v9  ;;  %v1959_v49 = vpop.eup %1958 }
 0x77d   :  { %v1512_v48 = vadd.f32 %v1511_v42, %v1510_v47 }
 0x77f   :  { %1960 = vtanh.f32 %v1512_v48 }
 0x789   :  { %v1961_v50 = vpop.eup %1960 }
 0x78a   :  { %v1514_v51 = vmul.f32 %v1961_v50, %v1959_v49 }
 0x78c   :  { %v1516_v52 = vpack.c.bf16 %v1514_v51, %v1514_v51  ;;  %1744 = vst [vmem:[%s2904_s4 + $0x30] sm:$0xff] %v1514_v51 }
 0x78e   :  { %1517 = vst [vmem:[#allocation3] sm:$0xf] %v1516_v52 }
 0x795   :  { %v1529_v54 = vld [vmem:[#allocation3] sm:$0xf] }
 0x796   :  { %1563 = vmatmul.mubr.bf16.vlgmr.msra.gmra.mrb[44].mxu0 %v1529_v54  ;;  %1604 = vmatmul.mubr.bf16.vlgmr.msra.gmra.mrb[44].mxu1 %v1529_v54 }
 0x869   :  { %v1564_v55 = vpop.f32.mrb[44].mxu0  ;;  %v1605_v56 = vpop.f32.mrb[44].mxu1 }
 0x86a   :  { %v1612_v4 = vadd.f32 %v1564_v55, %v2946_v57  ;;  %v1614_v5 = vadd.f32 %v1605_v56, %v2947_v58  ;;  %v1566_v59 = vpop.f32.mrb[45].mxu0  ;;  %v1607_v36 = vpop.f32.mrb[45].mxu1 }
 0x86b   :  { %v1613_v60 = vadd.f32 %v1566_v59, %v2948_v37  ;;  %v1615_v63 = vadd.f32 %v1607_v36, %v2949_v61  ;;  %v1568_v0 = vpop.f32.mrb[46].mxu0  ;;  %v1609_v2 = vpop.f32.mrb[46].mxu1 }
 0x86c   :  { %v1745_v3 = vmul.f32 -1.442695, %v1612_v4  ;;  %v1569_v12 = vpop.f32.mrb[47].mxu0  ;;  %v1610_v19 = vpop.f32.mrb[47].mxu1 }
 0x86d   :  { %v1746_v1 = vmul.f32 -1.442695, %v1613_v60  ;;  %v1747_v20 = vmul.f32 -1.442695, %v1615_v63 }
 0x86e   :  { %1962 = vpow2.f32 %v1745_v3 }
 0x86f   :  { %1964 = vpow2.f32 %v1746_v1 }
 0x870   :  { %1966 = vpow2.f32 %v1747_v20 }
 0x871   :  { %1968 = vtanh.f32 %v1614_v5 }
 0x878   :  { %v1963_v27 = vpop.eup %1962 }
 0x879   :  { %v1965_v9 = vpop.eup %1964  ;;  %v1619_v53 = vadd.f32 1.0, %v1963_v27 }
 0x87a   :  { %v1625_v24 = vadd.f32 1.0, %v1965_v9  ;;  %v1967_v26 = vpop.eup %1966 }
 0x87b   :  { %1970 = vrcp.f32 %v1619_v53  ;;  %v1969_v43 = vpop.eup %1968  ;;  %v1632_v28 = vadd.f32 1.0, %v1967_v26 }
 0x87c   :  { %1972 = vrcp.f32 %v1625_v24 }
 0x87d   :  { %1974 = vrcp.f32 %v1632_v28 }
 0x885   :  { %v1971_v45 = vpop.eup %1970 }
 0x886   :  { %v1973_v13 = vpop.eup %1972  ;;  %v1637_v21 = vmul.f32 %v1971_v45, %v1969_v43 }
 0x887   :  { %v1636_v25 = vmul.f32 %v1973_v13, %v1512_v48  ;;  %v1975_v32 = vpop.eup %1974 }
 0x889   :  { %v1638_v29 = vadd.f32 %v1637_v21, %v1636_v25 }
 0x88b   :  { %1976 = vtanh.f32 %v1638_v29 }
 0x895   :  { %v1977_v33 = vpop.eup %1976 }
 0x896   :  { %v1640_v34 = vmul.f32 %v1977_v33, %v1975_v32 }
 0x898   :  { %v1642_v44 = vpack.c.bf16 %v1640_v34, %v1640_v34  ;;  %1748 = vst [vmem:[%s2904_s4 + $0x38] sm:$0xff] %v1640_v34 }
 0x89a   :  { %1643 = vst [vmem:[#allocation3] sm:$0xf] %v1642_v44 }

</bundles_post_ra>
